<compile_context>
chip_gen: v7x
topology: tpu7x:2x2x1
jax: 0.10.0
libtpu: 0.0.40
codegen_flags: <defaults>
</compile_context>

<pallas_src>
import functools

import numpy as np
import jax
import jax.numpy as jnp
from jax.experimental import pallas as pl
from jax.experimental.pallas import tpu as pltpu


_ACTS = {
    "relu": lambda v: jnp.maximum(v, 0.0),
    "identity": lambda v: v,
    "sigmoid": jax.nn.sigmoid,
    "tanh": jnp.tanh,
    "gelu": lambda v: jax.nn.gelu(v, approximate=False),   # match torch.nn.GELU (erf form)
}


def _conv_bn_act_kernel(x_ref, w_ref, b_ref, out_ref, *, kh, kw, ho, wo, stride, cin, activ):
    """One (batch-tile, cout-tile) step: per-tap MXU accumulation -> folded-BN bias -> activation."""
    xs = x_ref[...]                         # (bt, H2, W2, s*s*Cin); space-to-depth layout if stride>1
    wm = w_ref[...]                         # (kh*kw*Cin, tn); BN scale already folded in
    b = b_ref[...]                          # (1, tn) f32 folded BN shift (+ conv bias)
    bt = xs.shape[0]
    tn = wm.shape[1]
    m = bt * ho * wo

    acc = jnp.zeros((m, tn), jnp.float32)
    for dy in range(kh):                    # unrolled at trace time: kh*kw small matmuls on the MXU
        qy, ry = divmod(dy, stride)
        for dx in range(kw):
            qx, rx = divmod(dx, stride)
            c0 = (ry * stride + rx) * cin   # channel offset inside the space-to-depth packing
            tap = xs[:, qy:qy + ho, qx:qx + wo, c0:c0 + cin].reshape(m, cin)
            w_tap = wm[(dy * kw + dx) * cin:(dy * kw + dx + 1) * cin, :]
            acc = acc + jnp.dot(tap, w_tap, preferred_element_type=jnp.float32)

    y = _ACTS[activ](acc + b)
    out_ref[...] = y.reshape(bt, ho, wo, tn).astype(out_ref.dtype)


def _vmem_limits():
    """(scoped_vmem_limit_bytes, tile_picking_budget_bytes), generation-aware with safe fallback."""
    cap = 64 << 20                                           # v7x-safe fallback
    try:
        info = pltpu.get_tpu_info()
        cap = int(getattr(info, "vmem_capacity_bytes", cap)) or cap
    except Exception:
        pass
    scoped = min((cap * 3) // 4, 112 << 20)                  # leave headroom for compiler scratch
    budget = (scoped * 3) // 4                               # what _pick_b_tile may account for
    return int(scoped), int(budget)


def _pick_cout_tile(cout):
    if cout <= 256:
        return cout
    if cout % 256 == 0:                                      # match 2x256x256 MXU on v6e/v7x
        return 256
    if cout % 128 == 0:
        return 128
    return cout


def _pick_b_tile(n, h2, w2, c2, ho, wo, tn, krows, cin, in_isz, out_isz, budget, max_bt):
    """Largest batch-tile divisor of n whose honestly-accounted per-step VMEM fits the budget."""
    const = 2 * (krows * tn * in_isz + tn * 4)               # resident weight + bias (double-buffered)
    best = 1
    for bt in range(1, max_bt + 1):
        if n % bt:
            continue
        m = bt * ho * wo
        use = (2 * bt * h2 * w2 * c2 * in_isz                # input block, double-buffered
               + 2 * m * tn * out_isz                        # output block, double-buffered
               + m * tn * 4                                  # f32 accumulator value
               + 2 * m * cin * in_isz                        # per-tap slice + reshape temporaries
               + const)
        if use <= budget:
            best = bt
    return best


def conv2d_bn_activ(x, params, *, stride=1, padding=0, activ="relu", use_bn=True, eps=1e-5,
                    b_tile=None, compute_dtype=jnp.bfloat16, out_dtype=None, data_format="NCHW"):
    """Forward of Conv2dBNActiv.

    x: (N, Cin, H, W) if data_format=="NCHW" (PyTorch layout) else (N, H, W, Cin).
    Returns the same layout as the input.  BN is eval-mode, folded into the conv.
    """
    w = params["weight"].astype(jnp.float32)                 # (Cout, Cin, KH, KW), PyTorch OIHW
    cout, cin, kh, kw = w.shape

    if data_format == "NCHW":
        x_nhwc = jnp.transpose(x, (0, 2, 3, 1))
    else:                                                    # NHWC: no wrapper transposes at all
        x_nhwc = x
    n, h, wdt, cin_x = x_nhwc.shape
    assert cin_x == cin
    if out_dtype is None:
        out_dtype = x.dtype

    # Fold eval-mode BatchNorm (and optional conv bias) into a per-output-channel scale/shift.
    bias = params.get("bias", None)
    if use_bn:
        scale = params["gamma"] / jnp.sqrt(params["var"] + eps)
        shift = params["beta"] - params["mean"] * scale
        if bias is not None:
            shift = shift + bias * scale
    else:
        scale = jnp.ones((cout,), jnp.float32)
        shift = bias if bias is not None else jnp.zeros((cout,), jnp.float32)

    # Fold scale into the weight; im2col layout rows ordered (dy, dx, cin), columns = Cout.
    w_f = w * scale[:, None, None, None]
    wmat = jnp.transpose(w_f, (2, 3, 1, 0)).reshape(kh * kw * cin, cout).astype(compute_dtype)
    shift = shift.reshape(1, cout).astype(jnp.float32)

    ho = (h + 2 * padding - kh) // stride + 1
    wo = (wdt + 2 * padding - kw) // stride + 1

    # NHWC inside the kernel (channels on lanes); zero-pad spatially ONCE here.
    xc = x_nhwc.astype(compute_dtype)
    x_pad = jnp.pad(xc, ((0, 0), (padding, padding), (padding, padding), (0, 0)))
    hp, wp = h + 2 * padding, wdt + 2 * padding

    if stride > 1:
        # Space-to-depth so every in-kernel tap is a contiguous unit-stride slice.
        s = stride
        need_h = s * (ho + (kh - 1) // s)
        need_w = s * (wo + (kw - 1) // s)
        if need_h > hp or need_w > wp:
            x_pad = jnp.pad(x_pad, ((0, 0), (0, max(0, need_h - hp)),
                                    (0, max(0, need_w - wp)), (0, 0)))
        x_pad = x_pad[:, :need_h, :need_w, :]
        h2, w2 = need_h // s, need_w // s
        x_in = x_pad.reshape(n, h2, s, w2, s, cin)
        x_in = jnp.transpose(x_in, (0, 1, 3, 2, 4, 5)).reshape(n, h2, w2, s * s * cin)
        c2 = s * s * cin
    else:
        x_in, h2, w2, c2 = x_pad, hp, wp, cin

    tn = _pick_cout_tile(cout)
    assert cout % tn == 0
    nct = cout // tn

    scoped_vmem, budget = _vmem_limits()
    in_isz = jnp.dtype(compute_dtype).itemsize
    out_isz = jnp.dtype(out_dtype).itemsize
    if b_tile is None:
        # Keep >= 2 total grid steps when possible so both v7x TensorCores get work.
        max_bt = n if (nct >= 2 or n == 1) else max(1, n // 2)
        b_tile = _pick_b_tile(n, h2, w2, c2, ho, wo, tn, kh * kw * cin, cin,
                              in_isz, out_isz, budget, max_bt)
    assert n % b_tile == 0

    kernel = functools.partial(_conv_bn_act_kernel, kh=kh, kw=kw, ho=ho, wo=wo,
                               stride=stride, cin=cin, activ=activ)

    out = pl.pallas_call(
        kernel,
        out_shape=jax.ShapeDtypeStruct((n, ho, wo, cout), out_dtype),
        grid_spec=pltpu.PrefetchScalarGridSpec(
            num_scalar_prefetch=0,
            grid=(n // b_tile, nct),                         # batch tiles outer, Cout tiles inner
            in_specs=[
                # Input block depends only on i -> not re-DMA'd across the inner Cout axis.
                pl.BlockSpec((b_tile, h2, w2, c2), lambda i, j: (i, 0, 0, 0)),
                # Weight/bias slab per Cout tile; constant across the batch axis within each i.
                pl.BlockSpec((kh * kw * cin, tn), lambda i, j: (0, j)),
                pl.BlockSpec((1, tn), lambda i, j: (0, j)),
            ],
            out_specs=pl.BlockSpec((b_tile, ho, wo, tn), lambda i, j: (i, 0, 0, j)),
        ),
        compiler_params=pltpu.CompilerParams(
            dimension_semantics=("parallel", "parallel"),    # independent tiles -> megacore on v7x
            vmem_limit_bytes=scoped_vmem),
    )(x_in, wmat, shift)

    if data_format == "NCHW":
        return jnp.transpose(out, (0, 3, 1, 2))              # back to PyTorch NCHW
    return out


# ----------------------- pure-JAX reference (for verification) -----------------------
def reference_forward(x_nchw, params, *, stride=1, padding=0, activ="relu",
                      use_bn=True, eps=1e-5):
    y = jax.lax.conv_general_dilated(
        x_nchw.astype(jnp.float32), params["weight"].astype(jnp.float32),
        window_strides=(stride, stride),
        padding=((padding, padding), (padding, padding)),
        dimension_numbers=("NCHW", "OIHW", "NCHW"),
        precision=jax.lax.Precision.HIGHEST)
    if params.get("bias", None) is not None:
        y = y + params["bias"][None, :, None, None]
    if use_bn:
        inv = 1.0 / jnp.sqrt(params["var"] + eps)
        y = (y - params["mean"][None, :, None, None]) * inv[None, :, None, None]
        y = y * params["gamma"][None, :, None, None] + params["beta"][None, :, None, None]
    return _ACTS[activ](y)


# ----------------------- deterministic parameter init -----------------------
def init_params(key, cin, cout, k):
    kw_, kg, kb, km, kv = jax.random.split(key, 5)
    return {
        "weight": jax.random.normal(kw_, (cout, cin, k, k), jnp.float32) / np.sqrt(k * k * cin),
        "bias": None,                                        # Conv2dBNActiv default: bias=False
        "gamma": 1.0 + 0.1 * jax.random.normal(kg, (cout,), jnp.float32),
        "beta": 0.05 * jax.random.normal(kb, (cout,), jnp.float32),
        "mean": 0.1 * jax.random.normal(km, (cout,), jnp.float32),
        "var": jnp.abs(jax.random.normal(kv, (cout,), jnp.float32)) + 0.5,
    }


if __name__ == "__main__":
    # Lane-friendly small sizes: Cin=Cout=128, H=W=16, 3x3 'same' conv.
    N, CIN, COUT, H, W, K = 4, 128, 128, 16, 16, 3
    key = jax.random.PRNGKey(0)
    key, kx, kp = jax.random.split(key, 3)
    x = jax.random.normal(kx, (N, CIN, H, W), jnp.float32)
    params = init_params(kp, CIN, COUT, K)

    y_ref = reference_forward(x, params, stride=1, padding=1, activ="relu", use_bn=True)

    # (1) f32 debug path: tight correctness check.
    y32 = conv2d_bn_activ(x, params, stride=1, padding=1, activ="relu", use_bn=True,
                          compute_dtype=jnp.float32)
    y32 = jax.block_until_ready(y32)
    assert y32.shape == (N, COUT, H, W), y32.shape
    np.testing.assert_allclose(np.asarray(y32), np.asarray(y_ref), rtol=2e-2, atol=2e-2)

    # (2) default bf16-operand / f32-accumulation path (validates the new default).
    y16 = conv2d_bn_activ(x, params, stride=1, padding=1, activ="relu", use_bn=True)
    y16 = jax.block_until_ready(y16)
    assert y16.shape == (N, COUT, H, W), y16.shape
    np.testing.assert_allclose(np.asarray(y16), np.asarray(y_ref), rtol=1e-1, atol=1e-1)

    # (3) stride-2 path: wrapper-side space-to-depth, unit-stride taps inside the kernel.
    N2 = 2
    x2 = jax.random.normal(key, (N2, CIN, H, W), jnp.float32)
    y2_ref = reference_forward(x2, params, stride=2, padding=1, activ="relu", use_bn=True)
    y2 = conv2d_bn_activ(x2, params, stride=2, padding=1, activ="relu", use_bn=True,
                         compute_dtype=jnp.float32)
    y2 = jax.block_until_ready(y2)
    assert y2.shape == y2_ref.shape, (y2.shape, y2_ref.shape)
    np.testing.assert_allclose(np.asarray(y2), np.asarray(y2_ref), rtol=2e-2, atol=2e-2)

    print("KERNEL_OK")
</pallas_src>

<mosaic_0001>
module attributes {stable_mosaic.version = 11 : i64} {
  func.func @_conv_bn_act_kernel(%arg0: i32, %arg1: i32, %arg2: memref<2x18x18x128xf32, #tpu.memory_space<vmem>>, %arg3: memref<1152x128xf32, #tpu.memory_space<vmem>>, %arg4: memref<1x128xf32, #tpu.memory_space<vmem>>, %arg5: memref<2x16x16x128xf32, #tpu.memory_space<vmem>>) attributes {dimension_semantics = [#tpu.dimension_semantics<parallel>, #tpu.dimension_semantics<parallel>], iteration_bounds = array<i64: 2, 1>, scalar_prefetch = 0 : i64, scratch_operands = 0 : i64, tpu.core_type = #tpu.core_type<tc>, window_params = [{transform_indices = @transform_0, window_bounds = array<i64: 2, 18, 18, 128>}, {transform_indices = @transform_1, window_bounds = array<i64: 1152, 128>}, {transform_indices = @transform_2, window_bounds = array<i64: 1, 128>}, {transform_indices = @transform_3, window_bounds = array<i64: 2, 16, 16, 128>}]} {
    %c0 = arith.constant 0 : index
    %c0_0 = arith.constant 0 : index
    %c0_1 = arith.constant 0 : index
    %c0_2 = arith.constant 0 : index
    %0 = vector.load %arg2[%c0, %c0_0, %c0_1, %c0_2] : memref<2x18x18x128xf32, #tpu.memory_space<vmem>>, vector<2x18x18x128xf32>
    %c0_3 = arith.constant 0 : index
    %c0_4 = arith.constant 0 : index
    %1 = vector.load %arg3[%c0_3, %c0_4] : memref<1152x128xf32, #tpu.memory_space<vmem>>, vector<1152x128xf32>
    %c0_5 = arith.constant 0 : index
    %c0_6 = arith.constant 0 : index
    %2 = vector.load %arg4[%c0_5, %c0_6] : memref<1x128xf32, #tpu.memory_space<vmem>>, vector<1x128xf32>
    %cst = arith.constant 0.000000e+00 : f32
    %3 = vector.broadcast %cst : f32 to vector<512x128xf32>
    %4 = vector.extract_strided_slice %0 {offsets = [0, 0, 0, 0], sizes = [2, 16, 16, 128], strides = [1, 1, 1, 1]} : vector<2x18x18x128xf32> to vector<2x16x16x128xf32>
    %5 = vector.shape_cast %4 : vector<2x16x16x128xf32> to vector<512x128xf32>
    %6 = vector.extract_strided_slice %1 {offsets = [0, 0], sizes = [128, 128], strides = [1, 1]} : vector<1152x128xf32> to vector<128x128xf32>
    %cst_7 = arith.constant dense<0.000000e+00> : vector<512x128xf32>
    %7 = tpu.matmul %5, %6, %cst_7 {dimension_numbers = #tpu.dot_dimension_numbers<[1], [0], [0], [1], [0, 0, 1, 1], [], []>} : vector<512x128xf32>, vector<128x128xf32>, vector<512x128xf32> -> vector<512x128xf32>
    %8 = arith.addf %3, %7 : vector<512x128xf32>
    %9 = vector.extract_strided_slice %0 {offsets = [0, 0, 1, 0], sizes = [2, 16, 16, 128], strides = [1, 1, 1, 1]} : vector<2x18x18x128xf32> to vector<2x16x16x128xf32>
    %10 = vector.shape_cast %9 : vector<2x16x16x128xf32> to vector<512x128xf32>
    %11 = vector.extract_strided_slice %1 {offsets = [128, 0], sizes = [128, 128], strides = [1, 1]} : vector<1152x128xf32> to vector<128x128xf32>
    %cst_8 = arith.constant dense<0.000000e+00> : vector<512x128xf32>
    %12 = tpu.matmul %10, %11, %cst_8 {dimension_numbers = #tpu.dot_dimension_numbers<[1], [0], [0], [1], [0, 0, 1, 1], [], []>} : vector<512x128xf32>, vector<128x128xf32>, vector<512x128xf32> -> vector<512x128xf32>
    %13 = arith.addf %8, %12 : vector<512x128xf32>
    %14 = vector.extract_strided_slice %0 {offsets = [0, 0, 2, 0], sizes = [2, 16, 16, 128], strides = [1, 1, 1, 1]} : vector<2x18x18x128xf32> to vector<2x16x16x128xf32>
    %15 = vector.shape_cast %14 : vector<2x16x16x128xf32> to vector<512x128xf32>
    %16 = vector.extract_strided_slice %1 {offsets = [256, 0], sizes = [128, 128], strides = [1, 1]} : vector<1152x128xf32> to vector<128x128xf32>
    %cst_9 = arith.constant dense<0.000000e+00> : vector<512x128xf32>
    %17 = tpu.matmul %15, %16, %cst_9 {dimension_numbers = #tpu.dot_dimension_numbers<[1], [0], [0], [1], [0, 0, 1, 1], [], []>} : vector<512x128xf32>, vector<128x128xf32>, vector<512x128xf32> -> vector<512x128xf32>
    %18 = arith.addf %13, %17 : vector<512x128xf32>
    %19 = vector.extract_strided_slice %0 {offsets = [0, 1, 0, 0], sizes = [2, 16, 16, 128], strides = [1, 1, 1, 1]} : vector<2x18x18x128xf32> to vector<2x16x16x128xf32>
    %20 = vector.shape_cast %19 : vector<2x16x16x128xf32> to vector<512x128xf32>
    %21 = vector.extract_strided_slice %1 {offsets = [384, 0], sizes = [128, 128], strides = [1, 1]} : vector<1152x128xf32> to vector<128x128xf32>
    %cst_10 = arith.constant dense<0.000000e+00> : vector<512x128xf32>
    %22 = tpu.matmul %20, %21, %cst_10 {dimension_numbers = #tpu.dot_dimension_numbers<[1], [0], [0], [1], [0, 0, 1, 1], [], []>} : vector<512x128xf32>, vector<128x128xf32>, vector<512x128xf32> -> vector<512x128xf32>
    %23 = arith.addf %18, %22 : vector<512x128xf32>
    %24 = vector.extract_strided_slice %0 {offsets = [0, 1, 1, 0], sizes = [2, 16, 16, 128], strides = [1, 1, 1, 1]} : vector<2x18x18x128xf32> to vector<2x16x16x128xf32>
    %25 = vector.shape_cast %24 : vector<2x16x16x128xf32> to vector<512x128xf32>
    %26 = vector.extract_strided_slice %1 {offsets = [512, 0], sizes = [128, 128], strides = [1, 1]} : vector<1152x128xf32> to vector<128x128xf32>
    %cst_11 = arith.constant dense<0.000000e+00> : vector<512x128xf32>
    %27 = tpu.matmul %25, %26, %cst_11 {dimension_numbers = #tpu.dot_dimension_numbers<[1], [0], [0], [1], [0, 0, 1, 1], [], []>} : vector<512x128xf32>, vector<128x128xf32>, vector<512x128xf32> -> vector<512x128xf32>
    %28 = arith.addf %23, %27 : vector<512x128xf32>
    %29 = vector.extract_strided_slice %0 {offsets = [0, 1, 2, 0], sizes = [2, 16, 16, 128], strides = [1, 1, 1, 1]} : vector<2x18x18x128xf32> to vector<2x16x16x128xf32>
    %30 = vector.shape_cast %29 : vector<2x16x16x128xf32> to vector<512x128xf32>
    %31 = vector.extract_strided_slice %1 {offsets = [640, 0], sizes = [128, 128], strides = [1, 1]} : vector<1152x128xf32> to vector<128x128xf32>
    %cst_12 = arith.constant dense<0.000000e+00> : vector<512x128xf32>
    %32 = tpu.matmul %30, %31, %cst_12 {dimension_numbers = #tpu.dot_dimension_numbers<[1], [0], [0], [1], [0, 0, 1, 1], [], []>} : vector<512x128xf32>, vector<128x128xf32>, vector<512x128xf32> -> vector<512x128xf32>
    %33 = arith.addf %28, %32 : vector<512x128xf32>
    %34 = vector.extract_strided_slice %0 {offsets = [0, 2, 0, 0], sizes = [2, 16, 16, 128], strides = [1, 1, 1, 1]} : vector<2x18x18x128xf32> to vector<2x16x16x128xf32>
    %35 = vector.shape_cast %34 : vector<2x16x16x128xf32> to vector<512x128xf32>
    %36 = vector.extract_strided_slice %1 {offsets = [768, 0], sizes = [128, 128], strides = [1, 1]} : vector<1152x128xf32> to vector<128x128xf32>
    %cst_13 = arith.constant dense<0.000000e+00> : vector<512x128xf32>
    %37 = tpu.matmul %35, %36, %cst_13 {dimension_numbers = #tpu.dot_dimension_numbers<[1], [0], [0], [1], [0, 0, 1, 1], [], []>} : vector<512x128xf32>, vector<128x128xf32>, vector<512x128xf32> -> vector<512x128xf32>
    %38 = arith.addf %33, %37 : vector<512x128xf32>
    %39 = vector.extract_strided_slice %0 {offsets = [0, 2, 1, 0], sizes = [2, 16, 16, 128], strides = [1, 1, 1, 1]} : vector<2x18x18x128xf32> to vector<2x16x16x128xf32>
    %40 = vector.shape_cast %39 : vector<2x16x16x128xf32> to vector<512x128xf32>
    %41 = vector.extract_strided_slice %1 {offsets = [896, 0], sizes = [128, 128], strides = [1, 1]} : vector<1152x128xf32> to vector<128x128xf32>
    %cst_14 = arith.constant dense<0.000000e+00> : vector<512x128xf32>
    %42 = tpu.matmul %40, %41, %cst_14 {dimension_numbers = #tpu.dot_dimension_numbers<[1], [0], [0], [1], [0, 0, 1, 1], [], []>} : vector<512x128xf32>, vector<128x128xf32>, vector<512x128xf32> -> vector<512x128xf32>
    %43 = arith.addf %38, %42 : vector<512x128xf32>
    %44 = vector.extract_strided_slice %0 {offsets = [0, 2, 2, 0], sizes = [2, 16, 16, 128], strides = [1, 1, 1, 1]} : vector<2x18x18x128xf32> to vector<2x16x16x128xf32>
    %45 = vector.shape_cast %44 : vector<2x16x16x128xf32> to vector<512x128xf32>
    %46 = vector.extract_strided_slice %1 {offsets = [1024, 0], sizes = [128, 128], strides = [1, 1]} : vector<1152x128xf32> to vector<128x128xf32>
    %cst_15 = arith.constant dense<0.000000e+00> : vector<512x128xf32>
    %47 = tpu.matmul %45, %46, %cst_15 {dimension_numbers = #tpu.dot_dimension_numbers<[1], [0], [0], [1], [0, 0, 1, 1], [], []>} : vector<512x128xf32>, vector<128x128xf32>, vector<512x128xf32> -> vector<512x128xf32>
    %48 = arith.addf %43, %47 : vector<512x128xf32>
    %49 = vector.broadcast %2 : vector<1x128xf32> to vector<512x128xf32>
    %50 = arith.addf %48, %49 : vector<512x128xf32>
    %cst_16 = arith.constant 0.000000e+00 : f32
    %51 = vector.broadcast %cst_16 : f32 to vector<512x128xf32>
    %52 = arith.maximumf %50, %51 : vector<512x128xf32>
    %53 = vector.shape_cast %52 : vector<512x128xf32> to vector<2x16x16x128xf32>
    %c0_17 = arith.constant 0 : index
    %c0_18 = arith.constant 0 : index
    %c0_19 = arith.constant 0 : index
    %c0_20 = arith.constant 0 : index
    %54 = vector.load %arg5[%c0_17, %c0_18, %c0_19, %c0_20] : memref<2x16x16x128xf32, #tpu.memory_space<vmem>>, vector<2x16x16x128xf32>
    tpu.vector_store %arg5[%c0_17, %c0_18, %c0_19, %c0_20], %53 {strides = array<i32>} : memref<2x16x16x128xf32, #tpu.memory_space<vmem>>, vector<2x16x16x128xf32>,
    return
  }
  func.func @transform_0(%arg0: i32, %arg1: i32) -> (i32, i32, i32, i32) {
    %c0_i32 = arith.constant 0 : i32
    %c0_i32_0 = arith.constant 0 : i32
    %c0_i32_1 = arith.constant 0 : i32
    %c0_i32_2 = arith.constant 0 : i32
    return %arg0, %c0_i32, %c0_i32_0, %c0_i32_1 : i32, i32, i32, i32
  }
  func.func @transform_1(%arg0: i32, %arg1: i32) -> (i32, i32) {
    %c0_i32 = arith.constant 0 : i32
    %c0_i32_0 = arith.constant 0 : i32
    return %c0_i32, %arg1 : i32, i32
  }
  func.func @transform_2(%arg0: i32, %arg1: i32) -> (i32, i32) {
    %c0_i32 = arith.constant 0 : i32
    %c0_i32_0 = arith.constant 0 : i32
    return %c0_i32, %arg1 : i32, i32
  }
  func.func @transform_3(%arg0: i32, %arg1: i32) -> (i32, i32, i32, i32) {
    %c0_i32 = arith.constant 0 : i32
    %c0_i32_0 = arith.constant 0 : i32
    %c0_i32_1 = arith.constant 0 : i32
    return %arg0, %c0_i32, %c0_i32_0, %arg1 : i32, i32, i32, i32
  }
}

</mosaic_0001>

<bundles_post_ra>
// kernel: tpu_custom_call.1
= control target key start
LH: loop header
LB: loop body
LE: loop exit
PB: predicated region body
PF: predicated region fallthrough
CT: control target
= control target key end

     0   :  { %8 = vsyncpa [#allocation3], 0  ;;  %s10719_s0 = inlined_call_operand.vmem [shape: f32[4,18,18,128], index: 0, kind: input, shape index: {}]   ;;  %s10720_s1 = inlined_call_operand.vmem [shape: f32[1152,128], index: 1, kind: input, shape index: {}]   ;;  %s10721_s2 = inlined_call_operand.vmem [shape: f32[1,128], index: 2, kind: input, shape index: {}]   ;;  %s10722_s3 = inlined_call_operand.hbm [shape: f32[4,16,16,128], index: 3, kind: output, shape index: {}]  }
   0x1   :  { %10 = vsyncpa [#allocation3 + $0x1], 0  ;;  %s8249_s12 = smov 0   ;;  %s8251_s13 = smov 0  }
   0x2   :  { %s8253_s14 = smov 0   ;;  %s8255_s15 = smov 0  }
   0x3   :  { %s8257_s16 = smov 0   ;;  %s8259_s17 = smov 0  }
   0x4 LB: > { %s5313_s18 = sadd.s32 4294967295, %s8224_s17   ;;  %s5314_s19 = sadd.s32 4294967294, %s8224_s17   ;;  %s8224_s17 = sphi %s8259_s17, %s16_s17   ;;  %s8220_s16 = sphi %s8257_s16, %s11358_s16   ;;  %s8216_s15 = sphi %s8255_s15, %s11357_s15   ;;  %s8212_s14 = sphi %s8253_s14, %s11356_s14   ;;  %s8208_s13 = sphi %s8251_s13, %s11355_s13   ;;  %s8204_s12 = sphi %s8249_s12, %s11354_s12  }
   0x5   : > { %s28_s20 = sadd.s32 1, %s8220_s16  ;;  %s115_s21 = sadd.s32 1, %s8212_s14 }
   0x6   : > { %p30_p0 = scmp.ge.s32.totalorder %s28_s20, 2  ;;  %p125_p1 = scmp.ne.s32.totalorder %s8212_s14, %s8208_s13 }
   0x7   : > { %p126_p2 = scmp.eq.s32.totalorder %s5313_s18, 1  ;;  %p131_p3 = scmp.ne.s32.totalorder %s8208_s13, %s8204_s12 }
   0x8   : > { %s11360_s20 = smov (%p30_p0, %s28_s20), 0  ;;  %p132_p5 = scmp.eq.s32.totalorder %s5314_s19, 1 }
   0x9   : > { %p8289_p4 = por %p126_p2, %p125_p1  ;;  %s110_s23 = ssub.s32 %s8220_s16, %s11360_s20 }
   0xa   : > { %p5319_p6 = scmp.ge.s32.totalorder %s8224_s17, 1  ;;  %p113_p7 = scmp.eq.s32.totalorder %s110_s23, 0 }
   0xb   : > { %p8296_p8 = por %p132_p5, %p131_p3  ;;  %p173_p9 = scmp.lt.s32.totalorder %s8224_s17, 3 }
   0xc   : > { %s8302_s25 = scalar_select %p113_p7, %s8212_s14, %s115_s21  }
   0xd   : > { %p174_p10 = pnand %p5319_p6, %p173_p9 }
   0xf   : > { %177 = sbr.rel (%p174_p10) target bundleno = 864 (0x360), region = 32 }
  0x16   : > { %v344_v0 = vld [vmem:[%s10720_s1 + $0x80] sm:$0xff]  ;;  %v345_v1 = vld [vmem:[%s10720_s1 + $0x88] sm:$0xff]  ;;  %s5321_s5 = sshll.u32 %s8216_s15, 1  ;;  %v346_v5 = vld [vmem:[%s10720_s1 + $0x90] sm:$0xff]  ;;  %vm569_vm0 = vcmask 1046528   ;;  %vm1564_vm1 = vcmask 1045504  }
  0x17   : > { %v392_v2 = vld [vmem:[%s10720_s1 + $0x200] sm:$0xff]  ;;  %v7204_v3 = vpack.c.bf16 %v345_v1, %v344_v0  ;;  %v393_v4 = vld [vmem:[%s10720_s1 + $0x208] sm:$0xff]  ;;  %v347_v6 = vld [vmem:[%s10720_s1 + $0x98] sm:$0xff]  ;;  %p206_p11 = scmp.lt.s32.totalorder %s5321_s5, 3  ;;  %s5331_s7 = sshll.u32 %s8216_s15, 13 }
  0x18   : > { %v8323_v7 = vpack.c.bf16 %v393_v4, %v392_v2  ;;  %v7208_v8 = vpack.c.bf16 %v347_v6, %v346_v5  ;;  %v394_v9 = vld [vmem:[%s10720_s1 + $0x210] sm:$0xff]  ;;  %v395_v10 = vld [vmem:[%s10720_s1 + $0x218] sm:$0xff]  ;;  %v348_v11 = vld [vmem:[%s10720_s1 + $0xa0] sm:$0xff]  ;;  %s10665_s11 = scalar_lea.hbm %s10722_s3, %s5331_s7  ;;  %s8226_s19 = smov [#allocation2]  }
  0x19   : > { %7205 = vmatprep.subr.bf16.mxu1 %v7204_v3  ;;  %v8334_v12 = vpack.c.bf16 %v395_v10, %v394_v9  ;;  %v349_v13 = vld [vmem:[%s10720_s1 + $0xa8] sm:$0xff]  ;;  %v396_v14 = vld [vmem:[%s10720_s1 + $0x220] sm:$0xff]  ;;  %s11362_s5 = smov (!%p206_p11, %s5321_s5), 3  ;;  %v350_v18 = vld [vmem:[%s10720_s1 + $0xb0] sm:$0xff]  ;;  %s8150_s21 = sshll.u32 %s8226_s19, 4  ;;  %s8151_s21 = int_to_ptr.vmem [resolvable:$false] %s8150_s21 }
  0x1a   : > { %10985 = vst [vmem:[#allocation5_spill] sm:$0xff] %v8323_v7  ;;  %v397_v15 = vld [vmem:[%s10720_s1 + $0x228] sm:$0xff]  ;;  %7333 = vmatprep.subr.bf16.mxu0 %v8323_v7  ;;  %7207 = vmatpush3.bf16.msra.mxu1 %v7204_v3  ;;  %v7212_v16 = vpack.c.bf16 %v349_v13, %v348_v11  ;;  %s8020_s8 = smul.u32 432, %s11362_s5  ;;  %v351_v19 = vld [vmem:[%s10720_s1 + $0xb8] sm:$0xff]  ;;  %v398_v20 = vld [vmem:[%s10720_s1 + $0x230] sm:$0xff]  ;;  %s8152_s23 = scalar_lea.vmem %s8151_s21, 16384 }
  0x1b   : > { %10986 = vst [vmem:[#allocation6_spill] sm:$0xff] %v8334_v12  ;;  %7335 = vmatpush3.bf16.msra.mxu0 %v8323_v7  ;;  %7209 = vmatprep.subr.bf16.mxu1 %v7208_v8  ;;  %v8348_v17 = vpack.c.bf16 %v397_v15, %v396_v14  ;;  %v399_v21 = vld [vmem:[%s10720_s1 + $0x238] sm:$0xff]  ;;  %v7216_v22 = vpack.c.bf16 %v351_v19, %v350_v18  ;;  %v352_v23 = vld [vmem:[%s10720_s1 + $0xc0] sm:$0xff]  ;;  %v353_v24 = vld [vmem:[%s10720_s1 + $0xc8] sm:$0xff] }
  0x1c   : > { %7337 = vmatprep.subr.bf16.mxu0 %v8334_v12  ;;  %s8365_s28 = scalar_lea.vmem %s10719_s0, %s8020_s8  ;;  %v8375_v25 = vpack.c.bf16 %v399_v21, %v398_v20  ;;  %v400_v26 = vld [vmem:[%s10720_s1 + $0x240] sm:$0xff]  ;;  %v401_v27 = vld [vmem:[%s10720_s1 + $0x248] sm:$0xff]  ;;  %v7220_v36 = vpack.c.bf16 %v353_v24, %v352_v23  ;;  %v354_v38 = vld [vmem:[%s10720_s1 + $0xd0] sm:$0xff] }
  0x1d   : > { %10987 = vst [vmem:[#allocation7_spill] sm:$0xff] %v8348_v17  ;;  %v220_v28 = vld [vmem:[%s8365_s28] sm:$0xff]  ;;  %v8385_v29 = vld [vmem:[%s8365_s28 + $0x8] sm:$0xff]  ;;  %v8388_v31 = vld [vmem:[%s8365_s28 + $0x18] sm:$0xff]  ;;  %v8398_v37 = vpack.c.bf16 %v401_v27, %v400_v26 }
  0x1e   : > { %7211 = vmatpush3.bf16.msra.mxu1 %v7208_v8  ;;  %10988 = vst [vmem:[#allocation8_spill] sm:$0xff] %v8375_v25  ;;  %v570_v30 = vrot.slane %v220_v28, 1  ;;  %v8391_v32 = vld [vmem:[%s8365_s28 + $0x20] sm:$0xff]  ;;  %v571_v33 = vrot.slane %v8385_v29, 1  ;;  %v575_v34 = vrot.slane %v8388_v31, 1  ;;  %v355_v39 = vld [vmem:[%s10720_s1 + $0xd8] sm:$0xff] }
  0x1f   : > { %7339 = vmatpush3.bf16.msra.mxu0 %v8334_v12  ;;  %7213 = vmatprep.subr.bf16.mxu1 %v7212_v16  ;;  %v576_v35 = vrot.slane %v8391_v32, 1  ;;  %10989 = vst [vmem:[#allocation9_spill] sm:$0xff] %v8398_v37  ;;  %v402_v42 = vld [vmem:[%s10720_s1 + $0x250] sm:$0xff]  ;;  %v403_v43 = vld [vmem:[%s10720_s1 + $0x258] sm:$0xff]  ;;  %v7224_v44 = vpack.c.bf16 %v355_v39, %v354_v38  ;;  %v356_v46 = vld [vmem:[%s10720_s1 + $0xe0] sm:$0xff] }
  0x20   : > { %7341 = vmatprep.subr.bf16.mxu0 %v8348_v17  ;;  %v572_v40 = vsel %vm569_vm0, %v570_v30, %v571_v33  ;;  %v8423_v45 = vpack.c.bf16 %v403_v43, %v402_v42  ;;  %v357_v47 = vld [vmem:[%s10720_s1 + $0xe8] sm:$0xff]  ;;  %v404_v48 = vld [vmem:[%s10720_s1 + $0x260] sm:$0xff]  ;;  %v358_v52 = vld [vmem:[%s10720_s1 + $0xf0] sm:$0xff] }
  0x21   : > { %v8412_v41 = vsel %vm569_vm0, %v575_v34, %v576_v35  ;;  %6084 = vmatprep.mubr.f32.mxu1 %v572_v40  ;;  %v405_v49 = vld [vmem:[%s10720_s1 + $0x268] sm:$0xff]  ;;  %v7228_v50 = vpack.c.bf16 %v357_v47, %v356_v46  ;;  %v359_v53 = vld [vmem:[%s10720_s1 + $0xf8] sm:$0xff]  ;;  %v406_v54 = vld [vmem:[%s10720_s1 + $0x270] sm:$0xff] }
  0x22   : > { %7215 = vmatpush3.bf16.msra.mxu1 %v7212_v16  ;;  %6596 = vmatprep.mubr.f32.mxu0 %v8412_v41  ;;  %10990 = vst [vmem:[#allocation10_spill] sm:$0xff] %v8423_v45  ;;  %v8439_v51 = vpack.c.bf16 %v405_v49, %v404_v48  ;;  %v407_v55 = vld [vmem:[%s10720_s1 + $0x278] sm:$0xff]  ;;  %v7232_v56 = vpack.c.bf16 %v359_v53, %v358_v52  ;;  %v222_v57 = vld [vmem:[%s8365_s28 + $0x10] sm:$0x3]  ;;  %v328_v59 = vld [vmem:[%s10720_s1] sm:$0xff] }
  0x23   : > { %7343 = vmatpush3.bf16.msra.mxu0 %v8348_v17  ;;  %7217 = vmatprep.subr.bf16.mxu1 %v7216_v22  ;;  %v8456_v58 = vpack.c.bf16 %v407_v55, %v406_v54  ;;  %v329_v60 = vld [vmem:[%s10720_s1 + $0x8] sm:$0xff]  ;;  %v408_v62 = vld [vmem:[%s10720_s1 + $0x280] sm:$0xff]  ;;  %v573_v0 = vrot.slane %v222_v57, 1  ;;  %v8474_v1 = vld [vmem:[%s8365_s28 + $0x30] sm:$0xff] }
  0x24   : > { %7345 = vmatprep.subr.bf16.mxu0 %v8375_v25  ;;  %10991 = vst [vmem:[#allocation11_spill] sm:$0xff] %v8439_v51  ;;  %v8465_v61 = vld [vmem:[%s8365_s28 + $0x28] sm:$0x3]  ;;  %v8477_v2 = vld [vmem:[%s8365_s28 + $0x38] sm:$0xff]  ;;  %v7236_v3 = vpack.c.bf16 %v329_v60, %v328_v59  ;;  %v8483_v6 = vld [vmem:[%s8365_s28 + $0x40] sm:$0x3] }
  0x25   : > { %10992 = vst [vmem:[#allocation12_spill] sm:$0xff] %v8456_v58  ;;  %v409_v63 = vld [vmem:[%s10720_s1 + $0x288] sm:$0xff]  ;;  %v578_v4 = vrot.slane %v8465_v61, 1  ;;  %v580_v9 = vrot.slane %v8474_v1, 1  ;;  %v581_v10 = vrot.slane %v8477_v2, 1  ;;  %v8491_v11 = vld [vmem:[%s8365_s28 + $0x50] sm:$0xff]  ;;  %v574_v15 = vsel %vm569_vm0, %v571_v33, %v573_v0 }
  0x26   : > { %7219 = vmatpush3.bf16.msra.mxu1 %v7216_v22  ;;  %v7364_v5 = vpack.c.bf16 %v409_v63, %v408_v62  ;;  %v8486_v8 = vld [vmem:[%s8365_s28 + $0x48] sm:$0xff]  ;;  %v410_v13 = vld [vmem:[%s10720_s1 + $0x290] sm:$0xff]  ;;  %v411_v14 = vld [vmem:[%s10720_s1 + $0x298] sm:$0xff]  ;;  %v583_v20 = vrot.slane %v8483_v6, 1  ;;  %v586_v22 = vrot.slane %v8491_v11, 1 }
  0x27   : > { %7347 = vmatpush3.bf16.msra.mxu0 %v8375_v25  ;;  %7221 = vmatprep.subr.bf16.mxu1 %v7220_v36  ;;  %v330_v16 = vld [vmem:[%s10720_s1 + $0x10] sm:$0xff]  ;;  %v331_v18 = vld [vmem:[%s10720_s1 + $0x18] sm:$0xff]  ;;  %v579_v19 = vsel %vm569_vm0, %v576_v35, %v578_v4  ;;  %v585_v21 = vrot.slane %v8486_v8, 1  ;;  %v7368_v24 = vpack.c.bf16 %v411_v14, %v410_v13  ;;  %v8519_v26 = vld [vmem:[%s8365_s28 + $0x60] sm:$0xff]  ;;  %v8522_v27 = vsel %vm569_vm0, %v580_v9, %v581_v10 }
  0x28   : > { %7349 = vmatprep.subr.bf16.mxu0 %v8398_v37  ;;  %v8516_v23 = vld [vmem:[%s8365_s28 + $0x58] sm:$0x3]  ;;  %10993 = vst [vmem:[#allocation13_spill] sm:$0xff] %v8522_v27  ;;  %v8525_v28 = vld [vmem:[%s8365_s28 + $0x68] sm:$0xff]  ;;  %v7240_v29 = vpack.c.bf16 %v331_v18, %v330_v16  ;;  %v412_v30 = vld [vmem:[%s10720_s1 + $0x2a0] sm:$0xff]  ;;  %v590_v40 = vrot.slane %v8519_v26, 1 }
  0x29   : > { %v413_v33 = vld [vmem:[%s10720_s1 + $0x2a8] sm:$0xff]  ;;  %v332_v34 = vld [vmem:[%s10720_s1 + $0x20] sm:$0xff]  ;;  %v588_v38 = vrot.slane %v8516_v23, 1  ;;  %v8546_v39 = vsel %vm569_vm0, %v585_v21, %v586_v22  ;;  %v591_v42 = vrot.slane %v8525_v28, 1  ;;  %v8551_v43 = vld [vmem:[%s8365_s28 + $0x70] sm:$0x3] }
  0x2a   : > { %7223 = vmatpush3.bf16.msra.mxu1 %v7220_v36  ;;  %v333_v35 = vld [vmem:[%s10720_s1 + $0x28] sm:$0xff]  ;;  %v8541_v36 = vsel %vm569_vm0, %v581_v10, %v583_v20  ;;  %10995 = vst [vmem:[#allocation15_spill] sm:$0xff] %v8546_v39  ;;  %v8557_v46 = vld [vmem:[%s8365_s28 + $0x80] sm:$0xff]  ;;  %v414_v47 = vld [vmem:[%s10720_s1 + $0x2b0] sm:$0xff]  ;;  %v593_v54 = vrot.slane %v8551_v43, 1 }
  0x2b   : > { %7351 = vmatpush3.bf16.msra.mxu0 %v8398_v37  ;;  %7225 = vmatprep.subr.bf16.mxu1 %v7224_v44  ;;  %10994 = vst [vmem:[#allocation14_spill] sm:$0xff] %v8541_v36  ;;  %v415_v48 = vld [vmem:[%s10720_s1 + $0x2b8] sm:$0xff]  ;;  %v7244_v49 = vpack.c.bf16 %v333_v35, %v332_v34  ;;  %v8575_v53 = vsel %vm569_vm0, %v586_v22, %v588_v38  ;;  %v596_v57 = vrot.slane %v8557_v46, 1  ;;  %v8584_v59 = vld [vmem:[%s8365_s28 + $0x88] sm:$0x3]  ;;  %v8587_v60 = vld [vmem:[%s8365_s28 + $0x90] sm:$0xff] }
  0x2c   : > { %7353 = vmatprep.subr.bf16.mxu0 %v8423_v45  ;;  %v335_v52 = vld [vmem:[%s10720_s1 + $0x38] sm:$0xff]  ;;  %10996 = vst [vmem:[#allocation16_spill] sm:$0xff] %v8575_v53  ;;  %v8579_v55 = vsel %vm569_vm0, %v590_v40, %v591_v42  ;;  %v7376_v62 = vpack.c.bf16 %v415_v48, %v414_v47  ;;  %v416_v0 = vld [vmem:[%s10720_s1 + $0x2c0] sm:$0xff]  ;;  %v337_v9 = vld [vmem:[%s10720_s1 + $0x48] sm:$0xff]  ;;  %v8609_v10 = vsel %vm569_vm0, %v591_v42, %v593_v54  ;;  %v598_v13 = vrot.slane %v8584_v59, 1 }
  0x2d   : > { %10997 = vst [vmem:[#allocation17_spill] sm:$0xff] %v8579_v55  ;;  %v8591_v63 = vld [vmem:[%s8365_s28 + $0x98] sm:$0xff]  ;;  %10998 = vst [vmem:[#allocation18_spill] sm:$0xff] %v8609_v10  ;;  %v8618_v18 = vld [vmem:[%s8365_s28 + $0xa0] sm:$0x3] }
  0x2e   : > { %7227 = vmatpush3.bf16.msra.mxu1 %v7224_v44  ;;  %v8554_v44 = vld [vmem:[%s8365_s28 + $0x78] sm:$0xff]  ;;  %v601_v16 = vrot.slane %v8591_v63, 1  ;;  %v8625_v21 = vld [vmem:[%s8365_s28 + $0xb0] sm:$0xff]  ;;  %v8643_v34 = vsel %vm569_vm0, %v596_v57, %v598_v13  ;;  %v603_v35 = vrot.slane %v8618_v18, 1  ;;  %v8655_v47 = vld [vmem:[%s8365_s28 + $0xc0] sm:$0xff] }
  0x2f   : > { %7355 = vmatpush3.bf16.msra.mxu0 %v8423_v45  ;;  %7229 = vmatprep.subr.bf16.mxu1 %v7228_v50  ;;  %v418_v22 = vld [vmem:[%s10720_s1 + $0x2d0] sm:$0xff]  ;;  %11000 = vst [vmem:[#allocation20_spill] sm:$0xff] %v8643_v34  ;;  %v606_v42 = vrot.slane %v8625_v21, 1  ;;  %v8687_v13 = vld [vmem:[%s8365_s28 + $0xe0] sm:$0xff]  ;;  %v8766_v37 = vld [vmem:[%s8365_s28 + $0x118] sm:$0x3] }
  0x30   : > { %7357 = vmatprep.subr.bf16.mxu0 %v8439_v51  ;;  %v8742_v45 = vld [vmem:[%s8365_s28 + $0x100] sm:$0x3] }
  0x31   : > { %v8769_v25 = vld [vmem:[%s8365_s28 + $0x120] sm:$0xff] }
  0x32   : > { %7231 = vmatpush3.bf16.msra.mxu1 %v7228_v50  ;;  %v334_v50 = vld [vmem:[%s10720_s1 + $0x30] sm:$0xff]  ;;  %v630_v12 = vrot.slane %v8769_v25, 1 }
  0x33   : > { %7359 = vmatpush3.bf16.msra.mxu0 %v8439_v51  ;;  %7233 = vmatprep.subr.bf16.mxu1 %v7232_v56  ;;  %v7248_v4 = vpack.c.bf16 %v335_v52, %v334_v50  ;;  %v420_v50 = vld [vmem:[%s10720_s1 + $0x2e0] sm:$0xff]  ;;  %v421_v52 = vld [vmem:[%s10720_s1 + $0x2e8] sm:$0xff] }
  0x34   : > { %7361 = vmatprep.subr.bf16.mxu0 %v8456_v58 }
  0x36   : > { %7235 = vmatpush3.bf16.msra.mxu1 %v7232_v56  ;;  %v595_v56 = vrot.slane %v8554_v44, 1 }
  0x37   : > { %7363 = vmatpush3.bf16.msra.mxu0 %v8456_v58  ;;  %7237 = vmatprep.subr.bf16.mxu1 %v7236_v3 }
  0x38   : > { %7365 = vmatprep.subr.bf16.mxu0 %v7364_v5  ;;  %v8613_v14 = vsel %vm569_vm0, %v595_v56, %v596_v57  ;;  %v8671_v56 = vsel %vm569_vm0, %v601_v16, %v603_v35  ;;  %v616_v35 = vrot.slane %v8687_v13, 1 }
  0x39   : > { %6085 = vmatmul.mubr.f32.vlgmr.msra.gmra.mrb[0].mxu1 %v574_v15  ;;  %10999 = vst [vmem:[#allocation19_spill] sm:$0xff] %v8613_v14  ;;  %v600_v15 = vrot.slane %v8587_v60, 1  ;;  %11002 = vst [vmem:[#allocation22_spill] sm:$0xff] %v8671_v56 }
  0x3a   : > { %6597 = vmatmul.mubr.f32.vlgmr.msra.gmra.mrb[0].mxu0 %v579_v19  ;;  %7239 = vmatpush3.bf16.msra.mxu1 %v7236_v3  ;;  %v417_v3 = vld [vmem:[%s10720_s1 + $0x2c8] sm:$0xff] }
  0x3b   : > { %7367 = vmatpush3.bf16.msra.mxu0 %v7364_v5  ;;  %6087 = vmatprep.mubr.f32.mxu1 %v8412_v41  ;;  %v7372_v41 = vpack.c.bf16 %v413_v33, %v412_v30  ;;  %v336_v5 = vld [vmem:[%s10720_s1 + $0x40] sm:$0xff]  ;;  %v7380_v20 = vpack.c.bf16 %v417_v3, %v416_v0  ;;  %v338_v30 = vld [vmem:[%s10720_s1 + $0x50] sm:$0xff]  ;;  %v339_v33 = vld [vmem:[%s10720_s1 + $0x58] sm:$0xff]  ;;  %v8647_v38 = vsel %vm569_vm0, %v600_v15, %v601_v16  ;;  %v610_v0 = vrot.slane %v8655_v47, 1 }
  0x3c   : > { %6599 = vmatprep.mubr.f32.mxu0 %v8522_v27  ;;  %7369 = vmatprep.subr.bf16.mxu0 %v7368_v24  ;;  %11001 = vst [vmem:[#allocation21_spill] sm:$0xff] %v8647_v38  ;;  %v7256_v54 = vpack.c.bf16 %v339_v33, %v338_v30  ;;  %v422_v15 = vld [vmem:[%s10720_s1 + $0x2f0] sm:$0xff]  ;;  %v423_v16 = vld [vmem:[%s10720_s1 + $0x2f8] sm:$0xff] }
  0x3d   : > { %6088 = vmatmul.mubr.f32.gmra.mrb[2].mxu1 %v579_v19  ;;  %7241 = vmatprep.subr.bf16.mxu1 %v7240_v29  ;;  %v8621_v19 = vld [vmem:[%s8365_s28 + $0xa8] sm:$0xff] }
  0x3e   : > { %6600 = vmatmul.mubr.f32.gmra.mrb[2].mxu0 %v8541_v36  ;;  %6090 = vmatprep.mubr.f32.mxu1 %v8522_v27  ;;  %v605_v40 = vrot.slane %v8621_v19, 1  ;;  %v275_v27 = vld [vmem:[%s8365_s28 + $0x1b8] sm:$0xff] }
  0x3f   : > { %6602 = vmatprep.mubr.f32.mxu0 %v8546_v39  ;;  %7371 = vmatpush3.bf16.msra.mxu0 %v7368_v24  ;;  %v419_v24 = vld [vmem:[%s10720_s1 + $0x2d8] sm:$0xff]  ;;  %v651_v7 = vrot.slane %v275_v27, 1  ;;  %v1573_v27 = vrot.slane %v8465_v61, 2 }
  0x40   : > { %7373 = vmatprep.subr.bf16.mxu0 %v7372_v41  ;;  %7243 = vmatpush3.bf16.msra.mxu1 %v7240_v29  ;;  %v7252_v29 = vpack.c.bf16 %v337_v9, %v336_v5  ;;  %v7384_v48 = vpack.c.bf16 %v419_v24, %v418_v22  ;;  %v8683_v5 = vld [vmem:[%s8365_s28 + $0xd8] sm:$0xff]  ;;  %v7388_v9 = vpack.c.bf16 %v421_v52, %v420_v50  ;;  %v340_v24 = vld [vmem:[%s10720_s1 + $0x60] sm:$0xff] }
  0x41   : > { %6091 = vmatmul.mubr.f32.gmra.mrb[4].mxu1 %v8541_v36  ;;  %7245 = vmatprep.subr.bf16.mxu1 %v7244_v49  ;;  %v615_v33 = vrot.slane %v8683_v5, 1  ;;  %v8721_v50 = vld [vmem:[%s8365_s28 + $0xf8] sm:$0xff]  ;;  %v424_v52 = vld [vmem:[%s10720_s1 + $0x300] sm:$0xff]  ;;  %v8892_v36 = vld [vmem:[%s8365_s28 + $0x190] sm:$0x3] }
  0x42   : > { %6603 = vmatmul.mubr.f32.gmra.mrb[4].mxu0 %v8575_v53  ;;  %6093 = vmatprep.mubr.f32.mxu1 %v8546_v39  ;;  %v621_v51 = vrot.slane %v8721_v50, 1 }
  0x43   : > { %6605 = vmatprep.mubr.f32.mxu0 %v8579_v55  ;;  %7375 = vmatpush3.bf16.msra.mxu0 %v7372_v41  ;;  %v8652_v41 = vld [vmem:[%s8365_s28 + $0xb8] sm:$0x3] }
  0x44   : > { %7377 = vmatprep.subr.bf16.mxu0 %v7376_v62  ;;  %7247 = vmatpush3.bf16.msra.mxu1 %v7244_v49  ;;  %v8659_v49 = vld [vmem:[%s8365_s28 + $0xc8] sm:$0xff]  ;;  %v608_v57 = vrot.slane %v8652_v41, 1 }
  0x45   : > { %6094 = vmatmul.mubr.f32.gmra.mrb[6].mxu1 %v8575_v53  ;;  %7249 = vmatprep.subr.bf16.mxu1 %v7248_v4  ;;  %v611_v3 = vrot.slane %v8659_v49, 1 }
  0x46   : > { %6606 = vmatmul.mubr.f32.gmra.mrb[6].mxu0 %v8609_v10  ;;  %6096 = vmatprep.mubr.f32.mxu1 %v8579_v55 }
  0x47   : > { %6608 = vmatprep.mubr.f32.mxu0 %v8613_v14  ;;  %7379 = vmatpush3.bf16.msra.mxu0 %v7376_v62  ;;  %v8675_v62 = vsel %vm569_vm0, %v605_v40, %v606_v42  ;;  %v8709_v30 = vsel %vm569_vm0, %v610_v0, %v611_v3  ;;  %v8714_v40 = vld [vmem:[%s8365_s28 + $0xe8] sm:$0x3] }
  0x48   : > { %7381 = vmatprep.subr.bf16.mxu0 %v7380_v20  ;;  %7251 = vmatpush3.bf16.msra.mxu1 %v7248_v4  ;;  %11003 = vst [vmem:[#allocation23_spill] sm:$0xff] %v8675_v62  ;;  %v8680_v4 = vld [vmem:[%s8365_s28 + $0xd0] sm:$0x3]  ;;  %11005 = vst [vmem:[#allocation25_spill] sm:$0xff] %v8709_v30 }
  0x49   : > { %6097 = vmatmul.mubr.f32.gmra.mrb[8].mxu1 %v8609_v10  ;;  %7253 = vmatprep.subr.bf16.mxu1 %v7252_v29  ;;  %v613_v22 = vrot.slane %v8680_v4, 1 }
  0x4a   : > { %6609 = vmatmul.mubr.f32.gmra.mrb[8].mxu0 %v8643_v34  ;;  %6099 = vmatprep.mubr.f32.mxu1 %v8613_v14 }
  0x4b   : > { %6611 = vmatprep.mubr.f32.mxu0 %v8647_v38  ;;  %7383 = vmatpush3.bf16.msra.mxu0 %v7380_v20  ;;  %v8699_v20 = vsel %vm569_vm0, %v606_v42, %v608_v57  ;;  %v8717_v42 = vld [vmem:[%s8365_s28 + $0xf0] sm:$0xff]  ;;  %v425_v57 = vld [vmem:[%s10720_s1 + $0x308] sm:$0xff] }
  0x4c   : > { %7385 = vmatprep.subr.bf16.mxu0 %v7384_v48  ;;  %7255 = vmatpush3.bf16.msra.mxu1 %v7252_v29  ;;  %11004 = vst [vmem:[#allocation24_spill] sm:$0xff] %v8699_v20  ;;  %v341_v29 = vld [vmem:[%s10720_s1 + $0x68] sm:$0xff]  ;;  %v620_v58 = vrot.slane %v8717_v42, 1 }
  0x4d   : > { %6100 = vmatmul.mubr.f32.gmra.mrb[10].mxu1 %v8643_v34  ;;  %7257 = vmatprep.subr.bf16.mxu1 %v7256_v54  ;;  %v7260_v0 = vpack.c.bf16 %v341_v29, %v340_v24  ;;  %v8744_v24 = vpack.c.bf16 %v425_v57, %v424_v52  ;;  %v623_v29 = vrot.slane %v8742_v45, 1  ;;  %v8852_v34 = vld [vmem:[%s8365_s28 + $0x170] sm:$0xff] }
  0x4e   : > { %6612 = vmatmul.mubr.f32.gmra.mrb[10].mxu0 %v8671_v56  ;;  %6102 = vmatprep.mubr.f32.mxu1 %v8647_v38  ;;  %v646_v53 = vrot.slane %v8852_v34, 1 }
  0x4f   : > { %6614 = vmatprep.mubr.f32.mxu0 %v8675_v62  ;;  %7387 = vmatpush3.bf16.msra.mxu0 %v7384_v48  ;;  %v7392_v48 = vpack.c.bf16 %v423_v16, %v422_v15  ;;  %v618_v15 = vrot.slane %v8714_v40, 1  ;;  %v8737_v16 = vsel %vm569_vm0, %v615_v33, %v616_v35  ;;  %v8761_v33 = vsel %vm569_vm0, %v620_v58, %v621_v51  ;;  %v342_v58 = vld [vmem:[%s10720_s1 + $0x70] sm:$0xff] }
  0x50   : > { %7389 = vmatprep.subr.bf16.mxu0 %v7388_v9  ;;  %7259 = vmatpush3.bf16.msra.mxu1 %v7256_v54  ;;  %v8733_v54 = vsel %vm569_vm0, %v611_v3, %v613_v22  ;;  %11007 = vst [vmem:[#allocation27_spill] sm:$0xff] %v8737_v16  ;;  %v8748_v3 = vld [vmem:[%s8365_s28 + $0x108] sm:$0xff]  ;;  %11009 = vst [vmem:[#allocation29_spill] sm:$0xff] %v8761_v33 }
  0x51   : > { %6103 = vmatmul.mubr.f32.gmra.mrb[12].mxu1 %v8671_v56  ;;  %11006 = vst [vmem:[#allocation26_spill] sm:$0xff] %v8733_v54  ;;  %7261 = vmatprep.subr.bf16.mxu1 %v7260_v0  ;;  %v8757_v22 = vsel %vm569_vm0, %v616_v35, %v618_v15  ;;  %v625_v52 = vrot.slane %v8748_v3, 1  ;;  %v8774_v35 = vld [vmem:[%s8365_s28 + $0x128] sm:$0xff]  ;;  %v628_v15 = vrot.slane %v8766_v37, 1 }
  0x52   : > { %6615 = vmatmul.mubr.f32.gmra.mrb[12].mxu0 %v8699_v20  ;;  %6105 = vmatprep.mubr.f32.mxu1 %v8675_v62  ;;  %11008 = vst [vmem:[#allocation28_spill] sm:$0xff] %v8757_v22  ;;  %v8817_v62 = vld [vmem:[%s8365_s28 + $0x148] sm:$0x3] }
  0x53   : > { %6617 = vmatprep.mubr.f32.mxu0 %v8709_v30  ;;  %7391 = vmatpush3.bf16.msra.mxu0 %v7388_v9  ;;  %v8751_v9 = vld [vmem:[%s8365_s28 + $0x110] sm:$0xff] }
  0x54   : > { %7393 = vmatprep.subr.bf16.mxu0 %v7392_v48  ;;  %v626_v57 = vrot.slane %v8751_v9, 1  ;;  %7263 = vmatpush3.bf16.msra.mxu1 %v7260_v0  ;;  %v8786_v0 = vsel %vm569_vm0, %v621_v51, %v623_v29  ;;  %v8802_v51 = vld [vmem:[%s8365_s28 + $0x140] sm:$0xff] }
  0x55   : > { %6106 = vmatmul.mubr.f32.gmra.mrb[14].mxu1 %v8699_v20  ;;  %11010 = vst [vmem:[#allocation30_spill] sm:$0xff] %v8786_v0 }
  0x56   : > { %6618 = vmatmul.mubr.f32.gmra.mrb[14].mxu0 %v8733_v54  ;;  %6108 = vmatprep.mubr.f32.mxu1 %v8709_v30  ;;  %v8790_v17 = vsel %vm569_vm0, %v625_v52, %v626_v57  ;;  %v8795_v30 = vld [vmem:[%s8365_s28 + $0x130] sm:$0x3]  ;;  %v8808_v29 = vsel %vm569_vm0, %v626_v57, %v628_v15  ;;  %v8824_v15 = vld [vmem:[%s8365_s28 + $0x158] sm:$0xff] }
  0x57   : > { %6620 = vmatprep.mubr.f32.mxu0 %v8737_v16  ;;  %7395 = vmatpush3.bf16.msra.mxu0 %v7392_v48  ;;  %v343_v48 = vld [vmem:[%s10720_s1 + $0x78] sm:$0xff]  ;;  %11011 = vst [vmem:[#allocation31_spill] sm:$0xff] %v8790_v17  ;;  %11012 = vst [vmem:[#allocation32_spill] sm:$0xff] %v8808_v29  ;;  %v633_v52 = vrot.slane %v8795_v30, 1  ;;  %v8821_v57 = vld [vmem:[%s8365_s28 + $0x150] sm:$0xff]  ;;  %v641_v38 = vrot.slane %v8824_v15, 1 }
  0x58   : > { %7397 = vmatprep.subr.bf16.mxu0 %v8744_v24  ;;  %v7264_v20 = vpack.c.bf16 %v343_v48, %v342_v58 }
  0x59   : > { %6109 = vmatmul.mubr.f32.gmra.mrb[16].mxu1 %v8733_v54  ;;  %v631_v54 = vrot.slane %v8774_v35, 1 }
  0x5a   : > { %6621 = vmatmul.mubr.f32.gmra.mrb[16].mxu0 %v8757_v22  ;;  %6111 = vmatprep.mubr.f32.mxu1 %v8737_v16  ;;  %v8799_v16 = vld [vmem:[%s8365_s28 + $0x138] sm:$0xff] }
  0x5b   : > { %6623 = vmatprep.mubr.f32.mxu0 %v8761_v33  ;;  %7265 = vmatprep.subr.bf16.mxu1 %v7264_v20  ;;  %v8812_v58 = vsel %vm569_vm0, %v630_v12, %v631_v54  ;;  %v635_v48 = vrot.slane %v8799_v16, 1  ;;  %v8830_v12 = vsel %vm569_vm0, %v631_v54, %v633_v52  ;;  %v8845_v54 = vld [vmem:[%s8365_s28 + $0x160] sm:$0x3]  ;;  %v8849_v52 = vld [vmem:[%s8365_s28 + $0x168] sm:$0xff] }
  0x5c   : > { %11013 = vst [vmem:[#allocation33_spill] sm:$0xff] %v8812_v58  ;;  %7267 = vmatpush3.bf16.msra.mxu1 %v7264_v20  ;;  %11014 = vst [vmem:[#allocation34_spill] sm:$0xff] %v8830_v12  ;;  %v360_v20 = vld [vmem:[%s10720_s1 + $0x100] sm:$0xff]  ;;  %v643_v10 = vrot.slane %v8845_v54, 1  ;;  %v645_v55 = vrot.slane %v8849_v52, 1 }
  0x5d   : > { %6112 = vmatmul.mubr.f32.gmra.mrb[18].mxu1 %v8757_v22  ;;  %v636_v22 = vrot.slane %v8802_v51, 1 }
  0x5e   : > { %6624 = vmatmul.mubr.f32.gmra.mrb[18].mxu0 %v8786_v0  ;;  %6114 = vmatprep.mubr.f32.mxu1 %v8761_v33  ;;  %v638_v33 = vrot.slane %v8817_v62, 1 }
  0x5f   : > { %6626 = vmatprep.mubr.f32.mxu0 %v8790_v17  ;;  %v8840_v56 = vsel %vm569_vm0, %v635_v48, %v636_v22 }
  0x60   : > { %11015 = vst [vmem:[#allocation35_spill] sm:$0xff] %v8840_v56  ;;  %v8860_v14 = vsel %vm569_vm0, %v636_v22, %v638_v33  ;;  %v8874_v22 = vld [vmem:[%s8365_s28 + $0x180] sm:$0xff]  ;;  %v8877_v33 = vld [vmem:[%s8365_s28 + $0x188] sm:$0xff] }
  0x61   : > { %6115 = vmatmul.mubr.f32.gmra.mrb[20].mxu1 %v8786_v0  ;;  %v361_v0 = vld [vmem:[%s10720_s1 + $0x108] sm:$0xff]  ;;  %11017 = vst [vmem:[#allocation37_spill] sm:$0xff] %v8860_v14  ;;  %11020 = vst [vmem:[#allocation40_spill] sm:$0xff] %v8874_v22  ;;  %v2694_v39 = vrot.slane %v8877_v33, 1 }
  0x62   : > { %6627 = vmatmul.mubr.f32.gmra.mrb[20].mxu0 %v8808_v29  ;;  %6117 = vmatprep.mubr.f32.mxu1 %v8790_v17  ;;  %v640_v17 = vrot.slane %v8821_v57, 1  ;;  %v8856_v48 = vpack.c.bf16 %v361_v0, %v360_v20  ;;  %11021 = vst [vmem:[#allocation41_spill] sm:$0xff] %v8877_v33  ;;  %v8887_v20 = vsel %vm569_vm0, %v645_v55, %v646_v53 }
  0x63   : > { %6629 = vmatprep.mubr.f32.mxu0 %v8812_v58  ;;  %11023 = vst [vmem:[#allocation43_spill] sm:$0xff] %v8887_v20 }
  0x64   : > { %11016 = vst [vmem:[#allocation36_spill] sm:$0xff] %v8856_v48  ;;  %7269 = vmatprep.subr.bf16.mxu1 %v8856_v48  ;;  %v276_v48 = vld [vmem:[%s8365_s28 + $0x1c0] sm:$0x3] }
  0x65   : > { %6118 = vmatmul.mubr.f32.gmra.mrb[22].mxu1 %v8808_v29  ;;  %v8864_v29 = vsel %vm569_vm0, %v640_v17, %v641_v38  ;;  %v8883_v17 = vsel %vm569_vm0, %v641_v38, %v643_v10  ;;  %v2696_v10 = vrot.slane %v8892_v36, 1 }
  0x66   : > { %6630 = vmatmul.mubr.f32.gmra.mrb[22].mxu0 %v8830_v12  ;;  %6120 = vmatprep.mubr.f32.mxu1 %v8812_v58  ;;  %11018 = vst [vmem:[#allocation38_spill] sm:$0xff] %v8864_v29  ;;  %v8869_v58 = vld [vmem:[%s8365_s28 + $0x178] sm:$0x3]  ;;  %11022 = vst [vmem:[#allocation42_spill] sm:$0xff] %v8883_v17 }
  0x67   : > { %6632 = vmatprep.mubr.f32.mxu0 %v8840_v56  ;;  %11019 = vst [vmem:[#allocation39_spill] sm:$0xff] %v8869_v58  ;;  %v648_v0 = vrot.slane %v8869_v58, 1  ;;  %v8911_v58 = vld [vmem:[%s8365_s28 + $0x1c8] sm:$0xff] }
  0x68   : > { %11026 = vst [vmem:[#allocation46_spill] sm:$0xff] %v8911_v58 }
  0x69   : > { %6121 = vmatmul.mubr.f32.gmra.mrb[24].mxu1 %v8830_v12  ;;  %v2693_v12 = vrot.slane %v8874_v22, 1  ;;  %v8901_v55 = vsel %vm569_vm0, %v646_v53, %v648_v0  ;;  %v1571_v22 = vrot.slane %v8391_v32, 2  ;;  %v653_v53 = vrot.slane %v276_v48, 1  ;;  %v8928_v0 = vld [vmem:[%s8365_s28 + $0x1d8] sm:$0x3] }
  0x6a   : > { %6633 = vmatmul.mubr.f32.gmra.mrb[24].mxu0 %v8860_v14  ;;  %6123 = vmatprep.mubr.f32.mxu1 %v8840_v56  ;;  %v274_v56 = vld [vmem:[%s8365_s28 + $0x1b0] sm:$0xff]  ;;  %11024 = vst [vmem:[#allocation44_spill] sm:$0xff] %v8901_v55  ;;  %v1576_v48 = vrot.slane %v8477_v2, 2  ;;  %v658_v2 = vrot.slane %v8928_v0, 1 }
  0x6b   : > { %6635 = vmatprep.mubr.f32.mxu0 %v8864_v29  ;;  %v650_v38 = vrot.slane %v274_v56, 1  ;;  %v8906_v33 = vsel %vm569_vm0, %v2693_v12, %v2694_v39  ;;  %v655_v56 = vrot.slane %v8911_v58, 1 }
  0x6c   : > { %11025 = vst [vmem:[#allocation45_spill] sm:$0xff] %v8906_v33 }
  0x6d   : > { %6124 = vmatmul.mubr.f32.gmra.mrb[26].mxu1 %v8860_v14  ;;  %v1570_v14 = vrot.slane %v8388_v31, 2  ;;  %v8922_v31 = vsel %vm569_vm0, %v2694_v39, %v2696_v10  ;;  %v652_v32 = vsel %vm569_vm0, %v650_v38, %v651_v7  ;;  %v8939_v39 = vld [vmem:[%s8365_s28 + $0x1e8] sm:$0xff]  ;;  %v426_v10 = vld [vmem:[%s10720_s1 + $0x310] sm:$0xff]  ;;  %v1578_v38 = vrot.slane %v8483_v6, 2 }
  0x6e   : > { %6636 = vmatmul.mubr.f32.gmra.mrb[26].mxu0 %v8883_v17  ;;  %6126 = vmatprep.mubr.f32.mxu1 %v8864_v29  ;;  %v8914_v29 = vld [vmem:[%s8365_s28 + $0x1d0] sm:$0xff]  ;;  %11028 = vst [vmem:[#allocation48_spill] sm:$0xff] %v8922_v31  ;;  %v661_v58 = vrot.slane %v8939_v39, 1  ;;  %v1581_v6 = vrot.slane %v8491_v11, 2 }
  0x6f   : > { %6638 = vmatprep.mubr.f32.mxu0 %v8887_v20  ;;  %11027 = vst [vmem:[#allocation47_spill] sm:$0xff] %v8914_v29  ;;  %v656_v12 = vrot.slane %v8914_v29, 1  ;;  %v8931_v61 = vsel %vm1564_vm1, %v1570_v14, %v1571_v22  ;;  %v427_v14 = vld [vmem:[%s10720_s1 + $0x318] sm:$0xff]  ;;  %v8987_v11 = vsel %vm1564_vm1, %v1576_v48, %v1578_v38  ;;  %v9007_v38 = vld [vmem:[%s8365_s28 + $0x210] sm:$0xff] }
  0x70   : > { %11029 = vst [vmem:[#allocation49_spill] sm:$0xff] %v8931_v61  ;;  %11034 = vst [vmem:[#allocation54_spill] sm:$0xff] %v8987_v11 }
  0x71   : > { %6127 = vmatmul.mubr.f32.gmra.mrb[28].mxu1 %v8883_v17  ;;  %v1575_v17 = vrot.slane %v8474_v1, 2  ;;  %v654_v1 = vsel %vm569_vm0, %v651_v7, %v653_v53  ;;  %v1580_v53 = vrot.slane %v8486_v8, 2  ;;  %v8984_v8 = vsel %vm569_vm0, %v656_v12, %v658_v2 }
  0x72   : > { %6639 = vmatmul.mubr.f32.gmra.mrb[28].mxu0 %v8901_v55  ;;  %6129 = vmatprep.mubr.f32.mxu1 %v8887_v20  ;;  %v8957_v20 = vsel %vm569_vm0, %v655_v56, %v656_v12  ;;  %v428_v56 = vld [vmem:[%s10720_s1 + $0x320] sm:$0xff]  ;;  %11033 = vst [vmem:[#allocation53_spill] sm:$0xff] %v8984_v8  ;;  %v8999_v12 = vld [vmem:[%s8365_s28 + $0x208] sm:$0x3]  ;;  %v1585_v2 = vrot.slane %v8519_v26, 2 }
  0x73   : > { %6641 = vmatprep.mubr.f32.mxu0 %v8906_v33  ;;  %v8936_v33 = vld [vmem:[%s8365_s28 + $0x1e0] sm:$0xff]  ;;  %11031 = vst [vmem:[#allocation51_spill] sm:$0xff] %v8957_v20  ;;  %v8965_v7 = vsel %vm1564_vm1, %v1575_v17, %v1576_v48  ;;  %v429_v17 = vld [vmem:[%s10720_s1 + $0x328] sm:$0xff]  ;;  %v9002_v48 = vsel %vm1564_vm1, %v1580_v53, %v1581_v6  ;;  %v431_v53 = vld [vmem:[%s10720_s1 + $0x338] sm:$0xff] }
  0x74   : > { %v660_v29 = vrot.slane %v8936_v33, 1  ;;  %11032 = vst [vmem:[#allocation52_spill] sm:$0xff] %v8965_v7  ;;  %11036 = vst [vmem:[#allocation56_spill] sm:$0xff] %v9002_v48 }
  0x75   : > { %6130 = vmatmul.mubr.f32.gmra.mrb[30].mxu1 %v8901_v55  ;;  %v8954_v55 = vsel %vm1564_vm1, %v1571_v22, %v1573_v27  ;;  %v8973_v22 = vld [vmem:[%s8365_s28 + $0x200] sm:$0xff]  ;;  %v7400_v27 = vpack.c.bf16 %v427_v14, %v426_v10 }
  0x76   : > { %6642 = vmatmul.mubr.f32.gmra.mrb[30].mxu0 %v8922_v31  ;;  %6132 = vmatprep.mubr.f32.mxu1 %v652_v32  ;;  %11030 = vst [vmem:[#allocation50_spill] sm:$0xff] %v8954_v55  ;;  %v8962_v31 = vld [vmem:[%s8365_s28 + $0x1f0] sm:$0x3]  ;;  %v8970_v32 = vld [vmem:[%s8365_s28 + $0x1f8] sm:$0xff]  ;;  %v8993_v14 = vsel %vm569_vm0, %v660_v29, %v661_v58 }
  0x77   : > { %6724 = vmatprep.mubr.f32.mxu0 %v8931_v61  ;;  %v663_v10 = vrot.slane %v8962_v31, 1  ;;  %11035 = vst [vmem:[#allocation55_spill] sm:$0xff] %v8993_v14  ;;  %v430_v29 = vld [vmem:[%s10720_s1 + $0x330] sm:$0xff] }
  0x79   : > { %6133 = vmatmul.mubr.f32.gmra.mrb[32].mxu1 %v654_v1  ;;  %v1583_v1 = vrot.slane %v8516_v23, 2  ;;  %v7404_v23 = vpack.c.bf16 %v429_v17, %v428_v56  ;;  %v9022_v26 = vsel %vm569_vm0, %v661_v58, %v663_v10  ;;  %v1588_v56 = vrot.slane %v8551_v43, 2 }
  0x7a   : > { %6725 = vmatmul.mubr.f32.vlgmr.msra.gmra.mrb[0].mxu0 %v8954_v55  ;;  %6135 = vmatprep.mubr.f32.mxu1 %v8957_v20  ;;  %v665_v55 = vrot.slane %v8970_v32, 1  ;;  %v666_v20 = vrot.slane %v8973_v22, 1  ;;  %11037 = vst [vmem:[#allocation57_spill] sm:$0xff] %v9022_v26  ;;  %v1590_v43 = vrot.slane %v8554_v44, 2  ;;  %v1591_v10 = vrot.slane %v8557_v46, 2 }
  0x7b   : > { %7399 = vmatpush3.bf16.msra.mxu0 %v8744_v24  ;;  %6727 = vmatprep.mubr.f32.mxu0 %v8965_v7  ;;  %v1586_v24 = vrot.slane %v8525_v28, 2  ;;  %v9010_v7 = vld [vmem:[%s8365_s28 + $0x218] sm:$0xff]  ;;  %v668_v28 = vrot.slane %v8999_v12, 1  ;;  %v9028_v17 = vsel %vm1564_vm1, %v1581_v6, %v1583_v1  ;;  %v9047_v6 = vld [vmem:[%s8365_s28 + $0x230] sm:$0xff]  ;;  %v433_v1 = vld [vmem:[%s10720_s1 + $0x348] sm:$0xff] }
  0x7c   : > { %7401 = vmatprep.subr.bf16.mxu0 %v7400_v27  ;;  %11038 = vst [vmem:[#allocation58_spill] sm:$0xff] %v9028_v17  ;;  %v671_v61 = vrot.slane %v9010_v7, 1 }
  0x7d   : > { %6136 = vmatmul.mubr.f32.gmra.mrb[34].mxu1 %v8984_v8  ;;  %v9031_v8 = vsel %vm569_vm0, %v665_v55, %v666_v20  ;;  %v9039_v58 = vsel %vm1564_vm1, %v1585_v2, %v1586_v24  ;;  %v7408_v55 = vpack.c.bf16 %v431_v53, %v430_v29  ;;  %v9059_v44 = vsel %vm569_vm0, %v666_v20, %v668_v28 }
  0x7e   : > { %6728 = vmatmul.mubr.f32.gmra.mrb[2].mxu0 %v8987_v11  ;;  %6138 = vmatprep.mubr.f32.mxu1 %v8993_v14  ;;  %11039 = vst [vmem:[#allocation59_spill] sm:$0xff] %v9031_v8  ;;  %v670_v11 = vrot.slane %v9007_v38, 1  ;;  %v9036_v14 = vld [vmem:[%s8365_s28 + $0x220] sm:$0x3]  ;;  %11040 = vst [vmem:[#allocation60_spill] sm:$0xff] %v9039_v58  ;;  %v9062_v46 = vsel %vm1564_vm1, %v1586_v24, %v1588_v56  ;;  %v1593_v53 = vrot.slane %v8584_v59, 2 }
  0x7f   : > { %6730 = vmatprep.mubr.f32.mxu0 %v9002_v48  ;;  %7403 = vmatpush3.bf16.msra.mxu0 %v7400_v27  ;;  %v9044_v48 = vld [vmem:[%s8365_s28 + $0x228] sm:$0xff]  ;;  %v432_v27 = vld [vmem:[%s10720_s1 + $0x340] sm:$0xff]  ;;  %11041 = vst [vmem:[#allocation61_spill] sm:$0xff] %v9059_v44  ;;  %11042 = vst [vmem:[#allocation62_spill] sm:$0xff] %v9062_v46  ;;  %v673_v2 = vrot.slane %v9036_v14, 1  ;;  %v9076_v20 = vsel %vm1564_vm1, %v1590_v43, %v1591_v10  ;;  %v1595_v24 = vrot.slane %v8587_v60, 2 }
  0x80   : > { %7405 = vmatprep.subr.bf16.mxu0 %v7404_v23  ;;  %v9067_v29 = vsel %vm569_vm0, %v670_v11, %v671_v61  ;;  %11044 = vst [vmem:[#allocation64_spill] sm:$0xff] %v9076_v20  ;;  %v1596_v28 = vrot.slane %v8591_v63, 2  ;;  %v9081_v56 = vld [vmem:[%s8365_s28 + $0x240] sm:$0xff]  ;;  %v9084_v11 = vld [vmem:[%s8365_s28 + $0x248] sm:$0xff]  ;;  %v7412_v59 = vpack.c.bf16 %v433_v1, %v432_v27  ;;  %v435_v43 = vld [vmem:[%s10720_s1 + $0x358] sm:$0xff]  ;;  %v1598_v27 = vrot.slane %v8618_v18, 2 }
  0x81   : > { %6139 = vmatmul.mubr.f32.gmra.mrb[36].mxu1 %v9022_v26  ;;  %11043 = vst [vmem:[#allocation63_spill] sm:$0xff] %v9067_v29  ;;  %v675_v26 = vrot.slane %v9044_v48, 1  ;;  %v9096_v60 = vsel %vm569_vm0, %v671_v61, %v673_v2  ;;  %v9102_v1 = vsel %vm1564_vm1, %v1591_v10, %v1593_v53  ;;  %v1600_v18 = vrot.slane %v8621_v19, 2  ;;  %v9121_v10 = vld [vmem:[%s8365_s28 + $0x260] sm:$0xff]  ;;  %v437_v53 = vld [vmem:[%s10720_s1 + $0x368] sm:$0xff] }
  0x82   : > { %6731 = vmatmul.mubr.f32.gmra.mrb[4].mxu0 %v9028_v17  ;;  %6141 = vmatprep.mubr.f32.mxu1 %v9031_v8  ;;  %v676_v17 = vrot.slane %v9047_v6, 1  ;;  %v9073_v8 = vld [vmem:[%s8365_s28 + $0x238] sm:$0x3]  ;;  %11045 = vst [vmem:[#allocation65_spill] sm:$0xff] %v9096_v60  ;;  %11046 = vst [vmem:[#allocation66_spill] sm:$0xff] %v9102_v1  ;;  %v9113_v61 = vsel %vm1564_vm1, %v1595_v24, %v1596_v28  ;;  %v1601_v2 = vrot.slane %v8625_v21, 2 }
  0x83   : > { %6733 = vmatprep.mubr.f32.mxu0 %v9039_v58  ;;  %7407 = vmatpush3.bf16.msra.mxu0 %v7404_v23  ;;  %v434_v23 = vld [vmem:[%s10720_s1 + $0x350] sm:$0xff]  ;;  %v678_v63 = vrot.slane %v9073_v8, 1  ;;  %v681_v58 = vrot.slane %v9084_v11, 1  ;;  %11048 = vst [vmem:[#allocation68_spill] sm:$0xff] %v9113_v61  ;;  %v9136_v21 = vsel %vm1564_vm1, %v1596_v28, %v1598_v27  ;;  %v1605_v28 = vrot.slane %v8655_v47, 2 }
  0x84   : > { %7409 = vmatprep.subr.bf16.mxu0 %v7408_v55  ;;  %11050 = vst [vmem:[#allocation70_spill] sm:$0xff] %v9136_v21  ;;  %v9155_v27 = vld [vmem:[%s8365_s28 + $0x270] sm:$0xff] }
  0x85   : > { %6142 = vmatmul.mubr.f32.gmra.mrb[38].mxu1 %v9059_v44  ;;  %v9105_v44 = vsel %vm569_vm0, %v675_v26, %v676_v17  ;;  %v7416_v26 = vpack.c.bf16 %v435_v43, %v434_v23  ;;  %v9133_v19 = vsel %vm569_vm0, %v676_v17, %v678_v63  ;;  %v1603_v43 = vrot.slane %v8652_v41, 2 }
  0x86   : > { %6734 = vmatmul.mubr.f32.gmra.mrb[6].mxu0 %v9062_v46  ;;  %6144 = vmatprep.mubr.f32.mxu1 %v9067_v29  ;;  %11047 = vst [vmem:[#allocation67_spill] sm:$0xff] %v9105_v44  ;;  %v680_v46 = vrot.slane %v9081_v56, 1  ;;  %v9110_v29 = vld [vmem:[%s8365_s28 + $0x250] sm:$0x3]  ;;  %11049 = vst [vmem:[#allocation69_spill] sm:$0xff] %v9133_v19  ;;  %v9150_v17 = vsel %vm1564_vm1, %v1600_v18, %v1601_v2  ;;  %v1606_v63 = vrot.slane %v8659_v49, 2 }
  0x87   : > { %6736 = vmatprep.mubr.f32.mxu0 %v9076_v20  ;;  %7411 = vmatpush3.bf16.msra.mxu0 %v7408_v55  ;;  %v9118_v20 = vld [vmem:[%s8365_s28 + $0x258] sm:$0xff]  ;;  %v436_v55 = vld [vmem:[%s10720_s1 + $0x360] sm:$0xff]  ;;  %v683_v24 = vrot.slane %v9110_v29, 1  ;;  %11052 = vst [vmem:[#allocation72_spill] sm:$0xff] %v9150_v17 }
  0x88   : > { %7413 = vmatprep.subr.bf16.mxu0 %v7412_v59  ;;  %v9141_v23 = vsel %vm569_vm0, %v680_v46, %v681_v58  ;;  %v9158_v46 = vld [vmem:[%s8365_s28 + $0x278] sm:$0xff]  ;;  %v7420_v41 = vpack.c.bf16 %v437_v53, %v436_v55  ;;  %v1608_v55 = vrot.slane %v8680_v4, 2  ;;  %v9176_v53 = vsel %vm1564_vm1, %v1601_v2, %v1603_v43  ;;  %v9195_v2 = vld [vmem:[%s8365_s28 + $0x290] sm:$0xff]  ;;  %v441_v43 = vld [vmem:[%s10720_s1 + $0x388] sm:$0xff] }
  0x89   : > { %6145 = vmatmul.mubr.f32.gmra.mrb[40].mxu1 %v9096_v60  ;;  %11051 = vst [vmem:[#allocation71_spill] sm:$0xff] %v9141_v23  ;;  %v685_v60 = vrot.slane %v9118_v20, 1  ;;  %v439_v18 = vld [vmem:[%s10720_s1 + $0x378] sm:$0xff]  ;;  %v9170_v47 = vsel %vm569_vm0, %v681_v58, %v683_v24  ;;  %11054 = vst [vmem:[#allocation74_spill] sm:$0xff] %v9176_v53  ;;  %v9187_v58 = vsel %vm1564_vm1, %v1605_v28, %v1606_v63  ;;  %v1610_v4 = vrot.slane %v8683_v5, 2 }
  0x8a   : > { %6737 = vmatmul.mubr.f32.gmra.mrb[8].mxu0 %v9102_v1  ;;  %6147 = vmatprep.mubr.f32.mxu1 %v9105_v44  ;;  %v686_v1 = vrot.slane %v9121_v10, 1  ;;  %v9147_v44 = vld [vmem:[%s8365_s28 + $0x268] sm:$0x3]  ;;  %11053 = vst [vmem:[#allocation73_spill] sm:$0xff] %v9170_v47  ;;  %11056 = vst [vmem:[#allocation76_spill] sm:$0xff] %v9187_v58  ;;  %v1611_v24 = vrot.slane %v8687_v13, 2  ;;  %v9210_v13 = vsel %vm1564_vm1, %v1606_v63, %v1608_v55 }
  0x8b   : > { %6739 = vmatprep.mubr.f32.mxu0 %v9113_v61  ;;  %7415 = vmatpush3.bf16.msra.mxu0 %v7412_v59  ;;  %v438_v59 = vld [vmem:[%s10720_s1 + $0x370] sm:$0xff]  ;;  %v688_v49 = vrot.slane %v9147_v44, 1  ;;  %v691_v61 = vrot.slane %v9158_v46, 1  ;;  %11058 = vst [vmem:[#allocation78_spill] sm:$0xff] %v9210_v13  ;;  %v1615_v63 = vrot.slane %v8717_v42, 2  ;;  %v9229_v55 = vld [vmem:[%s8365_s28 + $0x2a0] sm:$0xff] }
  0x8c   : > { %7417 = vmatprep.subr.bf16.mxu0 %v7416_v26 }
  0x8d   : > { %6148 = vmatmul.mubr.f32.gmra.mrb[42].mxu1 %v9133_v19  ;;  %v9179_v19 = vsel %vm569_vm0, %v685_v60, %v686_v1  ;;  %v7424_v60 = vpack.c.bf16 %v439_v18, %v438_v59  ;;  %v9207_v5 = vsel %vm569_vm0, %v686_v1, %v688_v49  ;;  %v1613_v18 = vrot.slane %v8714_v40, 2 }
  0x8e   : > { %6740 = vmatmul.mubr.f32.gmra.mrb[10].mxu0 %v9136_v21  ;;  %6150 = vmatprep.mubr.f32.mxu1 %v9141_v23  ;;  %11055 = vst [vmem:[#allocation75_spill] sm:$0xff] %v9179_v19  ;;  %v690_v21 = vrot.slane %v9155_v27, 1  ;;  %v9184_v23 = vld [vmem:[%s8365_s28 + $0x280] sm:$0x3]  ;;  %11057 = vst [vmem:[#allocation77_spill] sm:$0xff] %v9207_v5  ;;  %v9224_v1 = vsel %vm1564_vm1, %v1610_v4, %v1611_v24  ;;  %v1616_v49 = vrot.slane %v8721_v50, 2 }
  0x8f   : > { %6742 = vmatprep.mubr.f32.mxu0 %v9150_v17  ;;  %7419 = vmatpush3.bf16.msra.mxu0 %v7416_v26  ;;  %v9192_v17 = vld [vmem:[%s8365_s28 + $0x288] sm:$0xff]  ;;  %v440_v26 = vld [vmem:[%s10720_s1 + $0x380] sm:$0xff]  ;;  %v693_v28 = vrot.slane %v9184_v23, 1  ;;  %11060 = vst [vmem:[#allocation80_spill] sm:$0xff] %v9224_v1  ;;  %v9246_v4 = vsel %vm1564_vm1, %v1611_v24, %v1613_v18  ;;  %v9262_v24 = vld [vmem:[%s8365_s28 + $0x2b8] sm:$0xff] }
  0x90   : > { %7421 = vmatprep.subr.bf16.mxu0 %v7420_v41  ;;  %v9215_v59 = vsel %vm569_vm0, %v690_v21, %v691_v61  ;;  %v9232_v21 = vld [vmem:[%s8365_s28 + $0x2a8] sm:$0xff]  ;;  %v9234_v40 = vpack.c.bf16 %v441_v43, %v440_v26  ;;  %11062 = vst [vmem:[#allocation82_spill] sm:$0xff] %v9246_v4  ;;  %v700_v43 = vrot.slane %v9229_v55, 1  ;;  %v9265_v18 = vld [vmem:[%s8365_s28 + $0x2c0] sm:$0xff] }
  0x91   : > { %6151 = vmatmul.mubr.f32.gmra.mrb[44].mxu1 %v9170_v47  ;;  %11059 = vst [vmem:[#allocation79_spill] sm:$0xff] %v9215_v59  ;;  %v695_v47 = vrot.slane %v9192_v17, 1  ;;  %v9240_v42 = vsel %vm569_vm0, %v691_v61, %v693_v28  ;;  %v9257_v61 = vsel %vm1564_vm1, %v1615_v63, %v1616_v49  ;;  %v1621_v28 = vrot.slane %v8751_v9, 2 }
  0x92   : > { %6743 = vmatmul.mubr.f32.gmra.mrb[12].mxu0 %v9176_v53  ;;  %6153 = vmatprep.mubr.f32.mxu1 %v9179_v19  ;;  %v696_v53 = vrot.slane %v9195_v2, 1  ;;  %v9221_v19 = vld [vmem:[%s8365_s28 + $0x298] sm:$0x3]  ;;  %11061 = vst [vmem:[#allocation81_spill] sm:$0xff] %v9240_v42  ;;  %11064 = vst [vmem:[#allocation84_spill] sm:$0xff] %v9257_v61  ;;  %v1623_v63 = vrot.slane %v8766_v37, 2 }
  0x93   : > { %6745 = vmatprep.mubr.f32.mxu0 %v9187_v58  ;;  %7423 = vmatpush3.bf16.msra.mxu0 %v7420_v41  ;;  %v698_v50 = vrot.slane %v9221_v19, 1  ;;  %v1618_v41 = vrot.slane %v8742_v45, 2  ;;  %v1620_v45 = vrot.slane %v8748_v3, 2  ;;  %v9602_v58 = vld [vmem:[%s8365_s28 + $0x80] sm:$0xff] }
  0x94   : > { %7425 = vmatprep.subr.bf16.mxu0 %v7424_v60  ;;  %v9249_v26 = vsel %vm569_vm0, %v695_v47, %v696_v53 }
  0x95   : > { %6154 = vmatmul.mubr.f32.gmra.mrb[46].mxu1 %v9207_v5  ;;  %11063 = vst [vmem:[#allocation83_spill] sm:$0xff] %v9249_v26  ;;  %v701_v5 = vrot.slane %v9232_v21, 1  ;;  %v9272_v47 = vsel %vm569_vm0, %v696_v53, %v698_v50  ;;  %v9275_v3 = vsel %vm1564_vm1, %v1616_v49, %v1618_v41  ;;  %v9289_v53 = vsel %vm1564_vm1, %v1620_v45, %v1621_v28  ;;  %v9294_v41 = vld [vmem:[%s8365_s28 + $0x2d0] sm:$0xff] }
  0x96   : > { %6746 = vmatmul.mubr.f32.gmra.mrb[14].mxu0 %v9210_v13  ;;  %6156 = vmatprep.mubr.f32.mxu1 %v9215_v59  ;;  %v9254_v59 = vld [vmem:[%s8365_s28 + $0x2b0] sm:$0x3]  ;;  %11065 = vst [vmem:[#allocation85_spill] sm:$0xff] %v9272_v47  ;;  %11066 = vst [vmem:[#allocation86_spill] sm:$0xff] %v9275_v3  ;;  %v1625_v49 = vrot.slane %v8769_v25, 2  ;;  %v1626_v50 = vrot.slane %v8774_v35, 2  ;;  %v9309_v35 = vsel %vm1564_vm1, %v1621_v28, %v1623_v63 }
  0x97   : > { %6748 = vmatprep.mubr.f32.mxu0 %v9224_v1  ;;  %7427 = vmatpush3.bf16.msra.mxu0 %v7424_v60  ;;  %v703_v9 = vrot.slane %v9254_v59, 1  ;;  %v9280_v60 = vsel %vm569_vm0, %v700_v43, %v701_v5  ;;  %11068 = vst [vmem:[#allocation88_spill] sm:$0xff] %v9289_v53  ;;  %v9297_v43 = vld [vmem:[%s8365_s28 + $0x2d8] sm:$0xff]  ;;  %v1628_v25 = vrot.slane %v8795_v30, 2  ;;  %11070 = vst [vmem:[#allocation90_spill] sm:$0xff] %v9309_v35  ;;  %v1630_v30 = vrot.slane %v8799_v16, 2 }
  0x98   : > { %7429 = vmatprep.subr.bf16.mxu0 %v9234_v40  ;;  %11067 = vst [vmem:[#allocation87_spill] sm:$0xff] %v9280_v60  ;;  %v9328_v28 = vld [vmem:[%s8365_s28 + $0x2f0] sm:$0xff] }
  0x99   : > { %6157 = vmatmul.mubr.f32.gmra.mrb[48].mxu1 %v9240_v42  ;;  %v705_v42 = vrot.slane %v9262_v24, 1  ;;  %v9303_v37 = vsel %vm569_vm0, %v701_v5, %v703_v9  ;;  %v9320_v5 = vsel %vm1564_vm1, %v1625_v49, %v1626_v50  ;;  %v1631_v9 = vrot.slane %v8802_v51, 2 }
  0x9a   : > { %6749 = vmatmul.mubr.f32.gmra.mrb[16].mxu0 %v9246_v4  ;;  %6159 = vmatprep.mubr.f32.mxu1 %v9249_v26  ;;  %v706_v4 = vrot.slane %v9265_v18, 1  ;;  %v9286_v26 = vld [vmem:[%s8365_s28 + $0x2c8] sm:$0x3]  ;;  %11069 = vst [vmem:[#allocation89_spill] sm:$0xff] %v9303_v37  ;;  %11072 = vst [vmem:[#allocation92_spill] sm:$0xff] %v9320_v5  ;;  %v9337_v63 = vsel %vm1564_vm1, %v1626_v50, %v1628_v25  ;;  %v1633_v49 = vrot.slane %v8817_v62, 2 }
  0x9b   : > { %6751 = vmatprep.mubr.f32.mxu0 %v9257_v61  ;;  %v708_v45 = vrot.slane %v9286_v26, 1  ;;  %11074 = vst [vmem:[#allocation94_spill] sm:$0xff] %v9337_v63  ;;  %v1635_v50 = vrot.slane %v8821_v57, 2  ;;  %v9356_v25 = vld [vmem:[%s8365_s28 + $0x300] sm:$0xff]  ;;  %v1638_v57 = vrot.slane %v8845_v54, 2  ;;  %v1640_v54 = vrot.slane %v8849_v52, 2 }
  0x9c   : > { %v9312_v61 = vsel %vm569_vm0, %v705_v42, %v706_v4  ;;  %11077 = vst [vmem:[#allocation97_spill] sm:$0xff] %v9356_v25 }
  0x9d   : > { %6160 = vmatmul.mubr.f32.gmra.mrb[50].mxu1 %v9272_v47  ;;  %11071 = vst [vmem:[#allocation91_spill] sm:$0xff] %v9312_v61  ;;  %v710_v47 = vrot.slane %v9294_v41, 1  ;;  %v9334_v42 = vsel %vm569_vm0, %v706_v4, %v708_v45  ;;  %v9351_v4 = vsel %vm1564_vm1, %v1630_v30, %v1631_v9  ;;  %v1636_v45 = vrot.slane %v8824_v15, 2 }
  0x9e   : > { %6752 = vmatmul.mubr.f32.gmra.mrb[18].mxu0 %v9275_v3  ;;  %6162 = vmatprep.mubr.f32.mxu1 %v9280_v60  ;;  %v711_v3 = vrot.slane %v9297_v43, 1  ;;  %v9317_v60 = vld [vmem:[%s8365_s28 + $0x2e0] sm:$0x3]  ;;  %11073 = vst [vmem:[#allocation93_spill] sm:$0xff] %v9334_v42  ;;  %11076 = vst [vmem:[#allocation96_spill] sm:$0xff] %v9351_v4  ;;  %v9371_v15 = vsel %vm1564_vm1, %v1631_v9, %v1633_v49 }
  0x9f   : > { %6754 = vmatprep.mubr.f32.mxu0 %v9289_v53  ;;  %v9325_v53 = vld [vmem:[%s8365_s28 + $0x2e8] sm:$0xff]  ;;  %v713_v16 = vrot.slane %v9317_v60, 1  ;;  %11080 = vst [vmem:[#allocation100_spill] sm:$0xff] %v9371_v15  ;;  %v9390_v9 = vld [vmem:[%s8365_s28 + $0x320] sm:$0xff]  ;;  %v9399_v49 = vsel %vm1564_vm1, %v1636_v45, %v1638_v57 }
  0xa0   : > { %v9342_v51 = vsel %vm569_vm0, %v710_v47, %v711_v3  ;;  %v9359_v47 = vld [vmem:[%s8365_s28 + $0x308] sm:$0xff]  ;;  %11084 = vst [vmem:[#allocation104_spill] sm:$0xff] %v9390_v9  ;;  %11086 = vst [vmem:[#allocation106_spill] sm:$0xff] %v9399_v49  ;;  %v11091_v57 = vld [vmem:[#allocation41_spill] sm:$0xff] }
  0xa1   : > { %6163 = vmatmul.mubr.f32.gmra.mrb[52].mxu1 %v9303_v37  ;;  %11075 = vst [vmem:[#allocation95_spill] sm:$0xff] %v9342_v51  ;;  %v715_v37 = vrot.slane %v9325_v53, 1  ;;  %11078 = vst [vmem:[#allocation98_spill] sm:$0xff] %v9359_v47  ;;  %v9365_v62 = vsel %vm569_vm0, %v711_v3, %v713_v16  ;;  %v9382_v3 = vsel %vm1564_vm1, %v1635_v50, %v1636_v45  ;;  %v1641_v16 = vrot.slane %v8852_v34, 2  ;;  %v11088_v50 = vld [vmem:[#allocation39_spill] sm:$0xff]  ;;  %v11090_v45 = vld [vmem:[#allocation40_spill] sm:$0xff] }
  0xa2   : > { %6755 = vmatmul.mubr.f32.gmra.mrb[20].mxu0 %v9309_v35  ;;  %6165 = vmatprep.mubr.f32.mxu1 %v9312_v61  ;;  %v716_v35 = vrot.slane %v9328_v28, 1  ;;  %v9348_v61 = vld [vmem:[%s8365_s28 + $0x2f8] sm:$0x3]  ;;  %11079 = vst [vmem:[#allocation99_spill] sm:$0xff] %v9365_v62  ;;  %11082 = vst [vmem:[#allocation102_spill] sm:$0xff] %v9382_v3  ;;  %v1643_v1 = vrot.slane %v11088_v50, 2 }
  0xa3   : > { %6757 = vmatprep.mubr.f32.mxu0 %v9320_v5  ;;  %v718_v30 = vrot.slane %v9348_v61, 1  ;;  %v3157_v13 = vrot.slane %v11091_v57, 2  ;;  %v3159_v57 = vrot.slane %v8892_v36, 2 }
  0xa4   : > { %v9374_v5 = vsel %vm569_vm0, %v715_v37, %v716_v35 }
  0xa5   : > { %6166 = vmatmul.mubr.f32.gmra.mrb[54].mxu1 %v9334_v42  ;;  %11081 = vst [vmem:[#allocation101_spill] sm:$0xff] %v9374_v5  ;;  %v720_v42 = vrot.slane %v9356_v25, 1  ;;  %v9396_v37 = vsel %vm569_vm0, %v716_v35, %v718_v30  ;;  %v9413_v35 = vsel %vm1564_vm1, %v1640_v54, %v1641_v16  ;;  %v3156_v30 = vrot.slane %v11090_v45, 2 }
  0xa6   : > { %6758 = vmatmul.mubr.f32.gmra.mrb[22].mxu0 %v9337_v63  ;;  %6168 = vmatprep.mubr.f32.mxu1 %v9342_v51  ;;  %v721_v63 = vrot.slane %v9359_v47, 1  ;;  %v9379_v51 = vld [vmem:[%s8365_s28 + $0x310] sm:$0x3]  ;;  %11085 = vst [vmem:[#allocation105_spill] sm:$0xff] %v9396_v37  ;;  %11089 = vst [vmem:[#allocation39_spill] sm:$0xff] %v9413_v35  ;;  %v9426_v54 = vsel %vm1564_vm1, %v1641_v16, %v1643_v1  ;;  %v9445_v36 = vsel %vm1564_vm1, %v3157_v13, %v3159_v57 }
  0xa7   : > { %6760 = vmatprep.mubr.f32.mxu0 %v9351_v4  ;;  %v9387_v4 = vld [vmem:[%s8365_s28 + $0x318] sm:$0xff]  ;;  %v723_v52 = vrot.slane %v9379_v51, 1  ;;  %11093 = vst [vmem:[#allocation41_spill] sm:$0xff] %v9426_v54  ;;  %v1660_v57 = vrot.slane %v8970_v32, 2 }
  0xa8   : > { %11083 = vst [vmem:[#allocation103_spill] sm:$0xff] %v9387_v4  ;;  %v9404_v34 = vsel %vm569_vm0, %v720_v42, %v721_v63 }
  0xa9   : > { %6169 = vmatmul.mubr.f32.gmra.mrb[56].mxu1 %v9365_v62  ;;  %11087 = vst [vmem:[#allocation107_spill] sm:$0xff] %v9404_v34  ;;  %v725_v62 = vrot.slane %v9387_v4, 1  ;;  %v9421_v42 = vsel %vm569_vm0, %v721_v63, %v723_v52  ;;  %v1656_v52 = vrot.slane %v8939_v39, 2 }
  0xaa   : > { %6761 = vmatmul.mubr.f32.gmra.mrb[24].mxu0 %v9371_v15  ;;  %6171 = vmatprep.mubr.f32.mxu1 %v9374_v5  ;;  %v726_v15 = vrot.slane %v9390_v9, 1  ;;  %v9410_v5 = vld [vmem:[%s8365_s28 + $0x328] sm:$0x3]  ;;  %11092 = vst [vmem:[#allocation40_spill] sm:$0xff] %v9421_v42 }
  0xab   : > { %6763 = vmatprep.mubr.f32.mxu0 %v9382_v3  ;;  %v728_v50 = vrot.slane %v9410_v5, 1  ;;  %v11097_v3 = vld [vmem:[#allocation47_spill] sm:$0xff] }
  0xac   : > { %v9429_v45 = vsel %vm569_vm0, %v725_v62, %v726_v15  ;;  %v1651_v63 = vrot.slane %v11097_v3, 2  ;;  %11099 = vst [vmem:[#allocation47_spill] sm:$0xff] %v9445_v36  ;;  %v1653_v62 = vrot.slane %v8928_v0, 2  ;;  %v1655_v3 = vrot.slane %v8936_v33, 2  ;;  %v9462_v0 = vld [vmem:[%s8365_s28] sm:$0xff] }
  0xad   : > { %6172 = vmatmul.mubr.f32.gmra.mrb[58].mxu1 %v9396_v37  ;;  %11094 = vst [vmem:[#allocation108_spill] sm:$0xff] %v9429_v45  ;;  %v9433_v37 = vsel %vm1564_vm1, %v3156_v30, %v3157_v13  ;;  %v9441_v1 = vsel %vm569_vm0, %v726_v15, %v728_v50  ;;  %v362_v15 = vld [vmem:[%s10720_s1 + $0x110] sm:$0xff]  ;;  %v363_v13 = vld [vmem:[%s10720_s1 + $0x118] sm:$0xff]  ;;  %11101 = vst [vmem:[#allocation111_spill] sm:$0xff] %v9462_v0  ;;  %v1658_v30 = vrot.slane %v8962_v31, 2 }
  0xae   : > { %6764 = vmatmul.mubr.f32.gmra.mrb[26].mxu0 %v9399_v49  ;;  %6174 = vmatprep.mubr.f32.mxu1 %v9404_v34  ;;  %11095 = vst [vmem:[#allocation109_spill] sm:$0xff] %v9433_v37  ;;  %v11096_v49 = vld [vmem:[#allocation46_spill] sm:$0xff]  ;;  %v9471_v50 = vsel %vm1564_vm1, %v1655_v3, %v1656_v52  ;;  %v9488_v3 = vld [vmem:[%s8365_s28 + $0x18] sm:$0xff] }
  0xaf   : > { %6766 = vmatprep.mubr.f32.mxu0 %v9413_v35  ;;  %v1650_v34 = vrot.slane %v11096_v49, 2  ;;  %11098 = vst [vmem:[#allocation46_spill] sm:$0xff] %v9441_v1  ;;  %11103 = vst [vmem:[#allocation113_spill] sm:$0xff] %v9471_v50  ;;  %v365_v31 = vld [vmem:[%s10720_s1 + $0x128] sm:$0xff] }
  0xb0   : > { %v9577_v35 = vld [vmem:[%s8365_s28 + $0x68] sm:$0xff] }
  0xb1   : > { %6175 = vmatmul.mubr.f32.gmra.mrb[60].mxu1 %v9421_v42  ;;  %v9449_v16 = vsel %vm1564_vm1, %v1650_v34, %v1651_v63  ;;  %v9467_v34 = vsel %vm1564_vm1, %v1651_v63, %v1653_v62  ;;  %v364_v63 = vld [vmem:[%s10720_s1 + $0x120] sm:$0xff]  ;;  %v11105_v62 = vld [vmem:[#allocation36_spill] sm:$0xff]  ;;  %v1665_v42 = vrot.slane %v9007_v38, 2 }
  0xb2   : > { %6767 = vmatmul.mubr.f32.gmra.mrb[28].mxu0 %v9426_v54  ;;  %6177 = vmatprep.mubr.f32.mxu1 %v9429_v45  ;;  %11100 = vst [vmem:[#allocation110_spill] sm:$0xff] %v9449_v16  ;;  %11102 = vst [vmem:[#allocation112_spill] sm:$0xff] %v9467_v34  ;;  %v9552_v54 = vld [vmem:[%s8365_s28 + $0x50] sm:$0xff] }
  0xb3   : > { %6769 = vmatprep.mubr.f32.mxu0 %v9433_v37  ;;  %v1661_v37 = vrot.slane %v8973_v22, 2  ;;  %11106 = vst [vmem:[#allocation36_spill] sm:$0xff] %v9488_v3 }
  0xb5   : > { %6178 = vmatmul.mubr.f32.gmra.mrb[62].mxu1 %v9441_v1  ;;  %v9476_v1 = vld [vmem:[%s8365_s28 + $0x8] sm:$0xff]  ;;  %v9497_v45 = vsel %vm1564_vm1, %v1660_v57, %v1661_v37 }
  0xb6   : > { %6770 = vmatmul.mubr.f32.gmra.mrb[30].mxu0 %v9445_v36  ;;  %6212 = vmatprep.mubr.f32.mxu1 %v9462_v0  ;;  %v7272_v36 = vpack.c.bf16 %v363_v13, %v362_v15  ;;  %11104 = vst [vmem:[#allocation114_spill] sm:$0xff] %v9476_v1  ;;  %v9493_v15 = vsel %vm1564_vm1, %v1656_v52, %v1658_v30  ;;  %v1663_v13 = vrot.slane %v8999_v12, 2  ;;  %11108 = vst [vmem:[#allocation116_spill] sm:$0xff] %v9497_v45  ;;  %v366_v52 = vld [vmem:[%s10720_s1 + $0x130] sm:$0xff]  ;;  %v367_v12 = vld [vmem:[%s10720_s1 + $0x138] sm:$0xff] }
  0xb7   : > { %6772 = vmatprep.mubr.f32.mxu0 %v9449_v16  ;;  %11107 = vst [vmem:[#allocation115_spill] sm:$0xff] %v9493_v15  ;;  %v9502_v16 = vld [vmem:[%s8365_s28 + $0x20] sm:$0xff]  ;;  %v9513_v30 = vld [vmem:[%s8365_s28 + $0x30] sm:$0xff] }
  0xb8   : > { %11109 = vst [vmem:[#allocation117_spill] sm:$0xff] %v9502_v16  ;;  %v9518_v57 = vsel %vm1564_vm1, %v1661_v37, %v1663_v13  ;;  %v368_v37 = vld [vmem:[%s10720_s1 + $0x140] sm:$0xff]  ;;  %v1673_v13 = vrot.slane %v9073_v8, 2  ;;  %v371_v8 = vld [vmem:[%s10720_s1 + $0x158] sm:$0xff]  ;;  %v9654_v0 = vld [vmem:[%s8365_s28 + $0xb0] sm:$0xff] }
  0xb9   : > { %6213 = vmatmul.mubr.f32.vlgmr.msra.gmra.mrb[0].mxu1 %v9476_v1  ;;  %11110 = vst [vmem:[#allocation118_spill] sm:$0xff] %v9518_v57  ;;  %v9627_v1 = vld [vmem:[%s8365_s28 + $0x98] sm:$0xff] }
  0xba   : > { %6773 = vmatmul.mubr.f32.gmra.mrb[32].mxu0 %v9467_v34  ;;  %7271 = vmatpush3.bf16.msra.mxu1 %v11105_v62  ;;  %v1666_v34 = vrot.slane %v9010_v7, 2  ;;  %v7276_v62 = vpack.c.bf16 %v365_v31, %v364_v63  ;;  %v1668_v63 = vrot.slane %v9036_v14, 2  ;;  %v369_v14 = vld [vmem:[%s10720_s1 + $0x148] sm:$0xff] }
  0xbb   : > { %6215 = vmatprep.mubr.f32.mxu1 %v9488_v3  ;;  %6775 = vmatprep.mubr.f32.mxu0 %v9471_v50  ;;  %v1671_v3 = vrot.slane %v9047_v6, 2  ;;  %v9527_v50 = vld [vmem:[%s8365_s28 + $0x38] sm:$0xff] }
  0xbc   : > { %7273 = vmatprep.subr.bf16.mxu1 %v7272_v36  ;;  %v9522_v31 = vsel %vm1564_vm1, %v1665_v42, %v1666_v34  ;;  %11112 = vst [vmem:[#allocation120_spill] sm:$0xff] %v9527_v50  ;;  %v9538_v42 = vld [vmem:[%s8365_s28 + $0x48] sm:$0xff] }
  0xbd   : > { %6216 = vmatmul.mubr.f32.gmra.mrb[2].mxu1 %v9502_v16  ;;  %11111 = vst [vmem:[#allocation119_spill] sm:$0xff] %v9522_v31  ;;  %v1670_v16 = vrot.slane %v9044_v48, 2 }
  0xbe   : > { %6776 = vmatmul.mubr.f32.gmra.mrb[34].mxu0 %v9493_v15  ;;  %6218 = vmatprep.mubr.f32.mxu1 %v9513_v30  ;;  %v7280_v15 = vpack.c.bf16 %v367_v12, %v366_v52  ;;  %v1675_v12 = vrot.slane %v9081_v56, 2 }
  0xbf   : > { %6778 = vmatprep.mubr.f32.mxu0 %v9497_v45  ;;  %7275 = vmatpush3.bf16.msra.mxu1 %v7272_v36  ;;  %v9543_v36 = vsel %vm1564_vm1, %v1666_v34, %v1668_v63  ;;  %v9547_v52 = vsel %vm1564_vm1, %v1670_v16, %v1671_v3  ;;  %v7284_v45 = vpack.c.bf16 %v369_v14, %v368_v37  ;;  %v370_v34 = vld [vmem:[%s10720_s1 + $0x150] sm:$0xff]  ;;  %v9563_v16 = vld [vmem:[%s8365_s28 + $0x60] sm:$0xff]  ;;  %v1678_v63 = vrot.slane %v9110_v29, 2  ;;  %v373_v29 = vld [vmem:[%s10720_s1 + $0x168] sm:$0xff] }
  0xc0   : > { %7277 = vmatprep.subr.bf16.mxu1 %v7276_v62  ;;  %11113 = vst [vmem:[#allocation121_spill] sm:$0xff] %v9543_v36  ;;  %11114 = vst [vmem:[#allocation122_spill] sm:$0xff] %v9547_v52  ;;  %v1680_v14 = vrot.slane %v9118_v20, 2 }
  0xc1   : > { %6219 = vmatmul.mubr.f32.gmra.mrb[4].mxu1 %v9527_v50 }
  0xc2   : > { %6779 = vmatmul.mubr.f32.gmra.mrb[36].mxu0 %v9518_v57  ;;  %6221 = vmatprep.mubr.f32.mxu1 %v9538_v42  ;;  %v1676_v57 = vrot.slane %v9084_v11, 2 }
  0xc3   : > { %6781 = vmatprep.mubr.f32.mxu0 %v9522_v31  ;;  %7279 = vmatpush3.bf16.msra.mxu1 %v7276_v62  ;;  %v9568_v62 = vsel %vm1564_vm1, %v1671_v3, %v1673_v13  ;;  %v7288_v31 = vpack.c.bf16 %v371_v8, %v370_v34  ;;  %v372_v3 = vld [vmem:[%s10720_s1 + $0x160] sm:$0xff]  ;;  %v1685_v8 = vrot.slane %v9155_v27, 2 }
  0xc4   : > { %7281 = vmatprep.subr.bf16.mxu1 %v7280_v15  ;;  %11115 = vst [vmem:[#allocation123_spill] sm:$0xff] %v9568_v62  ;;  %v9572_v37 = vsel %vm1564_vm1, %v1675_v12, %v1676_v57  ;;  %v9593_v13 = vsel %vm1564_vm1, %v1676_v57, %v1678_v63  ;;  %v1683_v12 = vrot.slane %v9147_v44, 2  ;;  %v374_v57 = vld [vmem:[%s10720_s1 + $0x170] sm:$0xff]  ;;  %v375_v44 = vld [vmem:[%s10720_s1 + $0x178] sm:$0xff] }
  0xc5   : > { %6222 = vmatmul.mubr.f32.gmra.mrb[6].mxu1 %v9552_v54  ;;  %11116 = vst [vmem:[#allocation124_spill] sm:$0xff] %v9572_v37  ;;  %11117 = vst [vmem:[#allocation125_spill] sm:$0xff] %v9593_v13 }
  0xc6   : > { %6782 = vmatmul.mubr.f32.gmra.mrb[38].mxu0 %v9543_v36  ;;  %6224 = vmatprep.mubr.f32.mxu1 %v9563_v16  ;;  %v1681_v36 = vrot.slane %v9121_v10, 2 }
  0xc7   : > { %6784 = vmatprep.mubr.f32.mxu0 %v9547_v52  ;;  %7283 = vmatpush3.bf16.msra.mxu1 %v7280_v15  ;;  %v9588_v15 = vld [vmem:[%s8365_s28 + $0x78] sm:$0xff]  ;;  %v7292_v52 = vpack.c.bf16 %v373_v29, %v372_v3  ;;  %v1690_v29 = vrot.slane %v9192_v17, 2 }
  0xc8   : > { %7285 = vmatprep.subr.bf16.mxu1 %v7284_v45  ;;  %v9597_v34 = vsel %vm1564_vm1, %v1680_v14, %v1681_v36  ;;  %v9618_v63 = vsel %vm1564_vm1, %v1681_v36, %v1683_v12  ;;  %v1688_v14 = vrot.slane %v9184_v23, 2  ;;  %v376_v36 = vld [vmem:[%s10720_s1 + $0x180] sm:$0xff]  ;;  %v377_v23 = vld [vmem:[%s10720_s1 + $0x188] sm:$0xff] }
  0xc9   : > { %6225 = vmatmul.mubr.f32.gmra.mrb[8].mxu1 %v9577_v35  ;;  %11118 = vst [vmem:[#allocation126_spill] sm:$0xff] %v9597_v34  ;;  %11119 = vst [vmem:[#allocation127_spill] sm:$0xff] %v9618_v63 }
  0xca   : > { %6785 = vmatmul.mubr.f32.gmra.mrb[40].mxu0 %v9568_v62  ;;  %6227 = vmatprep.mubr.f32.mxu1 %v9588_v15  ;;  %v1686_v62 = vrot.slane %v9158_v46, 2 }
  0xcb   : > { %6787 = vmatprep.mubr.f32.mxu0 %v9572_v37  ;;  %7287 = vmatpush3.bf16.msra.mxu1 %v7284_v45  ;;  %v9613_v45 = vld [vmem:[%s8365_s28 + $0x90] sm:$0xff]  ;;  %v7296_v37 = vpack.c.bf16 %v375_v44, %v374_v57  ;;  %v1695_v44 = vrot.slane %v9229_v55, 2 }
  0xcc   : > { %7289 = vmatprep.subr.bf16.mxu1 %v7288_v31  ;;  %v9622_v3 = vsel %vm1564_vm1, %v1685_v8, %v1686_v62  ;;  %v9643_v12 = vsel %vm1564_vm1, %v1686_v62, %v1688_v14  ;;  %v1693_v8 = vrot.slane %v9221_v19, 2  ;;  %v9659_v19 = vld [vmem:[%s8365_s28 + $0xc0] sm:$0xff]  ;;  %v1698_v62 = vrot.slane %v9254_v59, 2 }
  0xcd   : > { %6228 = vmatmul.mubr.f32.gmra.mrb[10].mxu1 %v9602_v58  ;;  %11120 = vst [vmem:[#allocation128_spill] sm:$0xff] %v9622_v3  ;;  %11121 = vst [vmem:[#allocation129_spill] sm:$0xff] %v9643_v12 }
  0xce   : > { %6788 = vmatmul.mubr.f32.gmra.mrb[42].mxu0 %v9593_v13  ;;  %6230 = vmatprep.mubr.f32.mxu1 %v9613_v45  ;;  %v1691_v13 = vrot.slane %v9195_v2, 2 }
  0xcf   : > { %6790 = vmatprep.mubr.f32.mxu0 %v9597_v34  ;;  %7291 = vmatpush3.bf16.msra.mxu1 %v7288_v31  ;;  %v9638_v31 = vld [vmem:[%s8365_s28 + $0xa8] sm:$0xff]  ;;  %v1696_v34 = vrot.slane %v9232_v21, 2 }
  0xd0   : > { %7293 = vmatprep.subr.bf16.mxu1 %v7292_v52  ;;  %v9647_v57 = vsel %vm1564_vm1, %v1690_v29, %v1691_v13  ;;  %v1700_v29 = vrot.slane %v9262_v24, 2 }
  0xd1   : > { %6231 = vmatmul.mubr.f32.gmra.mrb[12].mxu1 %v9627_v1  ;;  %11122 = vst [vmem:[#allocation130_spill] sm:$0xff] %v9647_v57  ;;  %v9668_v14 = vsel %vm1564_vm1, %v1695_v44, %v1696_v34  ;;  %v9684_v59 = vsel %vm1564_vm1, %v1696_v34, %v1698_v62  ;;  %v1705_v44 = vrot.slane %v9294_v41, 2  ;;  %v1708_v34 = vrot.slane %v9317_v60, 2 }
  0xd2   : > { %6791 = vmatmul.mubr.f32.gmra.mrb[44].mxu0 %v9618_v63  ;;  %6233 = vmatprep.mubr.f32.mxu1 %v9638_v31  ;;  %v9651_v63 = vpack.c.bf16 %v377_v23, %v376_v36  ;;  %11125 = vst [vmem:[#allocation133_spill] sm:$0xff] %v9668_v14  ;;  %v1701_v36 = vrot.slane %v9265_v18, 2  ;;  %v9674_v23 = vld [vmem:[%s8365_s28 + $0xc8] sm:$0xff]  ;;  %11126 = vst [vmem:[#allocation134_spill] sm:$0xff] %v9684_v59 }
  0xd3   : > { %6793 = vmatprep.mubr.f32.mxu0 %v9622_v3  ;;  %7295 = vmatpush3.bf16.msra.mxu1 %v7292_v52  ;;  %v9664_v52 = vsel %vm1564_vm1, %v1691_v13, %v1693_v8  ;;  %v9679_v13 = vld [vmem:[%s8365_s28 + $0xd8] sm:$0xff]  ;;  %v9731_v3 = vld [vmem:[%s8365_s28 + $0x110] sm:$0xff] }
  0xd4   : > { %7297 = vmatprep.subr.bf16.mxu1 %v7296_v37  ;;  %11123 = vst [vmem:[#allocation131_spill] sm:$0xff] %v9651_v63  ;;  %11124 = vst [vmem:[#allocation132_spill] sm:$0xff] %v9664_v52  ;;  %v9688_v8 = vsel %vm1564_vm1, %v1700_v29, %v1701_v36  ;;  %v1710_v29 = vrot.slane %v9325_v53, 2 }
  0xd5   : > { %6234 = vmatmul.mubr.f32.gmra.mrb[14].mxu1 %v9654_v0  ;;  %11127 = vst [vmem:[#allocation135_spill] sm:$0xff] %v9688_v8 }
  0xd6   : > { %6794 = vmatmul.mubr.f32.gmra.mrb[46].mxu0 %v9643_v12  ;;  %6236 = vmatprep.mubr.f32.mxu1 %v9659_v19  ;;  %v9712_v12 = vld [vmem:[%s8365_s28 + $0xf8] sm:$0xff] }
  0xd7   : > { %6796 = vmatprep.mubr.f32.mxu0 %v9647_v57  ;;  %7299 = vmatpush3.bf16.msra.mxu1 %v7296_v37  ;;  %v1703_v37 = vrot.slane %v9286_v26, 2  ;;  %v9693_v57 = vld [vmem:[%s8365_s28 + $0xe0] sm:$0xff] }
  0xd8   : > { %7301 = vmatprep.subr.bf16.mxu1 %v9651_v63  ;;  %v9750_v63 = vld [vmem:[%s8365_s28 + $0x128] sm:$0xff] }
  0xd9   : > { %6237 = vmatmul.mubr.f32.gmra.mrb[16].mxu1 %v9674_v23  ;;  %v9703_v26 = vsel %vm1564_vm1, %v1701_v36, %v1703_v37  ;;  %v1713_v36 = vrot.slane %v9348_v61, 2 }
  0xda   : > { %6797 = vmatmul.mubr.f32.gmra.mrb[48].mxu0 %v9664_v52  ;;  %6239 = vmatprep.mubr.f32.mxu1 %v9679_v13  ;;  %v1706_v52 = vrot.slane %v9297_v43, 2  ;;  %11128 = vst [vmem:[#allocation136_spill] sm:$0xff] %v9703_v26 }
  0xdb   : > { %6799 = vmatprep.mubr.f32.mxu0 %v9668_v14  ;;  %v9698_v14 = vld [vmem:[%s8365_s28 + $0xf0] sm:$0xff] }
  0xdc   : > { %v9707_v62 = vsel %vm1564_vm1, %v1705_v44, %v1706_v52  ;;  %v9722_v60 = vsel %vm1564_vm1, %v1706_v52, %v1708_v34  ;;  %v1715_v44 = vrot.slane %v9356_v25, 2  ;;  %v9736_v52 = vld [vmem:[%s8365_s28 + $0x120] sm:$0xff]  ;;  %v1718_v34 = vrot.slane %v9379_v51, 2  ;;  %v9761_v51 = vld [vmem:[%s8365_s28 + $0x138] sm:$0xff] }
  0xdd   : > { %6240 = vmatmul.mubr.f32.gmra.mrb[18].mxu1 %v9693_v57  ;;  %11129 = vst [vmem:[#allocation137_spill] sm:$0xff] %v9707_v62  ;;  %11130 = vst [vmem:[#allocation138_spill] sm:$0xff] %v9722_v60  ;;  %v9778_v25 = vld [vmem:[%s8365_s28 + $0x140] sm:$0xff] }
  0xde   : > { %6800 = vmatmul.mubr.f32.gmra.mrb[50].mxu0 %v9684_v59  ;;  %6242 = vmatprep.mubr.f32.mxu1 %v9698_v14  ;;  %v1711_v59 = vrot.slane %v9328_v28, 2 }
  0xdf   : > { %6802 = vmatprep.mubr.f32.mxu0 %v9688_v8  ;;  %v9717_v8 = vld [vmem:[%s8365_s28 + $0x108] sm:$0xff] }
  0xe0   : > { %v9726_v37 = vsel %vm1564_vm1, %v1710_v29, %v1711_v59  ;;  %v9741_v61 = vsel %vm1564_vm1, %v1711_v59, %v1713_v36  ;;  %v9757_v59 = vld [vmem:[%s8365_s28 + $0x338] sm:$0xff] }
  0xe1   : > { %6243 = vmatmul.mubr.f32.gmra.mrb[20].mxu1 %v9712_v12  ;;  %11131 = vst [vmem:[#allocation139_spill] sm:$0xff] %v9726_v37  ;;  %11132 = vst [vmem:[#allocation140_spill] sm:$0xff] %v9741_v61 }
  0xe2   : > { %6803 = vmatmul.mubr.f32.gmra.mrb[52].mxu0 %v9703_v26  ;;  %6245 = vmatprep.mubr.f32.mxu1 %v9717_v8  ;;  %v1716_v26 = vrot.slane %v9359_v47, 2  ;;  %v9775_v47 = vld [vmem:[%s8365_s28 + $0x340] sm:$0x3] }
  0xe3   : > { %6805 = vmatprep.mubr.f32.mxu0 %v9707_v62  ;;  %v1720_v62 = vrot.slane %v9387_v4, 2  ;;  %11136 = vst [vmem:[#allocation144_spill] sm:$0xff] %v9775_v47 }
  0xe4   : > { %v9745_v29 = vsel %vm1564_vm1, %v1715_v44, %v1716_v26  ;;  %v9766_v36 = vsel %vm1564_vm1, %v1716_v26, %v1718_v34  ;;  %v1723_v44 = vrot.slane %v9410_v5, 2  ;;  %v9783_v26 = vld [vmem:[%s8365_s28 + $0x150] sm:$0xff] }
  0xe5   : > { %6246 = vmatmul.mubr.f32.gmra.mrb[22].mxu1 %v9731_v3  ;;  %11133 = vst [vmem:[#allocation141_spill] sm:$0xff] %v9745_v29  ;;  %11134 = vst [vmem:[#allocation142_spill] sm:$0xff] %v9766_v36 }
  0xe6   : > { %6806 = vmatmul.mubr.f32.gmra.mrb[54].mxu0 %v9722_v60  ;;  %6248 = vmatprep.mubr.f32.mxu1 %v9736_v52  ;;  %v1721_v60 = vrot.slane %v9390_v9, 2 }
  0xe7   : > { %6808 = vmatprep.mubr.f32.mxu0 %v9726_v37  ;;  %v9754_v37 = vld [vmem:[%s8365_s28 + $0x330] sm:$0xff] }
  0xe8   : > { %v9770_v9 = vsel %vm1564_vm1, %v1720_v62, %v1721_v60  ;;  %v3161_v4 = vrot.slane %v9754_v37, 2  ;;  %v9788_v5 = vsel %vm1564_vm1, %v1721_v60, %v1723_v44  ;;  %v3164_v62 = vrot.slane %v9775_v47, 2  ;;  %v9808_v44 = vld [vmem:[%s8365_s28 + $0x170] sm:$0xff]  ;;  %v443_v47 = vld [vmem:[%s10720_s1 + $0x398] sm:$0xff] }
  0xe9   : > { %6249 = vmatmul.mubr.f32.gmra.mrb[24].mxu1 %v9750_v63  ;;  %11135 = vst [vmem:[#allocation143_spill] sm:$0xff] %v9770_v9  ;;  %11137 = vst [vmem:[#allocation145_spill] sm:$0xff] %v9788_v5 }
  0xea   : > { %6809 = vmatmul.mubr.f32.gmra.mrb[56].mxu0 %v9741_v61  ;;  %6251 = vmatprep.mubr.f32.mxu1 %v9761_v51  ;;  %v3162_v61 = vrot.slane %v9757_v59, 2 }
  0xeb   : > { %6811 = vmatprep.mubr.f32.mxu0 %v9745_v29  ;;  %v9795_v29 = vld [vmem:[%s8365_s28 + $0x158] sm:$0xff] }
  0xec   : > { %v9792_v34 = vsel %vm1564_vm1, %v3161_v4, %v3162_v61  ;;  %v9805_v60 = vsel %vm1564_vm1, %v3162_v61, %v3164_v62  ;;  %v442_v4 = vld [vmem:[%s10720_s1 + $0x390] sm:$0xff]  ;;  %v9824_v62 = vld [vmem:[%s8365_s28 + $0x1b8] sm:$0xff] }
  0xed   : > { %6252 = vmatmul.mubr.f32.gmra.mrb[26].mxu1 %v9778_v25  ;;  %11138 = vst [vmem:[#allocation146_spill] sm:$0xff] %v9792_v34  ;;  %11139 = vst [vmem:[#allocation147_spill] sm:$0xff] %v9805_v60  ;;  %v7432_v61 = vpack.c.bf16 %v443_v47, %v442_v4  ;;  %v9838_v4 = vld [vmem:[%s8365_s28 + $0x1d0] sm:$0xff] }
  0xee   : > { %6812 = vmatmul.mubr.f32.gmra.mrb[58].mxu0 %v9766_v36  ;;  %6254 = vmatprep.mubr.f32.mxu1 %v9783_v26  ;;  %v9800_v36 = vld [vmem:[%s8365_s28 + $0x168] sm:$0xff] }
  0xef   : > { %6814 = vmatprep.mubr.f32.mxu0 %v9770_v9  ;;  %v445_v9 = vld [vmem:[%s10720_s1 + $0x3a8] sm:$0xff] }
  0xf1   : > { %6255 = vmatmul.mubr.f32.gmra.mrb[28].mxu1 %v9795_v29 }
  0xf2   : > { %6815 = vmatmul.mubr.f32.gmra.mrb[60].mxu0 %v9788_v5  ;;  %6257 = vmatprep.mubr.f32.mxu1 %v9800_v36  ;;  %v9819_v5 = vld [vmem:[%s8365_s28 + $0x1b0] sm:$0xff] }
  0xf3   : > { %6817 = vmatprep.mubr.f32.mxu0 %v9792_v34  ;;  %v444_v34 = vld [vmem:[%s10720_s1 + $0x3a0] sm:$0xff] }
  0xf4   : > { %v7436_v47 = vpack.c.bf16 %v445_v9, %v444_v34  ;;  %v448_v9 = vld [vmem:[%s10720_s1 + $0x3c0] sm:$0xff]  ;;  %v453_v34 = vld [vmem:[%s10720_s1 + $0x3e8] sm:$0xff] }
  0xf5   : > { %6258 = vmatmul.mubr.f32.gmra.mrb[30].mxu1 %v9808_v44 }
  0xf6   : > { %6818 = vmatmul.mubr.f32.gmra.mrb[62].mxu0 %v9805_v60  ;;  %6260 = vmatprep.mubr.f32.mxu1 %v9819_v5  ;;  %v446_v60 = vld [vmem:[%s10720_s1 + $0x3b0] sm:$0xff] }
  0xf7   : > { %6852 = vmatprep.mubr.f32.mxu0 %v9513_v30 }
  0xf9   : > { %6261 = vmatmul.mubr.f32.gmra.mrb[32].mxu1 %v9824_v62 }
  0xfa   : > { %6853 = vmatmul.mubr.f32.vlgmr.msra.gmra.mrb[0].mxu0 %v9527_v50  ;;  %6263 = vmatprep.mubr.f32.mxu1 %v11096_v49  ;;  %v447_v50 = vld [vmem:[%s10720_s1 + $0x3b8] sm:$0xff]  ;;  %v449_v49 = vld [vmem:[%s10720_s1 + $0x3c8] sm:$0xff] }
  0xfb   : > { %7431 = vmatpush3.bf16.msra.mxu0 %v9234_v40  ;;  %6855 = vmatprep.mubr.f32.mxu0 %v9538_v42  ;;  %v7440_v40 = vpack.c.bf16 %v447_v50, %v446_v60  ;;  %v451_v50 = vld [vmem:[%s10720_s1 + $0x3d8] sm:$0xff] }
  0xfc   : > { %7433 = vmatprep.subr.bf16.mxu0 %v7432_v61  ;;  %v455_v60 = vld [vmem:[%s10720_s1 + $0x3f8] sm:$0xff] }
  0xfd   : > { %6264 = vmatmul.mubr.f32.gmra.mrb[34].mxu1 %v9838_v4 }
  0xfe   : > { %6856 = vmatmul.mubr.f32.gmra.mrb[2].mxu0 %v9552_v54  ;;  %6266 = vmatprep.mubr.f32.mxu1 %v8936_v33  ;;  %v7444_v33 = vpack.c.bf16 %v449_v49, %v448_v9  ;;  %v11143_v9 = vld [vmem:[#allocation98_spill] sm:$0xff]  ;;  %v8114_v49 = vld [vmem:[%s8365_s28 + $0x10] sm:$0x3] }
  0xff   : > { %6858 = vmatprep.mubr.f32.mxu0 %v9563_v16  ;;  %7435 = vmatpush3.bf16.msra.mxu0 %v7432_v61  ;;  %v457_v61 = vld [vmem:[%s10720_s1 + $0x408] sm:$0xff] }
 0x100   : > { %7437 = vmatprep.subr.bf16.mxu0 %v7436_v47 }
 0x101   : > { %6267 = vmatmul.mubr.f32.gmra.mrb[36].mxu1 %v8939_v39  ;;  %v450_v39 = vld [vmem:[%s10720_s1 + $0x3d0] sm:$0xff] }
 0x102   : > { %6859 = vmatmul.mubr.f32.gmra.mrb[4].mxu0 %v9577_v35  ;;  %6269 = vmatprep.mubr.f32.mxu1 %v8970_v32  ;;  %v7448_v32 = vpack.c.bf16 %v451_v50, %v450_v39  ;;  %v9942_v39 = vld [vmem:[%s8365_s28 + $0x188] sm:$0xff]  ;;  %v11144_v50 = vld [vmem:[#allocation103_spill] sm:$0xff] }
 0x103   : > { %6861 = vmatprep.mubr.f32.mxu0 %v9588_v15  ;;  %7439 = vmatpush3.bf16.msra.mxu0 %v7436_v47 }
 0x104   : > { %7441 = vmatprep.subr.bf16.mxu0 %v7440_v40 }
 0x105   : > { %6270 = vmatmul.mubr.f32.gmra.mrb[38].mxu1 %v8973_v22  ;;  %v452_v22 = vld [vmem:[%s10720_s1 + $0x3e0] sm:$0xff] }
 0x106   : > { %6862 = vmatmul.mubr.f32.gmra.mrb[6].mxu0 %v9602_v58  ;;  %6272 = vmatprep.mubr.f32.mxu1 %v9007_v38  ;;  %v7452_v38 = vpack.c.bf16 %v453_v34, %v452_v22  ;;  %v11145_v34 = vld [vmem:[#allocation104_spill] sm:$0xff] }
 0x107   : > { %6864 = vmatprep.mubr.f32.mxu0 %v9613_v45  ;;  %7443 = vmatpush3.bf16.msra.mxu0 %v7440_v40  ;;  %v9937_v40 = vld [vmem:[%s8365_s28 + $0x198] sm:$0xff] }
 0x108   : > { %7445 = vmatprep.subr.bf16.mxu0 %v7444_v33 }
 0x109   : > { %6273 = vmatmul.mubr.f32.gmra.mrb[40].mxu1 %v9010_v7  ;;  %v454_v7 = vld [vmem:[%s10720_s1 + $0x3f0] sm:$0xff] }
 0x10a   : > { %6865 = vmatmul.mubr.f32.gmra.mrb[8].mxu0 %v9627_v1  ;;  %6275 = vmatprep.mubr.f32.mxu1 %v9044_v48  ;;  %v7456_v48 = vpack.c.bf16 %v455_v60, %v454_v7  ;;  %v379_v7 = vld [vmem:[%s10720_s1 + $0x198] sm:$0xff] }
 0x10b   : > { %6867 = vmatprep.mubr.f32.mxu0 %v9638_v31  ;;  %7447 = vmatpush3.bf16.msra.mxu0 %v7444_v33  ;;  %v1568_v33 = vrot.slane %v8114_v49, 2  ;;  %v9977_v49 = vld [vmem:[%s8365_s28 + $0x1f8] sm:$0xff] }
 0x10c   : > { %7449 = vmatprep.subr.bf16.mxu0 %v7448_v32 }
 0x10d   : > { %6276 = vmatmul.mubr.f32.gmra.mrb[42].mxu1 %v9047_v6  ;;  %v456_v6 = vld [vmem:[%s10720_s1 + $0x400] sm:$0xff] }
 0x10e   : > { %6868 = vmatmul.mubr.f32.gmra.mrb[10].mxu0 %v9654_v0  ;;  %6278 = vmatprep.mubr.f32.mxu1 %v9081_v56  ;;  %v9900_v56 = vpack.c.bf16 %v457_v61, %v456_v6  ;;  %v380_v61 = vld [vmem:[%s10720_s1 + $0x1a0] sm:$0xff] }
 0x10f   : > { %6870 = vmatprep.mubr.f32.mxu0 %v9659_v19  ;;  %7451 = vmatpush3.bf16.msra.mxu0 %v7448_v32  ;;  %v9948_v32 = vld [vmem:[%s8365_s28 + $0x1a0] sm:$0xff] }
 0x110   : > { %7453 = vmatprep.subr.bf16.mxu0 %v7452_v38 }
 0x111   : > { %6279 = vmatmul.mubr.f32.gmra.mrb[44].mxu1 %v9084_v11  ;;  %v9931_v11 = vld [vmem:[%s8365_s28 + $0x180] sm:$0xff] }
 0x112   : > { %6871 = vmatmul.mubr.f32.gmra.mrb[12].mxu0 %v9674_v23  ;;  %6281 = vmatprep.mubr.f32.mxu1 %v9118_v20  ;;  %v11140_v20 = vld [vmem:[#allocation97_spill] sm:$0xff] }
 0x113   : > { %6873 = vmatprep.mubr.f32.mxu0 %v9679_v13  ;;  %7455 = vmatpush3.bf16.msra.mxu0 %v7452_v38  ;;  %v378_v38 = vld [vmem:[%s10720_s1 + $0x190] sm:$0xff] }
 0x114   : > { %7457 = vmatprep.subr.bf16.mxu0 %v7456_v48  ;;  %v7304_v6 = vpack.c.bf16 %v379_v7, %v378_v38  ;;  %v382_v38 = vld [vmem:[%s10720_s1 + $0x1b0] sm:$0xff]  ;;  %v383_v7 = vld [vmem:[%s10720_s1 + $0x1b8] sm:$0xff] }
 0x115   : > { %6282 = vmatmul.mubr.f32.gmra.mrb[46].mxu1 %v9121_v10  ;;  %v11141_v10 = vld [vmem:[#allocation111_spill] sm:$0xff] }
 0x116   : > { %6874 = vmatmul.mubr.f32.gmra.mrb[14].mxu0 %v9693_v57  ;;  %6284 = vmatprep.mubr.f32.mxu1 %v9155_v27  ;;  %v1565_v27 = vrot.slane %v11141_v10, 2  ;;  %v381_v10 = vld [vmem:[%s10720_s1 + $0x1a8] sm:$0xff] }
 0x117   : > { %6876 = vmatprep.mubr.f32.mxu0 %v9698_v14  ;;  %7459 = vmatpush3.bf16.msra.mxu0 %v7456_v48  ;;  %v9961_v48 = vld [vmem:[%s8365_s28 + $0x1e0] sm:$0xff] }
 0x118   : > { %7461 = vmatprep.subr.bf16.mxu0 %v9900_v56  ;;  %11146 = vst [vmem:[#allocation97_spill] sm:$0xff] %v9961_v48 }
 0x119   : > { %6285 = vmatmul.mubr.f32.gmra.mrb[48].mxu1 %v9158_v46  ;;  %v11142_v46 = vld [vmem:[#allocation114_spill] sm:$0xff] }
 0x11a   : > { %6877 = vmatmul.mubr.f32.gmra.mrb[16].mxu0 %v9712_v12  ;;  %6287 = vmatprep.mubr.f32.mxu1 %v9192_v17  ;;  %v1566_v47 = vrot.slane %v11142_v46, 2  ;;  %v11148_v46 = vld [vmem:[#allocation131_spill] sm:$0xff]  ;;  %11150 = vst [vmem:[#allocation114_spill] sm:$0xff] %v9977_v49 }
 0x11b   : > { %6879 = vmatprep.mubr.f32.mxu0 %v9717_v8 }
 0x11c   : > { %v1567_v22 = vsel %vm1564_vm1, %v1565_v27, %v1566_v47  ;;  %v1569_v60 = vsel %vm1564_vm1, %v1566_v47, %v1568_v33  ;;  %v9971_v27 = vld [vmem:[%s8365_s28 + $0x1e8] sm:$0xff]  ;;  %v11149_v47 = vld [vmem:[#allocation49_spill] sm:$0xff]  ;;  %v7308_v33 = vpack.c.bf16 %v381_v10, %v380_v61  ;;  %v7312_v61 = vpack.c.bf16 %v383_v7, %v382_v38 }
 0x11d   : > { %6288 = vmatmul.mubr.f32.gmra.mrb[50].mxu1 %v9195_v2  ;;  %11147 = vst [vmem:[#allocation111_spill] sm:$0xff] %v9971_v27  ;;  %v11155_v10 = vld [vmem:[#allocation54_spill] sm:$0xff] }
 0x11e   : > { %6880 = vmatmul.mubr.f32.gmra.mrb[18].mxu0 %v9731_v3  ;;  %6290 = vmatprep.mubr.f32.mxu1 %v9229_v55  ;;  %v11159_v7 = vld [vmem:[#allocation58_spill] sm:$0xff] }
 0x11f   : > { %6882 = vmatprep.mubr.f32.mxu0 %v9736_v52 }
 0x121   : > { %6291 = vmatmul.mubr.f32.gmra.mrb[52].mxu1 %v9232_v21 }
 0x122   : > { %6883 = vmatmul.mubr.f32.gmra.mrb[20].mxu0 %v9750_v63  ;;  %6293 = vmatprep.mubr.f32.mxu1 %v9262_v24 }
 0x123   : > { %6885 = vmatprep.mubr.f32.mxu0 %v9761_v51 }
 0x125   : > { %6294 = vmatmul.mubr.f32.gmra.mrb[54].mxu1 %v9265_v18 }
 0x126   : > { %6886 = vmatmul.mubr.f32.gmra.mrb[22].mxu0 %v9778_v25  ;;  %6296 = vmatprep.mubr.f32.mxu1 %v9294_v41 }
 0x127   : > { %6888 = vmatprep.mubr.f32.mxu0 %v9783_v26 }
 0x129   : > { %6297 = vmatmul.mubr.f32.gmra.mrb[56].mxu1 %v9297_v43 }
 0x12a   : > { %6889 = vmatmul.mubr.f32.gmra.mrb[24].mxu0 %v9795_v29  ;;  %6299 = vmatprep.mubr.f32.mxu1 %v9325_v53 }
 0x12b   : > { %6891 = vmatprep.mubr.f32.mxu0 %v9800_v36 }
 0x12d   : > { %6300 = vmatmul.mubr.f32.gmra.mrb[58].mxu1 %v9328_v28 }
 0x12e   : > { %6892 = vmatmul.mubr.f32.gmra.mrb[26].mxu0 %v9808_v44  ;;  %6302 = vmatprep.mubr.f32.mxu1 %v11140_v20 }
 0x12f   : > { %6894 = vmatprep.mubr.f32.mxu0 %v9931_v11 }
 0x131   : > { %6303 = vmatmul.mubr.f32.gmra.mrb[60].mxu1 %v11143_v9 }
 0x132   : > { %6895 = vmatmul.mubr.f32.gmra.mrb[28].mxu0 %v9942_v39  ;;  %6305 = vmatprep.mubr.f32.mxu1 %v11144_v50 }
 0x133   : > { %6897 = vmatprep.mubr.f32.mxu0 %v9937_v40 }
 0x135   : > { %6306 = vmatmul.mubr.f32.gmra.mrb[62].mxu1 %v11145_v34 }
 0x136   : > { %6898 = vmatmul.mubr.f32.gmra.mrb[30].mxu0 %v9948_v32  ;;  %6340 = vmatprep.mubr.f32.mxu1 %v1567_v22  ;;  %v11151_v22 = vld [vmem:[#allocation50_spill] sm:$0xff] }
 0x137   : > { %6900 = vmatprep.mubr.f32.mxu0 %v9961_v48  ;;  %v10052_v48 = vld [vmem:[%s8365_s28 + $0x260] sm:$0xff] }
 0x138   : > { %11168 = vst [vmem:[#allocation148_spill] sm:$0xff] %v10052_v48 }
 0x139   : > { %6341 = vmatmul.mubr.f32.vlgmr.msra.gmra.mrb[0].mxu1 %v1569_v60  ;;  %v9988_v60 = vld [vmem:[%s8365_s28 + $0x200] sm:$0xff] }
 0x13a   : > { %6901 = vmatmul.mubr.f32.gmra.mrb[32].mxu0 %v9971_v27  ;;  %7303 = vmatpush3.bf16.msra.mxu1 %v11148_v46  ;;  %11152 = vst [vmem:[#allocation98_spill] sm:$0xff] %v9988_v60  ;;  %v11153_v46 = vld [vmem:[#allocation52_spill] sm:$0xff]  ;;  %v386_v27 = vld [vmem:[%s10720_s1 + $0x1d0] sm:$0xff] }
 0x13b   : > { %6343 = vmatprep.mubr.f32.mxu1 %v11149_v47  ;;  %6903 = vmatprep.mubr.f32.mxu0 %v9977_v49  ;;  %v9993_v47 = vld [vmem:[%s8365_s28 + $0x210] sm:$0xff]  ;;  %v10004_v49 = vld [vmem:[%s8365_s28 + $0x218] sm:$0xff] }
 0x13c   : > { %7305 = vmatprep.subr.bf16.mxu1 %v7304_v6  ;;  %11154 = vst [vmem:[#allocation103_spill] sm:$0xff] %v9993_v47  ;;  %11156 = vst [vmem:[#allocation104_spill] sm:$0xff] %v10004_v49 }
 0x13d   : > { %6344 = vmatmul.mubr.f32.gmra.mrb[2].mxu1 %v11151_v22  ;;  %v384_v22 = vld [vmem:[%s10720_s1 + $0x1c0] sm:$0xff] }
 0x13e   : > { %6904 = vmatmul.mubr.f32.gmra.mrb[34].mxu0 %v9988_v60  ;;  %6346 = vmatprep.mubr.f32.mxu1 %v11153_v46  ;;  %v385_v60 = vld [vmem:[%s10720_s1 + $0x1c8] sm:$0xff] }
 0x13f   : > { %6906 = vmatprep.mubr.f32.mxu0 %v9993_v47  ;;  %7307 = vmatpush3.bf16.msra.mxu1 %v7304_v6  ;;  %v11157_v47 = vld [vmem:[#allocation56_spill] sm:$0xff]  ;;  %v10009_v6 = vld [vmem:[%s8365_s28 + $0x228] sm:$0xff]  ;;  %v7316_v38 = vpack.c.bf16 %v385_v60, %v384_v22 }
 0x140   : > { %7309 = vmatprep.subr.bf16.mxu1 %v7308_v33  ;;  %11158 = vst [vmem:[#allocation131_spill] sm:$0xff] %v10009_v6  ;;  %v11163_v22 = vld [vmem:[#allocation62_spill] sm:$0xff] }
 0x141   : > { %6347 = vmatmul.mubr.f32.gmra.mrb[4].mxu1 %v11155_v10 }
 0x142   : > { %6907 = vmatmul.mubr.f32.gmra.mrb[36].mxu0 %v10004_v49  ;;  %6349 = vmatprep.mubr.f32.mxu1 %v11157_v47  ;;  %v387_v49 = vld [vmem:[%s10720_s1 + $0x1d8] sm:$0xff]  ;;  %v10020_v47 = vld [vmem:[%s8365_s28 + $0x230] sm:$0xff] }
 0x143   : > { %6909 = vmatprep.mubr.f32.mxu0 %v10009_v6  ;;  %7311 = vmatpush3.bf16.msra.mxu1 %v7308_v33  ;;  %11160 = vst [vmem:[#allocation49_spill] sm:$0xff] %v10020_v47  ;;  %v11161_v6 = vld [vmem:[#allocation60_spill] sm:$0xff]  ;;  %v10025_v33 = vld [vmem:[%s8365_s28 + $0x240] sm:$0xff]  ;;  %v7320_v60 = vpack.c.bf16 %v387_v49, %v386_v27  ;;  %v11167_v49 = vld [vmem:[#allocation66_spill] sm:$0xff] }
 0x144   : > { %7313 = vmatprep.subr.bf16.mxu1 %v7312_v61  ;;  %11162 = vst [vmem:[#allocation50_spill] sm:$0xff] %v10025_v33 }
 0x145   : > { %6350 = vmatmul.mubr.f32.gmra.mrb[6].mxu1 %v11159_v7  ;;  %v388_v7 = vld [vmem:[%s10720_s1 + $0x1e0] sm:$0xff] }
 0x146   : > { %6910 = vmatmul.mubr.f32.gmra.mrb[38].mxu0 %v10020_v47  ;;  %6352 = vmatprep.mubr.f32.mxu1 %v11161_v6  ;;  %v389_v47 = vld [vmem:[%s10720_s1 + $0x1e8] sm:$0xff] }
 0x147   : > { %6912 = vmatprep.mubr.f32.mxu0 %v10025_v33  ;;  %7315 = vmatpush3.bf16.msra.mxu1 %v7312_v61  ;;  %v10036_v6 = vld [vmem:[%s8365_s28 + $0x248] sm:$0xff]  ;;  %v11165_v33 = vld [vmem:[#allocation64_spill] sm:$0xff]  ;;  %v7324_v27 = vpack.c.bf16 %v389_v47, %v388_v7 }
 0x148   : > { %7317 = vmatprep.subr.bf16.mxu1 %v7316_v38  ;;  %11164 = vst [vmem:[#allocation52_spill] sm:$0xff] %v10036_v6  ;;  %v10041_v61 = vld [vmem:[%s8365_s28 + $0x258] sm:$0xff] }
 0x149   : > { %6353 = vmatmul.mubr.f32.gmra.mrb[8].mxu1 %v11163_v22  ;;  %11166 = vst [vmem:[#allocation54_spill] sm:$0xff] %v10041_v61  ;;  %v390_v22 = vld [vmem:[%s10720_s1 + $0x1f0] sm:$0xff]  ;;  %v10062_v7 = vld [vmem:[%s8365_s28 + $0x278] sm:$0xff] }
 0x14a   : > { %6913 = vmatmul.mubr.f32.gmra.mrb[40].mxu0 %v10036_v6  ;;  %6355 = vmatprep.mubr.f32.mxu1 %v11165_v33  ;;  %v391_v6 = vld [vmem:[%s10720_s1 + $0x1f8] sm:$0xff] }
 0x14b   : > { %6915 = vmatprep.mubr.f32.mxu0 %v10041_v61  ;;  %7319 = vmatpush3.bf16.msra.mxu1 %v7316_v38  ;;  %v11169_v33 = vld [vmem:[#allocation68_spill] sm:$0xff]  ;;  %v10057_v61 = vld [vmem:[%s8365_s28 + $0x270] sm:$0xff]  ;;  %v7328_v47 = vpack.c.bf16 %v391_v6, %v390_v22  ;;  %v11171_v38 = vld [vmem:[#allocation70_spill] sm:$0xff] }
 0x14c   : > { %7321 = vmatprep.subr.bf16.mxu1 %v7320_v60  ;;  %11170 = vst [vmem:[#allocation68_spill] sm:$0xff] %v10057_v61  ;;  %v11175_v6 = vld [vmem:[#allocation5_spill] sm:$0xff]  ;;  %v11177_v22 = vld [vmem:[#allocation80_spill] sm:$0xff] }
 0x14d   : > { %6356 = vmatmul.mubr.f32.gmra.mrb[10].mxu1 %v11167_v49  ;;  %v11172_v49 = vld [vmem:[#allocation72_spill] sm:$0xff] }
 0x14e   : > { %6916 = vmatmul.mubr.f32.gmra.mrb[42].mxu0 %v10052_v48  ;;  %6358 = vmatprep.mubr.f32.mxu1 %v11169_v33  ;;  %v11173_v48 = vld [vmem:[#allocation74_spill] sm:$0xff] }
 0x14f   : > { %6918 = vmatprep.mubr.f32.mxu0 %v10057_v61  ;;  %7323 = vmatpush3.bf16.msra.mxu1 %v7320_v60  ;;  %v11174_v61 = vld [vmem:[#allocation76_spill] sm:$0xff]  ;;  %v11176_v60 = vld [vmem:[#allocation78_spill] sm:$0xff] }
 0x150   : > { %7325 = vmatprep.subr.bf16.mxu1 %v7324_v27 }
 0x151   : > { %6359 = vmatmul.mubr.f32.gmra.mrb[12].mxu1 %v11171_v38 }
 0x152   : > { %6919 = vmatmul.mubr.f32.gmra.mrb[44].mxu0 %v10062_v7  ;;  %6361 = vmatprep.mubr.f32.mxu1 %v11172_v49 }
 0x153   : > { %6921 = vmatprep.mubr.f32.mxu0 %v9192_v17  ;;  %7327 = vmatpush3.bf16.msra.mxu1 %v7324_v27  ;;  %v11178_v17 = vld [vmem:[#allocation82_spill] sm:$0xff]  ;;  %v11181_v27 = vld [vmem:[#allocation88_spill] sm:$0xff] }
 0x154   : > { %7329 = vmatprep.subr.bf16.mxu1 %v7328_v47 }
 0x155   : > { %6362 = vmatmul.mubr.f32.gmra.mrb[14].mxu1 %v11173_v48 }
 0x156   : > { %6922 = vmatmul.mubr.f32.gmra.mrb[46].mxu0 %v9195_v2  ;;  %6364 = vmatprep.mubr.f32.mxu1 %v11174_v61  ;;  %v11179_v2 = vld [vmem:[#allocation84_spill] sm:$0xff] }
 0x157   : > { %6924 = vmatprep.mubr.f32.mxu0 %v9229_v55  ;;  %7331 = vmatpush3.bf16.msra.mxu1 %v7328_v47  ;;  %v11180_v55 = vld [vmem:[#allocation86_spill] sm:$0xff] }
 0x158   : > { %7492 = vmatprep.subr.bf16.mxu1 %v11175_v6  ;;  %v10099_v47 = vld [vmem:[%s8365_s28 + $0x348] sm:$0xff] }
 0x159   : > { %6365 = vmatmul.mubr.f32.gmra.mrb[16].mxu1 %v11176_v60 }
 0x15a   : > { %6925 = vmatmul.mubr.f32.gmra.mrb[48].mxu0 %v9232_v21  ;;  %6367 = vmatprep.mubr.f32.mxu1 %v11177_v22  ;;  %v11182_v21 = vld [vmem:[#allocation90_spill] sm:$0xff] }
 0x15b   : > { %6927 = vmatprep.mubr.f32.mxu0 %v9262_v24  ;;  %v11183_v24 = vld [vmem:[#allocation92_spill] sm:$0xff] }
 0x15d   : > { %6368 = vmatmul.mubr.f32.gmra.mrb[18].mxu1 %v11178_v17 }
 0x15e   : > { %6928 = vmatmul.mubr.f32.gmra.mrb[50].mxu0 %v9265_v18  ;;  %6370 = vmatprep.mubr.f32.mxu1 %v11179_v2  ;;  %v11184_v18 = vld [vmem:[#allocation94_spill] sm:$0xff] }
 0x15f   : > { %6930 = vmatprep.mubr.f32.mxu0 %v9294_v41  ;;  %v11185_v41 = vld [vmem:[#allocation96_spill] sm:$0xff] }
 0x161   : > { %6371 = vmatmul.mubr.f32.gmra.mrb[20].mxu1 %v11180_v55 }
 0x162   : > { %6931 = vmatmul.mubr.f32.gmra.mrb[52].mxu0 %v9297_v43  ;;  %6373 = vmatprep.mubr.f32.mxu1 %v11181_v27  ;;  %v11186_v43 = vld [vmem:[#allocation100_spill] sm:$0xff] }
 0x163   : > { %6933 = vmatprep.mubr.f32.mxu0 %v9325_v53  ;;  %v11187_v53 = vld [vmem:[#allocation102_spill] sm:$0xff] }
 0x165   : > { %6374 = vmatmul.mubr.f32.gmra.mrb[22].mxu1 %v11182_v21  ;;  %v11193_v21 = vld [vmem:[#allocation110_spill] sm:$0xff] }
 0x166   : > { %6934 = vmatmul.mubr.f32.gmra.mrb[54].mxu0 %v9328_v28  ;;  %6376 = vmatprep.mubr.f32.mxu1 %v11183_v24  ;;  %v1645_v28 = vrot.slane %v9819_v5, 2  ;;  %v458_v5 = vld [vmem:[%s10720_s1 + $0x410] sm:$0xff]  ;;  %v11192_v24 = vld [vmem:[#allocation14_spill] sm:$0xff] }
 0x167   : > { %6936 = vmatprep.mubr.f32.mxu0 %v11140_v20  ;;  %v1646_v20 = vrot.slane %v9824_v62, 2  ;;  %v459_v62 = vld [vmem:[%s10720_s1 + $0x418] sm:$0xff] }
 0x169   : > { %6377 = vmatmul.mubr.f32.gmra.mrb[24].mxu1 %v11184_v18  ;;  %v11190_v18 = vld [vmem:[#allocation41_spill] sm:$0xff] }
 0x16a   : > { %6937 = vmatmul.mubr.f32.gmra.mrb[56].mxu0 %v11143_v9  ;;  %6379 = vmatprep.mubr.f32.mxu1 %v11185_v41  ;;  %v11188_v9 = vld [vmem:[#allocation106_spill] sm:$0xff]  ;;  %v11189_v41 = vld [vmem:[#allocation39_spill] sm:$0xff] }
 0x16b   : > { %6939 = vmatprep.mubr.f32.mxu0 %v11144_v50  ;;  %v8130_v50 = vld [vmem:[%s8365_s28 + $0x1c0] sm:$0x3] }
 0x16d   : > { %6380 = vmatmul.mubr.f32.gmra.mrb[26].mxu1 %v11186_v43  ;;  %v1648_v43 = vrot.slane %v8130_v50, 2 }
 0x16e   : > { %6940 = vmatmul.mubr.f32.gmra.mrb[58].mxu0 %v11145_v34  ;;  %6382 = vmatprep.mubr.f32.mxu1 %v11187_v53  ;;  %v10107_v34 = vld [vmem:[%s8365_s28 + $0x350] sm:$0xff]  ;;  %v1647_v53 = vsel %vm1564_vm1, %v1645_v28, %v1646_v20  ;;  %v460_v28 = vld [vmem:[%s10720_s1 + $0x420] sm:$0xff] }
 0x16f   : > { %6942 = vmatprep.mubr.f32.mxu0 %v9754_v37  ;;  %v1649_v50 = vsel %vm1564_vm1, %v1646_v20, %v1648_v43  ;;  %v11195_v43 = vld [vmem:[#allocation112_spill] sm:$0xff]  ;;  %v462_v20 = vld [vmem:[%s10720_s1 + $0x430] sm:$0xff] }
 0x171   : > { %6383 = vmatmul.mubr.f32.gmra.mrb[28].mxu1 %v11188_v9  ;;  %v7464_v9 = vpack.c.bf16 %v459_v62, %v458_v5  ;;  %v463_v5 = vld [vmem:[%s10720_s1 + $0x438] sm:$0xff] }
 0x172   : > { %6943 = vmatmul.mubr.f32.gmra.mrb[60].mxu0 %v9757_v59  ;;  %6385 = vmatprep.mubr.f32.mxu1 %v11189_v41  ;;  %v11191_v41 = vld [vmem:[#allocation13_spill] sm:$0xff]  ;;  %v11196_v62 = vld [vmem:[#allocation16_spill] sm:$0xff] }
 0x173   : > { %6945 = vmatprep.mubr.f32.mxu0 %v10099_v47 }
 0x175   : > { %6386 = vmatmul.mubr.f32.gmra.mrb[30].mxu1 %v11190_v18  ;;  %v461_v18 = vld [vmem:[%s10720_s1 + $0x428] sm:$0xff] }
 0x176   : > { %6946 = vmatmul.mubr.f32.gmra.mrb[62].mxu0 %v10107_v34  ;;  %6388 = vmatprep.mubr.f32.mxu1 %v1647_v53  ;;  %v11194_v53 = vld [vmem:[#allocation15_spill] sm:$0xff] }
 0x177   : > { %6980 = vmatprep.mubr.f32.mxu0 %v11191_v41  ;;  %v7468_v41 = vpack.c.bf16 %v461_v18, %v460_v28  ;;  %v11199_v18 = vld [vmem:[#allocation115_spill] sm:$0xff]  ;;  %v465_v28 = vld [vmem:[%s10720_s1 + $0x448] sm:$0xff] }
 0x179   : > { %6389 = vmatmul.mubr.f32.gmra.mrb[32].mxu1 %v1649_v50  ;;  %v464_v50 = vld [vmem:[%s10720_s1 + $0x440] sm:$0xff] }
 0x17a   : > { %6981 = vmatmul.mubr.f32.vlgmr.msra.gmra.mrb[0].mxu0 %v11192_v24  ;;  %6391 = vmatprep.mubr.f32.mxu1 %v11193_v21  ;;  %v11197_v24 = vld [vmem:[#allocation113_spill] sm:$0xff] }
 0x17b   : > { %7463 = vmatpush3.bf16.msra.mxu0 %v9900_v56  ;;  %6983 = vmatprep.mubr.f32.mxu0 %v11194_v53  ;;  %v11198_v21 = vld [vmem:[#allocation17_spill] sm:$0xff]  ;;  %v7472_v56 = vpack.c.bf16 %v463_v5, %v462_v20  ;;  %v11200_v53 = vld [vmem:[#allocation18_spill] sm:$0xff]  ;;  %v466_v5 = vld [vmem:[%s10720_s1 + $0x450] sm:$0xff] }
 0x17c   : > { %7465 = vmatprep.subr.bf16.mxu0 %v7464_v9  ;;  %v11203_v20 = vld [vmem:[#allocation118_spill] sm:$0xff] }
 0x17d   : > { %6392 = vmatmul.mubr.f32.gmra.mrb[34].mxu1 %v11195_v43  ;;  %v11201_v43 = vld [vmem:[#allocation116_spill] sm:$0xff] }
 0x17e   : > { %6984 = vmatmul.mubr.f32.gmra.mrb[2].mxu0 %v11196_v62  ;;  %6394 = vmatprep.mubr.f32.mxu1 %v11197_v24  ;;  %v11202_v62 = vld [vmem:[#allocation19_spill] sm:$0xff] }
 0x17f   : > { %6986 = vmatprep.mubr.f32.mxu0 %v11198_v21  ;;  %7467 = vmatpush3.bf16.msra.mxu0 %v7464_v9  ;;  %v7476_v9 = vpack.c.bf16 %v465_v28, %v464_v50  ;;  %v467_v21 = vld [vmem:[%s10720_s1 + $0x458] sm:$0xff]  ;;  %v11207_v50 = vld [vmem:[#allocation121_spill] sm:$0xff]  ;;  %v11219_v24 = vld [vmem:[#allocation127_spill] sm:$0xff] }
 0x180   : > { %7469 = vmatprep.subr.bf16.mxu0 %v7468_v41  ;;  %v468_v28 = vld [vmem:[%s10720_s1 + $0x460] sm:$0xff] }
 0x181   : > { %6395 = vmatmul.mubr.f32.gmra.mrb[36].mxu1 %v11199_v18  ;;  %v11204_v18 = vld [vmem:[#allocation20_spill] sm:$0xff] }
 0x182   : > { %6987 = vmatmul.mubr.f32.gmra.mrb[4].mxu0 %v11200_v53  ;;  %6397 = vmatprep.mubr.f32.mxu1 %v11201_v43  ;;  %v11205_v53 = vld [vmem:[#allocation119_spill] sm:$0xff]  ;;  %v11206_v43 = vld [vmem:[#allocation21_spill] sm:$0xff] }
 0x183   : > { %6989 = vmatprep.mubr.f32.mxu0 %v11202_v62  ;;  %7471 = vmatpush3.bf16.msra.mxu0 %v7468_v41  ;;  %v7480_v41 = vpack.c.bf16 %v467_v21, %v466_v5  ;;  %v469_v62 = vld [vmem:[%s10720_s1 + $0x468] sm:$0xff]  ;;  %v470_v5 = vld [vmem:[%s10720_s1 + $0x470] sm:$0xff]  ;;  %v471_v21 = vld [vmem:[%s10720_s1 + $0x478] sm:$0xff] }
 0x184   : > { %7473 = vmatprep.subr.bf16.mxu0 %v7472_v56 }
 0x185   : > { %6398 = vmatmul.mubr.f32.gmra.mrb[38].mxu1 %v11203_v20  ;;  %v11208_v20 = vld [vmem:[#allocation22_spill] sm:$0xff] }
 0x186   : > { %6990 = vmatmul.mubr.f32.gmra.mrb[6].mxu0 %v11204_v18  ;;  %6400 = vmatprep.mubr.f32.mxu1 %v11205_v53  ;;  %v11209_v18 = vld [vmem:[#allocation122_spill] sm:$0xff]  ;;  %v11210_v53 = vld [vmem:[#allocation23_spill] sm:$0xff] }
 0x187   : > { %6992 = vmatprep.mubr.f32.mxu0 %v11206_v43  ;;  %7475 = vmatpush3.bf16.msra.mxu0 %v7472_v56  ;;  %v7484_v56 = vpack.c.bf16 %v469_v62, %v468_v28  ;;  %v11211_v43 = vld [vmem:[#allocation123_spill] sm:$0xff]  ;;  %v11216_v28 = vld [vmem:[#allocation26_spill] sm:$0xff] }
 0x188   : > { %7477 = vmatprep.subr.bf16.mxu0 %v7476_v9  ;;  %v11217_v62 = vld [vmem:[#allocation126_spill] sm:$0xff] }
 0x189   : > { %6401 = vmatmul.mubr.f32.gmra.mrb[40].mxu1 %v11207_v50  ;;  %v11212_v50 = vld [vmem:[#allocation24_spill] sm:$0xff] }
 0x18a   : > { %6993 = vmatmul.mubr.f32.gmra.mrb[8].mxu0 %v11208_v20  ;;  %6403 = vmatprep.mubr.f32.mxu1 %v11209_v18  ;;  %v11213_v20 = vld [vmem:[#allocation124_spill] sm:$0xff]  ;;  %v11214_v18 = vld [vmem:[#allocation25_spill] sm:$0xff] }
 0x18b   : > { %6995 = vmatprep.mubr.f32.mxu0 %v11210_v53  ;;  %7479 = vmatpush3.bf16.msra.mxu0 %v7476_v9  ;;  %v7488_v9 = vpack.c.bf16 %v471_v21, %v470_v5  ;;  %v11215_v53 = vld [vmem:[#allocation125_spill] sm:$0xff]  ;;  %v11224_v5 = vld [vmem:[#allocation30_spill] sm:$0xff] }
 0x18c   : > { %7481 = vmatprep.subr.bf16.mxu0 %v7480_v41  ;;  %v11225_v21 = vld [vmem:[#allocation130_spill] sm:$0xff] }
 0x18d   : > { %6404 = vmatmul.mubr.f32.gmra.mrb[42].mxu1 %v11211_v43  ;;  %v11218_v43 = vld [vmem:[#allocation27_spill] sm:$0xff] }
 0x18e   : > { %6996 = vmatmul.mubr.f32.gmra.mrb[10].mxu0 %v11212_v50  ;;  %6406 = vmatprep.mubr.f32.mxu1 %v11213_v20  ;;  %v11220_v50 = vld [vmem:[#allocation28_spill] sm:$0xff] }
 0x18f   : > { %6998 = vmatprep.mubr.f32.mxu0 %v11214_v18  ;;  %7483 = vmatpush3.bf16.msra.mxu0 %v7480_v41  ;;  %v11221_v20 = vld [vmem:[#allocation128_spill] sm:$0xff]  ;;  %v11222_v18 = vld [vmem:[#allocation29_spill] sm:$0xff] }
 0x190   : > { %7485 = vmatprep.subr.bf16.mxu0 %v7484_v56  ;;  %v11223_v41 = vld [vmem:[#allocation129_spill] sm:$0xff] }
 0x191   : > { %6407 = vmatmul.mubr.f32.gmra.mrb[44].mxu1 %v11215_v53 }
 0x192   : > { %6999 = vmatmul.mubr.f32.gmra.mrb[12].mxu0 %v11216_v28  ;;  %6409 = vmatprep.mubr.f32.mxu1 %v11217_v62  ;;  %v11226_v28 = vld [vmem:[#allocation31_spill] sm:$0xff] }
 0x193   : > { %7001 = vmatprep.mubr.f32.mxu0 %v11218_v43  ;;  %7487 = vmatpush3.bf16.msra.mxu0 %v7484_v56  ;;  %v11227_v43 = vld [vmem:[#allocation132_spill] sm:$0xff]  ;;  %v11250_v62 = vld [vmem:[#allocation143_spill] sm:$0xff] }
 0x194   : > { %7489 = vmatprep.subr.bf16.mxu0 %v7488_v9  ;;  %v11228_v56 = vld [vmem:[#allocation32_spill] sm:$0xff] }
 0x195   : > { %6410 = vmatmul.mubr.f32.gmra.mrb[46].mxu1 %v11219_v24  ;;  %v11229_v24 = vld [vmem:[#allocation133_spill] sm:$0xff] }
 0x196   : > { %7002 = vmatmul.mubr.f32.gmra.mrb[14].mxu0 %v11220_v50  ;;  %6412 = vmatprep.mubr.f32.mxu1 %v11221_v20  ;;  %v11230_v50 = vld [vmem:[#allocation33_spill] sm:$0xff]  ;;  %v11231_v20 = vld [vmem:[#allocation134_spill] sm:$0xff] }
 0x197   : > { %7004 = vmatprep.mubr.f32.mxu0 %v11222_v18  ;;  %7491 = vmatpush3.bf16.msra.mxu0 %v7488_v9  ;;  %v11232_v9 = vld [vmem:[#allocation34_spill] sm:$0xff]  ;;  %v11233_v18 = vld [vmem:[#allocation135_spill] sm:$0xff] }
 0x199   : > { %6413 = vmatmul.mubr.f32.gmra.mrb[48].mxu1 %v11223_v41  ;;  %v11240_v41 = vld [vmem:[#allocation42_spill] sm:$0xff] }
 0x19a   : > { %7005 = vmatmul.mubr.f32.gmra.mrb[16].mxu0 %v11224_v5  ;;  %6415 = vmatprep.mubr.f32.mxu1 %v11225_v21  ;;  %v11234_v5 = vld [vmem:[#allocation35_spill] sm:$0xff]  ;;  %v11235_v21 = vld [vmem:[#allocation136_spill] sm:$0xff] }
 0x19b   : > { %7007 = vmatprep.mubr.f32.mxu0 %v11226_v28  ;;  %v11236_v28 = vld [vmem:[#allocation37_spill] sm:$0xff] }
 0x19d   : > { %6416 = vmatmul.mubr.f32.gmra.mrb[50].mxu1 %v11227_v43  ;;  %v11237_v43 = vld [vmem:[#allocation137_spill] sm:$0xff] }
 0x19e   : > { %7008 = vmatmul.mubr.f32.gmra.mrb[18].mxu0 %v11228_v56  ;;  %6418 = vmatprep.mubr.f32.mxu1 %v11229_v24  ;;  %v11238_v56 = vld [vmem:[#allocation38_spill] sm:$0xff] }
 0x19f   : > { %7010 = vmatprep.mubr.f32.mxu0 %v11230_v50  ;;  %v11239_v24 = vld [vmem:[#allocation138_spill] sm:$0xff]  ;;  %v11241_v50 = vld [vmem:[#allocation139_spill] sm:$0xff] }
 0x1a1   : > { %6419 = vmatmul.mubr.f32.gmra.mrb[52].mxu1 %v11231_v20  ;;  %v11242_v20 = vld [vmem:[#allocation43_spill] sm:$0xff] }
 0x1a2   : > { %7011 = vmatmul.mubr.f32.gmra.mrb[20].mxu0 %v11232_v9  ;;  %6421 = vmatprep.mubr.f32.mxu1 %v11233_v18  ;;  %v4074_v9 = vrot.slane %v9937_v40, 1  ;;  %v10211_v18 = vld [vmem:[%s8365_s28 + $0x1a8] sm:$0x3] }
 0x1a3   : > { %7013 = vmatprep.mubr.f32.mxu0 %v11234_v5  ;;  %v4075_v5 = vrot.slane %v9948_v32, 1  ;;  %11243 = vst [vmem:[#allocation70_spill] sm:$0xff] %v10211_v18 }
 0x1a5   : > { %6422 = vmatmul.mubr.f32.gmra.mrb[54].mxu1 %v11235_v21  ;;  %v11244_v21 = vld [vmem:[#allocation140_spill] sm:$0xff] }
 0x1a6   : > { %7014 = vmatmul.mubr.f32.gmra.mrb[22].mxu0 %v11236_v28  ;;  %6424 = vmatprep.mubr.f32.mxu1 %v11237_v43  ;;  %v11245_v28 = vld [vmem:[#allocation44_spill] sm:$0xff]  ;;  %v11246_v43 = vld [vmem:[#allocation141_spill] sm:$0xff] }
 0x1a7   : > { %7016 = vmatprep.mubr.f32.mxu0 %v11238_v56  ;;  %v11247_v56 = vld [vmem:[#allocation45_spill] sm:$0xff] }
 0x1a9   : > { %6425 = vmatmul.mubr.f32.gmra.mrb[56].mxu1 %v11239_v24  ;;  %v11248_v24 = vld [vmem:[#allocation142_spill] sm:$0xff] }
 0x1aa   : > { %7017 = vmatmul.mubr.f32.gmra.mrb[24].mxu0 %v11240_v41  ;;  %6427 = vmatprep.mubr.f32.mxu1 %v11241_v50  ;;  %v4077_v41 = vrot.slane %v10211_v18, 1  ;;  %v4076_v50 = vsel %vm569_vm0, %v4074_v9, %v4075_v5  ;;  %v11255_v18 = vld [vmem:[#allocation57_spill] sm:$0xff]  ;;  %v11256_v9 = vld [vmem:[#allocation59_spill] sm:$0xff] }
 0x1ab   : > { %7019 = vmatprep.mubr.f32.mxu0 %v11242_v20  ;;  %v11249_v20 = vld [vmem:[#allocation48_spill] sm:$0xff] }
 0x1ac   : > { %v4078_v53 = vsel %vm569_vm0, %v4075_v5, %v4077_v41  ;;  %v11258_v5 = vld [vmem:[#allocation120_spill] sm:$0xff]  ;;  %v11259_v41 = vld [vmem:[#allocation61_spill] sm:$0xff] }
 0x1ad   : > { %6428 = vmatmul.mubr.f32.gmra.mrb[58].mxu1 %v11244_v21  ;;  %v11251_v21 = vld [vmem:[#allocation145_spill] sm:$0xff] }
 0x1ae   : > { %7020 = vmatmul.mubr.f32.gmra.mrb[26].mxu0 %v11245_v28  ;;  %6430 = vmatprep.mubr.f32.mxu1 %v11246_v43  ;;  %v11252_v28 = vld [vmem:[#allocation36_spill] sm:$0xff]  ;;  %v11253_v43 = vld [vmem:[#allocation55_spill] sm:$0xff] }
 0x1af   : > { %7022 = vmatprep.mubr.f32.mxu0 %v11247_v56  ;;  %v11254_v56 = vld [vmem:[#allocation117_spill] sm:$0xff] }
 0x1b1   : > { %6431 = vmatmul.mubr.f32.gmra.mrb[60].mxu1 %v11248_v24 }
 0x1b2   : > { %7023 = vmatmul.mubr.f32.gmra.mrb[28].mxu0 %v11249_v20  ;;  %6433 = vmatprep.mubr.f32.mxu1 %v11250_v62  ;;  %v11261_v20 = vld [vmem:[#allocation7_spill] sm:$0xff]  ;;  %v10302_v62 = vld [vmem:[%s8365_s28 + $0x358] sm:$0x3] }
 0x1b3   : > { %7025 = vmatprep.mubr.f32.mxu0 %v4076_v50  ;;  %v11257_v50 = vld [vmem:[#allocation6_spill] sm:$0xff] }
 0x1b5   : > { %6434 = vmatmul.mubr.f32.gmra.mrb[62].mxu1 %v11251_v21 }
 0x1b6   : > { %7026 = vmatmul.mubr.f32.gmra.mrb[30].mxu0 %v4078_v53  ;;  %6468 = vmatprep.mubr.f32.mxu1 %v11252_v28  ;;  %v11260_v53 = vld [vmem:[#allocation63_spill] sm:$0xff]  ;;  %v11264_v28 = vld [vmem:[#allocation8_spill] sm:$0xff] }
 0x1b7   : > { %7028 = vmatprep.mubr.f32.mxu0 %v11253_v43 }
 0x1b9   : > { %6469 = vmatmul.mubr.f32.vlgmr.msra.gmra.mrb[0].mxu1 %v11254_v56  ;;  %v11266_v56 = vld [vmem:[#allocation71_spill] sm:$0xff] }
 0x1ba   : > { %7029 = vmatmul.mubr.f32.gmra.mrb[32].mxu0 %v11255_v18  ;;  %7500 = vmatpush3.bf16.msra.mxu1 %v11175_v6  ;;  %v11262_v6 = vld [vmem:[#allocation65_spill] sm:$0xff] }
 0x1bb   : > { %6471 = vmatprep.mubr.f32.mxu1 %v9513_v30  ;;  %7031 = vmatprep.mubr.f32.mxu0 %v11256_v9  ;;  %v11263_v30 = vld [vmem:[#allocation67_spill] sm:$0xff] }
 0x1bc   : > { %7493 = vmatprep.subr.bf16.mxu1 %v11257_v50 }
 0x1bd   : > { %6472 = vmatmul.mubr.f32.gmra.mrb[2].mxu1 %v11258_v5  ;;  %v11272_v5 = vld [vmem:[#allocation79_spill] sm:$0xff] }
 0x1be   : > { %7032 = vmatmul.mubr.f32.gmra.mrb[34].mxu0 %v11259_v41  ;;  %6474 = vmatprep.mubr.f32.mxu1 %v9538_v42  ;;  %v11265_v42 = vld [vmem:[#allocation69_spill] sm:$0xff] }
 0x1bf   : > { %7034 = vmatprep.mubr.f32.mxu0 %v11260_v53  ;;  %7501 = vmatpush3.bf16.msra.mxu1 %v11257_v50  ;;  %v11269_v50 = vld [vmem:[#allocation75_spill] sm:$0xff] }
 0x1c0   : > { %7494 = vmatprep.subr.bf16.mxu1 %v11261_v20 }
 0x1c1   : > { %6475 = vmatmul.mubr.f32.gmra.mrb[4].mxu1 %v9552_v54  ;;  %v11267_v54 = vld [vmem:[#allocation9_spill] sm:$0xff] }
 0x1c2   : > { %7035 = vmatmul.mubr.f32.gmra.mrb[36].mxu0 %v11262_v6  ;;  %6477 = vmatprep.mubr.f32.mxu1 %v9563_v16  ;;  %v11268_v16 = vld [vmem:[#allocation73_spill] sm:$0xff] }
 0x1c3   : > { %7037 = vmatprep.mubr.f32.mxu0 %v11263_v30  ;;  %7502 = vmatpush3.bf16.msra.mxu1 %v11261_v20  ;;  %v11275_v20 = vld [vmem:[#allocation83_spill] sm:$0xff] }
 0x1c4   : > { %7495 = vmatprep.subr.bf16.mxu1 %v11264_v28 }
 0x1c5   : > { %6478 = vmatmul.mubr.f32.gmra.mrb[6].mxu1 %v9577_v35  ;;  %v11270_v35 = vld [vmem:[#allocation10_spill] sm:$0xff] }
 0x1c6   : > { %7038 = vmatmul.mubr.f32.gmra.mrb[38].mxu0 %v11265_v42  ;;  %6480 = vmatprep.mubr.f32.mxu1 %v9588_v15  ;;  %v11271_v15 = vld [vmem:[#allocation77_spill] sm:$0xff] }
 0x1c7   : > { %7040 = vmatprep.mubr.f32.mxu0 %v11266_v56  ;;  %7503 = vmatpush3.bf16.msra.mxu1 %v11264_v28  ;;  %v11278_v28 = vld [vmem:[#allocation87_spill] sm:$0xff] }
 0x1c8   : > { %7496 = vmatprep.subr.bf16.mxu1 %v11267_v54 }
 0x1c9   : > { %6481 = vmatmul.mubr.f32.gmra.mrb[8].mxu1 %v9602_v58  ;;  %v11273_v58 = vld [vmem:[#allocation11_spill] sm:$0xff] }
 0x1ca   : > { %7041 = vmatmul.mubr.f32.gmra.mrb[40].mxu0 %v11268_v16  ;;  %6483 = vmatprep.mubr.f32.mxu1 %v9613_v45  ;;  %v11274_v45 = vld [vmem:[#allocation81_spill] sm:$0xff] }
 0x1cb   : > { %7043 = vmatprep.mubr.f32.mxu0 %v11269_v50  ;;  %7504 = vmatpush3.bf16.msra.mxu1 %v11267_v54  ;;  %v11281_v54 = vld [vmem:[#allocation93_spill] sm:$0xff] }
 0x1cc   : > { %7497 = vmatprep.subr.bf16.mxu1 %v11270_v35 }
 0x1cd   : > { %6484 = vmatmul.mubr.f32.gmra.mrb[10].mxu1 %v9627_v1  ;;  %v11276_v1 = vld [vmem:[#allocation12_spill] sm:$0xff] }
 0x1ce   : > { %7044 = vmatmul.mubr.f32.gmra.mrb[42].mxu0 %v11271_v15  ;;  %6486 = vmatprep.mubr.f32.mxu1 %v9638_v31  ;;  %v11277_v31 = vld [vmem:[#allocation85_spill] sm:$0xff] }
 0x1cf   : > { %7046 = vmatprep.mubr.f32.mxu0 %v11272_v5  ;;  %7505 = vmatpush3.bf16.msra.mxu1 %v11270_v35  ;;  %v2699_v35 = vrot.slane %v9757_v59, 1 }
 0x1d0   : > { %7498 = vmatprep.subr.bf16.mxu1 %v11273_v58 }
 0x1d1   : > { %6487 = vmatmul.mubr.f32.gmra.mrb[12].mxu1 %v9654_v0  ;;  %v11279_v0 = vld [vmem:[#allocation89_spill] sm:$0xff] }
 0x1d2   : > { %7047 = vmatmul.mubr.f32.gmra.mrb[44].mxu0 %v11274_v45  ;;  %6489 = vmatprep.mubr.f32.mxu1 %v9659_v19  ;;  %v11280_v19 = vld [vmem:[#allocation91_spill] sm:$0xff] }
 0x1d3   : > { %7049 = vmatprep.mubr.f32.mxu0 %v11275_v20  ;;  %7506 = vmatpush3.bf16.msra.mxu1 %v11273_v58  ;;  %v11289_v58 = vld [vmem:[#allocation144_spill] sm:$0xff] }
 0x1d4   : > { %7499 = vmatprep.subr.bf16.mxu1 %v11276_v1 }
 0x1d5   : > { %6490 = vmatmul.mubr.f32.gmra.mrb[14].mxu1 %v9674_v23  ;;  %v11282_v23 = vld [vmem:[#allocation95_spill] sm:$0xff] }
 0x1d6   : > { %7050 = vmatmul.mubr.f32.gmra.mrb[46].mxu0 %v11277_v31  ;;  %6492 = vmatprep.mubr.f32.mxu1 %v9679_v13  ;;  %v11283_v13 = vld [vmem:[#allocation99_spill] sm:$0xff] }
 0x1d7   : > { %7052 = vmatprep.mubr.f32.mxu0 %v11278_v28  ;;  %7507 = vmatpush3.bf16.msra.mxu1 %v11276_v1  ;;  %v4079_v1 = vrot.slane %v10099_v47, 1 }
 0x1d9   : > { %6493 = vmatmul.mubr.f32.gmra.mrb[16].mxu1 %v9693_v57  ;;  %v11284_v57 = vld [vmem:[#allocation101_spill] sm:$0xff] }
 0x1da   : > { %7053 = vmatmul.mubr.f32.gmra.mrb[48].mxu0 %v11279_v0  ;;  %6495 = vmatprep.mubr.f32.mxu1 %v9698_v14  ;;  %v11285_v14 = vld [vmem:[#allocation105_spill] sm:$0xff] }
 0x1db   : > { %7055 = vmatprep.mubr.f32.mxu0 %v11280_v19 }
 0x1dd   : > { %6496 = vmatmul.mubr.f32.gmra.mrb[18].mxu1 %v9712_v12  ;;  %v11286_v12 = vld [vmem:[#allocation107_spill] sm:$0xff] }
 0x1de   : > { %7056 = vmatmul.mubr.f32.gmra.mrb[50].mxu0 %v11281_v54  ;;  %6498 = vmatprep.mubr.f32.mxu1 %v9717_v8  ;;  %v2698_v8 = vrot.slane %v9754_v37, 1 }
 0x1df   : > { %7058 = vmatprep.mubr.f32.mxu0 %v11282_v23 }
 0x1e0   : > { %v10299_v21 = vsel %vm569_vm0, %v2698_v8, %v2699_v35  ;;  %v11291_v8 = vld [vmem:[#allocation97_spill] sm:$0xff] }
 0x1e1   : > { %6499 = vmatmul.mubr.f32.gmra.mrb[20].mxu1 %v9731_v3  ;;  %v11287_v3 = vld [vmem:[#allocation40_spill] sm:$0xff] }
 0x1e2   : > { %7059 = vmatmul.mubr.f32.gmra.mrb[52].mxu0 %v11283_v13  ;;  %6501 = vmatprep.mubr.f32.mxu1 %v9736_v52  ;;  %v11288_v52 = vld [vmem:[#allocation108_spill] sm:$0xff] }
 0x1e3   : > { %7061 = vmatprep.mubr.f32.mxu0 %v11284_v57 }
 0x1e5   : > { %6502 = vmatmul.mubr.f32.gmra.mrb[22].mxu1 %v9750_v63  ;;  %v2701_v63 = vrot.slane %v11289_v58, 1  ;;  %v4082_v58 = vrot.slane %v10302_v62, 1 }
 0x1e6   : > { %7062 = vmatmul.mubr.f32.gmra.mrb[54].mxu0 %v11285_v14  ;;  %6504 = vmatprep.mubr.f32.mxu1 %v9761_v51  ;;  %v4080_v51 = vrot.slane %v10107_v34, 1 }
 0x1e7   : > { %7064 = vmatprep.mubr.f32.mxu0 %v11286_v12 }
 0x1e9   : > { %6505 = vmatmul.mubr.f32.gmra.mrb[24].mxu1 %v9778_v25  ;;  %v11290_v25 = vld [vmem:[#allocation46_spill] sm:$0xff] }
 0x1ea   : > { %7065 = vmatmul.mubr.f32.gmra.mrb[56].mxu0 %v11287_v3  ;;  %6507 = vmatprep.mubr.f32.mxu1 %v9783_v26  ;;  %v10309_v26 = vsel %vm569_vm0, %v2699_v35, %v2701_v63  ;;  %v11293_v35 = vld [vmem:[#allocation111_spill] sm:$0xff]  ;;  %v11297_v63 = vld [vmem:[#allocation98_spill] sm:$0xff] }
 0x1eb   : > { %7067 = vmatprep.mubr.f32.mxu0 %v11288_v52  ;;  %v4081_v52 = vsel %vm569_vm0, %v4079_v1, %v4080_v51  ;;  %v11298_v1 = vld [vmem:[#allocation62_spill] sm:$0xff] }
 0x1ed   : > { %6508 = vmatmul.mubr.f32.gmra.mrb[26].mxu1 %v9795_v29  ;;  %v4083_v29 = vsel %vm569_vm0, %v4080_v51, %v4082_v58  ;;  %v11302_v51 = vld [vmem:[#allocation66_spill] sm:$0xff]  ;;  %v11303_v58 = vld [vmem:[#allocation131_spill] sm:$0xff] }
 0x1ee   : > { %7068 = vmatmul.mubr.f32.gmra.mrb[58].mxu0 %v11290_v25  ;;  %6510 = vmatprep.mubr.f32.mxu1 %v9800_v36  ;;  %v8131_v36 = vld [vmem:[%s8365_s28 + $0x1c8] sm:$0xff] }
 0x1ef   : > { %7070 = vmatprep.mubr.f32.mxu0 %v10299_v21 }
 0x1f1   : > { %6511 = vmatmul.mubr.f32.gmra.mrb[28].mxu1 %v9808_v44  ;;  %v11292_v44 = vld [vmem:[#allocation56_spill] sm:$0xff] }
 0x1f2   : > { %7071 = vmatmul.mubr.f32.gmra.mrb[60].mxu0 %v10309_v26  ;;  %6513 = vmatprep.mubr.f32.mxu1 %v9931_v11  ;;  %v11294_v11 = vld [vmem:[#allocation58_spill] sm:$0xff] }
 0x1f3   : > { %7073 = vmatprep.mubr.f32.mxu0 %v4081_v52  ;;  %v11295_v52 = vld [vmem:[#allocation114_spill] sm:$0xff] }
 0x1f5   : > { %6514 = vmatmul.mubr.f32.gmra.mrb[30].mxu1 %v9942_v39  ;;  %v11296_v39 = vld [vmem:[#allocation60_spill] sm:$0xff] }
 0x1f6   : > { %7074 = vmatmul.mubr.f32.gmra.mrb[62].mxu0 %v4083_v29  ;;  %6516 = vmatprep.mubr.f32.mxu1 %v8131_v36  ;;  %v11304_v29 = vld [vmem:[#allocation49_spill] sm:$0xff]  ;;  %v11305_v36 = vld [vmem:[#allocation50_spill] sm:$0xff] }
 0x1f7   : > { %7108 = vmatprep.mubr.f32.mxu0 %v11153_v46  ;;  %v11299_v46 = vld [vmem:[#allocation103_spill] sm:$0xff] }
 0x1f9   : > { %6517 = vmatmul.mubr.f32.gmra.mrb[32].mxu1 %v9838_v4  ;;  %v11300_v4 = vld [vmem:[#allocation64_spill] sm:$0xff] }
 0x1fa   : > { %7109 = vmatmul.mubr.f32.vlgmr.msra.gmra.mrb[0].mxu0 %v11155_v10  ;;  %6519 = vmatprep.mubr.f32.mxu1 %v11291_v8  ;;  %v11301_v10 = vld [vmem:[#allocation104_spill] sm:$0xff] }
 0x1fb   : > { %7111 = vmatprep.mubr.f32.mxu0 %v11292_v44  ;;  %v11306_v8 = vld [vmem:[#allocation52_spill] sm:$0xff]  ;;  %v11307_v44 = vld [vmem:[#allocation54_spill] sm:$0xff] }
 0x1fd   : > { %6520 = vmatmul.mubr.f32.gmra.mrb[34].mxu1 %v11293_v35  ;;  %v11308_v35 = vld [vmem:[#allocation148_spill] sm:$0xff] }
 0x1fe   : > { %7112 = vmatmul.mubr.f32.gmra.mrb[2].mxu0 %v11294_v11  ;;  %6522 = vmatprep.mubr.f32.mxu1 %v11295_v52  ;;  %v11313_v11 = vld [vmem:[#allocation96_spill] sm:$0xff] }
 0x1ff   : > { %7114 = vmatprep.mubr.f32.mxu0 %v11296_v39  ;;  %v11314_v52 = vld [vmem:[#allocation100_spill] sm:$0xff]  ;;  %v8140_v39 = vld [vmem:[%s8365_s28 + $0x2e8] sm:$0xff] }
 0x201   : > { %6523 = vmatmul.mubr.f32.gmra.mrb[36].mxu1 %v11297_v63  ;;  %v11315_v63 = vld [vmem:[#allocation102_spill] sm:$0xff] }
 0x202   : > { %7115 = vmatmul.mubr.f32.gmra.mrb[4].mxu0 %v11298_v1  ;;  %6525 = vmatprep.mubr.f32.mxu1 %v11299_v46  ;;  %v8141_v1 = vld [vmem:[%s8365_s28 + $0x2f0] sm:$0xff]  ;;  %v11316_v46 = vld [vmem:[#allocation106_spill] sm:$0xff] }
 0x203   : > { %7117 = vmatprep.mubr.f32.mxu0 %v11300_v4  ;;  %v8142_v4 = vld [vmem:[%s8365_s28 + $0x300] sm:$0xff] }
 0x205   : > { %6526 = vmatmul.mubr.f32.gmra.mrb[38].mxu1 %v11301_v10  ;;  %v11317_v10 = vld [vmem:[#allocation39_spill] sm:$0xff] }
 0x206   : > { %7118 = vmatmul.mubr.f32.gmra.mrb[6].mxu0 %v11302_v51  ;;  %6528 = vmatprep.mubr.f32.mxu1 %v11303_v58  ;;  %v4537_v51 = vrot.slane %v9937_v40, 2  ;;  %v4538_v58 = vrot.slane %v9948_v32, 2  ;;  %v11322_v32 = vld [vmem:[#allocation51_spill] sm:$0xff] }
 0x207   : > { %7120 = vmatprep.mubr.f32.mxu0 %v11169_v33  ;;  %v11309_v33 = vld [vmem:[#allocation68_spill] sm:$0xff] }
 0x209   : > { %6529 = vmatmul.mubr.f32.gmra.mrb[40].mxu1 %v11304_v29  ;;  %v8143_v29 = vld [vmem:[%s8365_s28 + $0x308] sm:$0xff] }
 0x20a   : > { %7121 = vmatmul.mubr.f32.gmra.mrb[8].mxu0 %v11171_v38  ;;  %6531 = vmatprep.mubr.f32.mxu1 %v11305_v36  ;;  %v8135_v38 = vld [vmem:[%s8365_s28 + $0x2a8] sm:$0xff]  ;;  %v11318_v36 = vld [vmem:[#allocation41_spill] sm:$0xff] }
 0x20b   : > { %7123 = vmatprep.mubr.f32.mxu0 %v11172_v49  ;;  %v8134_v49 = vld [vmem:[%s8365_s28 + $0x2a0] sm:$0xff] }
 0x20d   : > { %6532 = vmatmul.mubr.f32.gmra.mrb[42].mxu1 %v11306_v8  ;;  %v8144_v8 = vld [vmem:[%s8365_s28 + $0x318] sm:$0xff] }
 0x20e   : > { %7124 = vmatmul.mubr.f32.gmra.mrb[10].mxu0 %v11173_v48  ;;  %6534 = vmatprep.mubr.f32.mxu1 %v11307_v44  ;;  %v8132_v48 = vld [vmem:[%s8365_s28 + $0x288] sm:$0xff]  ;;  %v11319_v44 = vld [vmem:[#allocation109_spill] sm:$0xff] }
 0x20f   : > { %7126 = vmatprep.mubr.f32.mxu0 %v11174_v61  ;;  %v8133_v61 = vld [vmem:[%s8365_s28 + $0x290] sm:$0xff] }
 0x211   : > { %6535 = vmatmul.mubr.f32.gmra.mrb[44].mxu1 %v11308_v35  ;;  %v11320_v35 = vld [vmem:[#allocation70_spill] sm:$0xff] }
 0x212   : > { %7127 = vmatmul.mubr.f32.gmra.mrb[12].mxu0 %v11176_v60  ;;  %6537 = vmatprep.mubr.f32.mxu1 %v11309_v33  ;;  %v8136_v60 = vld [vmem:[%s8365_s28 + $0x2b8] sm:$0xff]  ;;  %v4540_v33 = vrot.slane %v11320_v35, 2 }
 0x213   : > { %7129 = vmatprep.mubr.f32.mxu0 %v11177_v22  ;;  %v11311_v22 = vld [vmem:[#allocation92_spill] sm:$0xff] }
 0x214   : > { %v4541_v40 = vsel %vm1564_vm1, %v4538_v58, %v4540_v33 }
 0x215   : > { %6538 = vmatmul.mubr.f32.gmra.mrb[46].mxu1 %v10062_v7  ;;  %v11310_v7 = vld [vmem:[#allocation90_spill] sm:$0xff] }
 0x216   : > { %7130 = vmatmul.mubr.f32.gmra.mrb[14].mxu0 %v11178_v17  ;;  %6540 = vmatprep.mubr.f32.mxu1 %v8132_v48  ;;  %v8137_v17 = vld [vmem:[%s8365_s28 + $0x2c0] sm:$0xff]  ;;  %v4539_v48 = vsel %vm1564_vm1, %v4537_v51, %v4538_v58 }
 0x217   : > { %7132 = vmatprep.mubr.f32.mxu0 %v11179_v2  ;;  %v11312_v2 = vld [vmem:[#allocation94_spill] sm:$0xff] }
 0x219   : > { %6541 = vmatmul.mubr.f32.gmra.mrb[48].mxu1 %v8133_v61  ;;  %v8145_v61 = vld [vmem:[%s8365_s28 + $0x320] sm:$0xff] }
 0x21a   : > { %7133 = vmatmul.mubr.f32.gmra.mrb[16].mxu0 %v11180_v55  ;;  %6543 = vmatprep.mubr.f32.mxu1 %v8134_v49  ;;  %v8138_v55 = vld [vmem:[%s8365_s28 + $0x2d0] sm:$0xff] }
 0x21b   : > { %7135 = vmatprep.mubr.f32.mxu0 %v11181_v27  ;;  %v8139_v27 = vld [vmem:[%s8365_s28 + $0x2d8] sm:$0xff]  ;;  %v11321_v49 = vld [vmem:[#allocation47_spill] sm:$0xff]  ;;  %s202_s28 = sand.u32 1, %s8208_s13  }
 0x21c   : > { %s5320_s4 = sshll.u32 %s202_s28, 9  ;;  %s10673_s15 = scalar_lea.sflag [#allocation3], %s202_s28 }
 0x21d   : > { %6544 = vmatmul.mubr.f32.gmra.mrb[50].mxu1 %v8135_v38  ;;  %v11323_v38 = vld [vmem:[#allocation113_spill] sm:$0xff]  ;;  %s10510_s6 = scalar_lea.vmem [#allocation2], %s5320_s4 }
 0x21e   : > { %7136 = vmatmul.mubr.f32.gmra.mrb[18].mxu0 %v11310_v7  ;;  %6546 = vmatprep.mubr.f32.mxu1 %v8136_v60  ;;  %v11324_v7 = vld [vmem:[#allocation53_spill] sm:$0xff]  ;;  %v11325_v60 = vld [vmem:[#allocation115_spill] sm:$0xff]  ;;  %s5214_s8 = sshll.u32 %s10510_s6, 4  ;;  %s10667_s8 = int_to_ptr.vmem [resolvable:$true] %s5214_s8 }
 0x21f   : > { %7138 = vmatprep.mubr.f32.mxu0 %v11311_v22  ;;  %v11326_v22 = vld [vmem:[#allocation116_spill] sm:$0xff]  ;;  %s8146_s18 = scalar_lea.vmem %s10667_s8, 8192  ;;  %p8153_p1 = scmp.lt.s32.totalorder %s10667_s8, %s8151_s21 }
 0x220   : > { %p8147_p12 = scmp.ne.s32.totalorder %s10667_s8, %s8146_s18  ;;  %p8154_p2 = scmp.lt.s32.totalorder %s8152_s23, %s8146_s18 }
 0x221   : > { %6547 = vmatmul.mubr.f32.gmra.mrb[52].mxu1 %v8137_v17  ;;  %v11329_v17 = vld [vmem:[#allocation121_spill] sm:$0xff] }
 0x222   : > { %7139 = vmatmul.mubr.f32.gmra.mrb[20].mxu0 %v11312_v2  ;;  %6549 = vmatprep.mubr.f32.mxu1 %v8138_v55  ;;  %v11330_v2 = vld [vmem:[#allocation122_spill] sm:$0xff]  ;;  %v11351_v55 = vld [vmem:[#allocation108_spill] sm:$0xff]  ;;  %p8148_p13 = pnand %p8147_p12, %p8289_p4  ;;  %p8155_p3 = por %p8154_p2, %p8153_p1 }
 0x223   : > { %7141 = vmatprep.mubr.f32.mxu0 %v11313_v11 }
 0x224   : > { %p8149_p0 = pneg %p8148_p13 }
 0x225   : > { %6550 = vmatmul.mubr.f32.gmra.mrb[54].mxu1 %v8139_v27 }
 0x226   : > { %7142 = vmatmul.mubr.f32.gmra.mrb[22].mxu0 %v11314_v52  ;;  %6552 = vmatprep.mubr.f32.mxu1 %v8140_v39  ;;  %p8156_p5 = pnand %p8155_p3, %p8149_p0 }
 0x227   : > { %7144 = vmatprep.mubr.f32.mxu0 %v11315_v63 }
 0x229   : > { %6553 = vmatmul.mubr.f32.gmra.mrb[56].mxu1 %v8141_v1 }
 0x22a   : > { %7145 = vmatmul.mubr.f32.gmra.mrb[24].mxu0 %v11316_v46  ;;  %6555 = vmatprep.mubr.f32.mxu1 %v8142_v4 }
 0x22b   : > { %7147 = vmatprep.mubr.f32.mxu0 %v11317_v10 }
 0x22d   : > { %6556 = vmatmul.mubr.f32.gmra.mrb[58].mxu1 %v8143_v29 }
 0x22e   : > { %7148 = vmatmul.mubr.f32.gmra.mrb[26].mxu0 %v11318_v36  ;;  %6558 = vmatprep.mubr.f32.mxu1 %v8144_v8 }
 0x22f   : > { %7150 = vmatprep.mubr.f32.mxu0 %v11319_v44 }
 0x231   : > { %6559 = vmatmul.mubr.f32.gmra.mrb[60].mxu1 %v8145_v61 }
 0x232   : > { %7151 = vmatmul.mubr.f32.gmra.mrb[28].mxu0 %v11321_v49  ;;  %6561 = vmatprep.mubr.f32.mxu1 %v9754_v37  ;;  %v11327_v37 = vld [vmem:[#allocation118_spill] sm:$0xff] }
 0x233   : > { %7153 = vmatprep.mubr.f32.mxu0 %v4539_v48 }
 0x235   : > { %6562 = vmatmul.mubr.f32.gmra.mrb[62].mxu1 %v9757_v59  ;;  %v11328_v59 = vld [vmem:[#allocation119_spill] sm:$0xff] }
 0x236   : > { %7154 = vmatmul.mubr.f32.gmra.mrb[30].mxu0 %v4541_v40  ;;  %6644 = vmatprep.mubr.f32.mxu1 %v11322_v32 }
 0x237   : > { %7156 = vmatprep.mubr.f32.mxu0 %v11323_v38 }
 0x239   : > { %6645 = vmatmul.mubr.f32.vlgmr.msra.gmra.mrb[32].mxu1 %v11324_v7 }
 0x23a   : > { %7157 = vmatmul.mubr.f32.gmra.mrb[32].mxu0 %v11325_v60  ;;  %6647 = vmatprep.mubr.f32.mxu1 %v11253_v43  ;;  %v11331_v43 = vld [vmem:[#allocation123_spill] sm:$0xff] }
 0x23b   : > { %7159 = vmatprep.mubr.f32.mxu0 %v11326_v22 }
 0x23d   : > { %6648 = vmatmul.mubr.f32.gmra.mrb[34].mxu1 %v11255_v18  ;;  %v11332_v18 = vld [vmem:[#allocation124_spill] sm:$0xff] }
 0x23e   : > { %7160 = vmatmul.mubr.f32.gmra.mrb[34].mxu0 %v11327_v37  ;;  %6650 = vmatprep.mubr.f32.mxu1 %v11256_v9  ;;  %v11333_v9 = vld [vmem:[#allocation125_spill] sm:$0xff] }
 0x23f   : > { %7162 = vmatprep.mubr.f32.mxu0 %v11328_v59  ;;  %v10504_v37 = vld [vmem:[%s10721_s2] ss:$0 sm:$0xff] }
 0x241   : > { %6651 = vmatmul.mubr.f32.gmra.mrb[36].mxu1 %v11259_v41  ;;  %v11334_v41 = vld [vmem:[#allocation126_spill] sm:$0xff] }
 0x242   : > { %7163 = vmatmul.mubr.f32.gmra.mrb[36].mxu0 %v11329_v17  ;;  %6653 = vmatprep.mubr.f32.mxu1 %v11260_v53  ;;  %v11335_v53 = vld [vmem:[#allocation127_spill] sm:$0xff] }
 0x243   : > { %7165 = vmatprep.mubr.f32.mxu0 %v11330_v2 }
 0x245   : > { %6654 = vmatmul.mubr.f32.gmra.mrb[38].mxu1 %v11262_v6  ;;  %v11336_v6 = vld [vmem:[#allocation128_spill] sm:$0xff] }
 0x246   : > { %7166 = vmatmul.mubr.f32.gmra.mrb[38].mxu0 %v11331_v43  ;;  %6656 = vmatprep.mubr.f32.mxu1 %v11263_v30  ;;  %v11337_v30 = vld [vmem:[#allocation129_spill] sm:$0xff] }
 0x247   : > { %7168 = vmatprep.mubr.f32.mxu0 %v11332_v18 }
 0x249   : > { %6657 = vmatmul.mubr.f32.gmra.mrb[40].mxu1 %v11265_v42  ;;  %v11338_v42 = vld [vmem:[#allocation130_spill] sm:$0xff] }
 0x24a   : > { %7169 = vmatmul.mubr.f32.gmra.mrb[40].mxu0 %v11333_v9  ;;  %6659 = vmatprep.mubr.f32.mxu1 %v11266_v56  ;;  %v11339_v56 = vld [vmem:[#allocation132_spill] sm:$0xff] }
 0x24b   : > { %7171 = vmatprep.mubr.f32.mxu0 %v11334_v41 }
 0x24d   : > { %6660 = vmatmul.mubr.f32.gmra.mrb[42].mxu1 %v11268_v16  ;;  %v11340_v16 = vld [vmem:[#allocation133_spill] sm:$0xff] }
 0x24e   : > { %7172 = vmatmul.mubr.f32.gmra.mrb[42].mxu0 %v11335_v53  ;;  %6662 = vmatprep.mubr.f32.mxu1 %v11269_v50  ;;  %v11341_v50 = vld [vmem:[#allocation134_spill] sm:$0xff] }
 0x24f   : > { %7174 = vmatprep.mubr.f32.mxu0 %v11336_v6 }
 0x251   : > { %6663 = vmatmul.mubr.f32.gmra.mrb[44].mxu1 %v11271_v15  ;;  %v11342_v15 = vld [vmem:[#allocation135_spill] sm:$0xff] }
 0x252   : > { %7175 = vmatmul.mubr.f32.gmra.mrb[44].mxu0 %v11337_v30  ;;  %6665 = vmatprep.mubr.f32.mxu1 %v11272_v5  ;;  %v11343_v5 = vld [vmem:[#allocation136_spill] sm:$0xff] }
 0x253   : > { %7177 = vmatprep.mubr.f32.mxu0 %v11338_v42 }
 0x255   : > { %6666 = vmatmul.mubr.f32.gmra.mrb[46].mxu1 %v11274_v45  ;;  %v11344_v45 = vld [vmem:[#allocation137_spill] sm:$0xff] }
 0x256   : > { %7178 = vmatmul.mubr.f32.gmra.mrb[46].mxu0 %v11339_v56  ;;  %6668 = vmatprep.mubr.f32.mxu1 %v11275_v20  ;;  %v11345_v20 = vld [vmem:[#allocation138_spill] sm:$0xff] }
 0x257   : > { %7180 = vmatprep.mubr.f32.mxu0 %v11340_v16 }
 0x259   : > { %6669 = vmatmul.mubr.f32.gmra.mrb[48].mxu1 %v11277_v31  ;;  %v11346_v31 = vld [vmem:[#allocation139_spill] sm:$0xff] }
 0x25a   : > { %7181 = vmatmul.mubr.f32.gmra.mrb[48].mxu0 %v11341_v50  ;;  %6671 = vmatprep.mubr.f32.mxu1 %v11278_v28  ;;  %v11347_v28 = vld [vmem:[#allocation140_spill] sm:$0xff] }
 0x25b   : > { %7183 = vmatprep.mubr.f32.mxu0 %v11342_v15 }
 0x25d   : > { %6672 = vmatmul.mubr.f32.gmra.mrb[50].mxu1 %v11279_v0  ;;  %v11348_v0 = vld [vmem:[#allocation141_spill] sm:$0xff] }
 0x25e   : > { %7184 = vmatmul.mubr.f32.gmra.mrb[50].mxu0 %v11343_v5  ;;  %6674 = vmatprep.mubr.f32.mxu1 %v11280_v19  ;;  %v11349_v19 = vld [vmem:[#allocation143_spill] sm:$0xff] }
 0x25f   : > { %7186 = vmatprep.mubr.f32.mxu0 %v11344_v45 }
 0x261   : > { %6675 = vmatmul.mubr.f32.gmra.mrb[52].mxu1 %v11281_v54  ;;  %v4542_v54 = vrot.slane %v10099_v47, 2 }
 0x262   : > { %7187 = vmatmul.mubr.f32.gmra.mrb[52].mxu0 %v11345_v20  ;;  %6677 = vmatprep.mubr.f32.mxu1 %v11282_v23  ;;  %v4543_v23 = vrot.slane %v10107_v34, 2 }
 0x263   : > { %7189 = vmatprep.mubr.f32.mxu0 %v11346_v31 }
 0x265   : > { %6678 = vmatmul.mubr.f32.gmra.mrb[54].mxu1 %v11283_v13  ;;  %v11350_v13 = vld [vmem:[#allocation145_spill] sm:$0xff] }
 0x266   : > { %7190 = vmatmul.mubr.f32.gmra.mrb[54].mxu0 %v11347_v28  ;;  %6680 = vmatprep.mubr.f32.mxu1 %v11284_v57  ;;  %v11352_v57 = vld [vmem:[#allocation146_spill] sm:$0xff] }
 0x267   : > { %7192 = vmatprep.mubr.f32.mxu0 %v11348_v0 }
 0x269   : > { %6681 = vmatmul.mubr.f32.gmra.mrb[56].mxu1 %v11285_v14  ;;  %v4545_v14 = vrot.slane %v10302_v62, 2 }
 0x26a   : > { %7193 = vmatmul.mubr.f32.gmra.mrb[56].mxu0 %v11248_v24  ;;  %6683 = vmatprep.mubr.f32.mxu1 %v11286_v12  ;;  %v4544_v24 = vsel %vm1564_vm1, %v4542_v54, %v4543_v23  ;;  %v11353_v12 = vld [vmem:[#allocation147_spill] sm:$0xff] }
 0x26b   : > { %7195 = vmatprep.mubr.f32.mxu0 %v11349_v19  ;;  %v4546_v47 = vsel %vm1564_vm1, %v4543_v23, %v4545_v14 }
 0x26d   : > { %6684 = vmatmul.mubr.f32.gmra.mrb[58].mxu1 %v11287_v3 }
 0x26e   : > { %7196 = vmatmul.mubr.f32.gmra.mrb[58].mxu0 %v11350_v13  ;;  %6686 = vmatprep.mubr.f32.mxu1 %v11351_v55 }
 0x26f   : > { %7198 = vmatprep.mubr.f32.mxu0 %v11352_v57 }
 0x271   : > { %6687 = vmatmul.mubr.f32.gmra.mrb[60].mxu1 %v11290_v25 }
 0x272   : > { %7199 = vmatmul.mubr.f32.gmra.mrb[60].mxu0 %v11353_v12  ;;  %6689 = vmatprep.mubr.f32.mxu1 %v10299_v21 }
 0x273   : > { %7201 = vmatprep.mubr.f32.mxu0 %v4544_v24 }
 0x275   : > { %6690 = vmatmul.mubr.f32.gmra.mrb[62].mxu1 %v10309_v26 }
 0x276   : > { %7202 = vmatmul.mubr.f32.gmra.mrb[62].mxu0 %v4546_v47 }
 0x28c   : > { %v6470_v34 = vpop.f32.mrb[0].mxu1 }
 0x28d   : > { %v2304_v3 = vpop.f32.mrb[1].mxu1 }
 0x290   : > { %v6473_v11 = vpop.f32.mrb[2].mxu1 }
 0x291   : > { %v2314_v27 = vpop.f32.mrb[3].mxu1 }
 0x294   : > { %v6476_v52 = vpop.f32.mrb[4].mxu1 }
 0x295   : > { %v2324_v62 = vpop.f32.mrb[5].mxu1 }
 0x298   : > { %v6479_v39 = vpop.f32.mrb[6].mxu1 }
 0x299   : > { %v2334_v63 = vpop.f32.mrb[7].mxu1 }
 0x29c   : > { %v10452_v1 = vpop.f32.mrb[8].mxu1 }
 0x29d   : > { %v10454_v25 = vpop.f32.mrb[9].mxu1 }
 0x2a0   : > { %v10456_v46 = vpop.f32.mrb[10].mxu1 }
 0x2a1   : > { %v10458_v21 = vpop.f32.mrb[11].mxu1 }
 0x2a4   : > { %v10460_v4 = vpop.f32.mrb[12].mxu1 }
 0x2a5   : > { %v10462_v26 = vpop.f32.mrb[13].mxu1 }
 0x2a8   : > { %v10464_v10 = vpop.f32.mrb[14].mxu1 }
 0x2a9   : > { %v10466_v51 = vpop.f32.mrb[15].mxu1 }
 0x2ac   : > { %v10468_v58 = vpop.f32.mrb[16].mxu1 }
 0x2ad   : > { %v10470_v29 = vpop.f32.mrb[17].mxu1 }
 0x2b0   : > { %v10472_v36 = vpop.f32.mrb[18].mxu1 }
 0x2b1   : > { %v10474_v8 = vpop.f32.mrb[19].mxu1 }
 0x2b4   : > { %v10476_v44 = vpop.f32.mrb[20].mxu1 }
 0x2b5   : > { %v10478_v35 = vpop.f32.mrb[21].mxu1 }
 0x2b8   : > { %v10480_v33 = vpop.f32.mrb[22].mxu1 }
 0x2b9   : > { %v10482_v48 = vpop.f32.mrb[23].mxu1 }
 0x2bc   : > { %v10484_v61 = vpop.f32.mrb[24].mxu1 }
 0x2bd   : > { %v10486_v49 = vpop.f32.mrb[25].mxu1 }
 0x2c0   : > { %v10488_v40 = vpop.f32.mrb[26].mxu1 }
 0x2c1   : > { %v10490_v32 = vpop.f32.mrb[27].mxu1 }
 0x2c4   : > { %v10492_v38 = vpop.f32.mrb[28].mxu1 }
 0x2c5   : > { %v10494_v7 = vpop.f32.mrb[29].mxu1 }
 0x2c8   : > { %v10496_v60 = vpop.f32.mrb[30].mxu1 }
 0x2c9   : > { %v10498_v22 = vpop.f32.mrb[31].mxu1 }
 0x2cd   : > { %v7110_v59 = vpop.f32.mrb[0].mxu0 }
 0x2ce   : > { %v7508_v17 = vadd.f32 %v7110_v59, %v6470_v34  ;;  %v4617_v2 = vpop.f32.mrb[1].mxu0 }
 0x2cf   : > { %v7509_v43 = vadd.f32 %v4617_v2, %v2304_v3 }
 0x2d0   : > { %v5007_v18 = vadd.f32 %v7508_v17, %v10504_v37 }
 0x2d1   : > { %v5006_v9 = vadd.f32 %v7509_v43, %v10504_v37  ;;  %v7113_v41 = vpop.f32.mrb[2].mxu0 }
 0x2d2   : > { %v5071_v53 = vmax.f32 %v5007_v18, 0.0  ;;  %v7510_v6 = vadd.f32 %v7113_v41, %v6473_v11  ;;  %v4627_v30 = vpop.f32.mrb[3].mxu0 }
 0x2d3   : > { %v5070_v42 = vmax.f32 %v5006_v9, 0.0  ;;  %v7511_v56 = vadd.f32 %v4627_v30, %v2314_v27 }
 0x2d4   : > { %5135 = vst [vmem:[%s10510_s6 + $0x8] sm:$0xff] %v5071_v53  ;;  %v5009_v16 = vadd.f32 %v7510_v6, %v10504_v37 }
 0x2d5   : > { %5134 = vst [vmem:[%s10510_s6] sm:$0xff] %v5070_v42  ;;  %v5008_v50 = vadd.f32 %v7511_v56, %v10504_v37  ;;  %v7116_v15 = vpop.f32.mrb[4].mxu0 }
 0x2d6   : > { %v5073_v5 = vmax.f32 %v5009_v16, 0.0  ;;  %v7512_v45 = vadd.f32 %v7116_v15, %v6476_v52  ;;  %v4637_v20 = vpop.f32.mrb[5].mxu0 }
 0x2d7   : > { %v5072_v31 = vmax.f32 %v5008_v50, 0.0  ;;  %v7513_v28 = vadd.f32 %v4637_v20, %v2324_v62 }
 0x2d8   : > { %5137 = vst [vmem:[%s10510_s6 + $0x18] sm:$0xff] %v5073_v5  ;;  %v5011_v0 = vadd.f32 %v7512_v45, %v10504_v37 }
 0x2d9   : > { %5136 = vst [vmem:[%s10510_s6 + $0x10] sm:$0xff] %v5072_v31  ;;  %v5010_v19 = vadd.f32 %v7513_v28, %v10504_v37  ;;  %v7119_v54 = vpop.f32.mrb[6].mxu0 }
 0x2da   : > { %v5075_v23 = vmax.f32 %v5011_v0, 0.0  ;;  %v7514_v13 = vadd.f32 %v7119_v54, %v6479_v39  ;;  %v4647_v55 = vpop.f32.mrb[7].mxu0 }
 0x2db   : > { %v5074_v57 = vmax.f32 %v5010_v19, 0.0  ;;  %v7515_v14 = vadd.f32 %v4647_v55, %v2334_v63 }
 0x2dc   : > { %5139 = vst [vmem:[%s10510_s6 + $0x28] sm:$0xff] %v5075_v23  ;;  %v5013_v24 = vadd.f32 %v7514_v13, %v10504_v37 }
 0x2dd   : > { %5138 = vst [vmem:[%s10510_s6 + $0x20] sm:$0xff] %v5074_v57  ;;  %v5012_v12 = vadd.f32 %v7515_v14, %v10504_v37  ;;  %v7122_v47 = vpop.f32.mrb[8].mxu0 }
 0x2de   : > { %v5077_v34 = vmax.f32 %v5013_v24, 0.0  ;;  %v7516_v3 = vadd.f32 %v7122_v47, %v10452_v1  ;;  %v4657_v11 = vpop.f32.mrb[9].mxu0 }
 0x2df   : > { %v5076_v27 = vmax.f32 %v5012_v12, 0.0  ;;  %v7517_v52 = vadd.f32 %v4657_v11, %v10454_v25 }
 0x2e0   : > { %5141 = vst [vmem:[%s10510_s6 + $0x38] sm:$0xff] %v5077_v34  ;;  %v5015_v62 = vadd.f32 %v7516_v3, %v10504_v37 }
 0x2e1   : > { %5140 = vst [vmem:[%s10510_s6 + $0x30] sm:$0xff] %v5076_v27  ;;  %v5014_v39 = vadd.f32 %v7517_v52, %v10504_v37  ;;  %v7125_v63 = vpop.f32.mrb[10].mxu0 }
 0x2e2   : > { %v5079_v59 = vmax.f32 %v5015_v62, 0.0  ;;  %v7518_v17 = vadd.f32 %v7125_v63, %v10456_v46  ;;  %v4667_v2 = vpop.f32.mrb[11].mxu0 }
 0x2e3   : > { %v5078_v43 = vmax.f32 %v5014_v39, 0.0  ;;  %v7519_v1 = vadd.f32 %v4667_v2, %v10458_v21 }
 0x2e4   : > { %5143 = vst [vmem:[%s10510_s6 + $0x48] sm:$0xff] %v5079_v59  ;;  %v5017_v18 = vadd.f32 %v7518_v17, %v10504_v37 }
 0x2e5   : > { %5142 = vst [vmem:[%s10510_s6 + $0x40] sm:$0xff] %v5078_v43  ;;  %v5016_v25 = vadd.f32 %v7519_v1, %v10504_v37  ;;  %v7128_v9 = vpop.f32.mrb[12].mxu0 }
 0x2e6   : > { %v5081_v41 = vmax.f32 %v5017_v18, 0.0  ;;  %v7520_v53 = vadd.f32 %v7128_v9, %v10460_v4  ;;  %v4677_v6 = vpop.f32.mrb[13].mxu0 }
 0x2e7   : > { %v5080_v30 = vmax.f32 %v5016_v25, 0.0  ;;  %v7521_v46 = vadd.f32 %v4677_v6, %v10462_v26 }
 0x2e8   : > { %5145 = vst [vmem:[%s10510_s6 + $0x58] sm:$0xff] %v5081_v41  ;;  %v5019_v42 = vadd.f32 %v7520_v53, %v10504_v37 }
 0x2e9   : > { %5144 = vst [vmem:[%s10510_s6 + $0x50] sm:$0xff] %v5080_v30  ;;  %v5018_v21 = vadd.f32 %v7521_v46, %v10504_v37  ;;  %v7131_v56 = vpop.f32.mrb[14].mxu0 }
 0x2ea   : > { %v5083_v16 = vmax.f32 %v5019_v42, 0.0  ;;  %v7522_v50 = vadd.f32 %v7131_v56, %v10464_v10  ;;  %v4687_v15 = vpop.f32.mrb[15].mxu0 }
 0x2eb   : > { %v5082_v5 = vmax.f32 %v5018_v21, 0.0  ;;  %v7523_v4 = vadd.f32 %v4687_v15, %v10466_v51 }
 0x2ec   : > { %5147 = vst [vmem:[%s10510_s6 + $0x68] sm:$0xff] %v5083_v16  ;;  %v5021_v45 = vadd.f32 %v7522_v50, %v10504_v37 }
 0x2ed   : > { %5146 = vst [vmem:[%s10510_s6 + $0x60] sm:$0xff] %v5082_v5  ;;  %v5020_v26 = vadd.f32 %v7523_v4, %v10504_v37  ;;  %v7134_v20 = vpop.f32.mrb[16].mxu0 }
 0x2ee   : > { %v5085_v31 = vmax.f32 %v5021_v45, 0.0  ;;  %v7524_v28 = vadd.f32 %v7134_v20, %v10468_v58  ;;  %v4697_v0 = vpop.f32.mrb[17].mxu0 }
 0x2ef   : > { %v5084_v19 = vmax.f32 %v5020_v26, 0.0  ;;  %v7525_v10 = vadd.f32 %v4697_v0, %v10470_v29 }
 0x2f0   : > { %5149 = vst [vmem:[%s10510_s6 + $0x78] sm:$0xff] %v5085_v31  ;;  %v5023_v54 = vadd.f32 %v7524_v28, %v10504_v37 }
 0x2f1   : > { %5148 = vst [vmem:[%s10510_s6 + $0x70] sm:$0xff] %v5084_v19  ;;  %v5022_v51 = vadd.f32 %v7525_v10, %v10504_v37  ;;  %v7137_v23 = vpop.f32.mrb[18].mxu0 }
 0x2f2   : > { %v5087_v13 = vmax.f32 %v5023_v54, 0.0  ;;  %v7526_v55 = vadd.f32 %v7137_v23, %v10472_v36  ;;  %v4707_v57 = vpop.f32.mrb[19].mxu0 }
 0x2f3   : > { %v5086_v14 = vmax.f32 %v5022_v51, 0.0  ;;  %v7527_v58 = vadd.f32 %v4707_v57, %v10474_v8 }
 0x2f4   : > { %5151 = vst [vmem:[%s10510_s6 + $0x88] sm:$0xff] %v5087_v13  ;;  %v5025_v24 = vadd.f32 %v7526_v55, %v10504_v37 }
 0x2f5   : > { %5150 = vst [vmem:[%s10510_s6 + $0x80] sm:$0xff] %v5086_v14  ;;  %v5024_v29 = vadd.f32 %v7527_v58, %v10504_v37  ;;  %v7140_v12 = vpop.f32.mrb[20].mxu0 }
 0x2f6   : > { %v5089_v47 = vmax.f32 %v5025_v24, 0.0  ;;  %v7528_v34 = vadd.f32 %v7140_v12, %v10476_v44  ;;  %v4717_v3 = vpop.f32.mrb[21].mxu0 }
 0x2f7   : > { %v5088_v11 = vmax.f32 %v5024_v29, 0.0  ;;  %v7529_v36 = vadd.f32 %v4717_v3, %v10478_v35 }
 0x2f8   : > { %5153 = vst [vmem:[%s10510_s6 + $0x98] sm:$0xff] %v5089_v47  ;;  %v5027_v27 = vadd.f32 %v7528_v34, %v10504_v37 }
 0x2f9   : > { %5152 = vst [vmem:[%s10510_s6 + $0x90] sm:$0xff] %v5088_v11  ;;  %v5026_v8 = vadd.f32 %v7529_v36, %v10504_v37  ;;  %v7143_v52 = vpop.f32.mrb[22].mxu0 }
 0x2fa   : > { %v5091_v62 = vmax.f32 %v5027_v27, 0.0  ;;  %v7530_v39 = vadd.f32 %v7143_v52, %v10480_v33  ;;  %v4727_v63 = vpop.f32.mrb[23].mxu0 }
 0x2fb   : > { %v5090_v59 = vmax.f32 %v5026_v8, 0.0  ;;  %v7531_v44 = vadd.f32 %v4727_v63, %v10482_v48 }
 0x2fc   : > { %5155 = vst [vmem:[%s10510_s6 + $0xa8] sm:$0xff] %v5091_v62  ;;  %v5029_v17 = vadd.f32 %v7530_v39, %v10504_v37 }
 0x2fd   : > { %5154 = vst [vmem:[%s10510_s6 + $0xa0] sm:$0xff] %v5090_v59  ;;  %v5028_v35 = vadd.f32 %v7531_v44, %v10504_v37  ;;  %v7146_v2 = vpop.f32.mrb[24].mxu0 }
 0x2fe   : > { %v5093_v43 = vmax.f32 %v5029_v17, 0.0  ;;  %v7532_v1 = vadd.f32 %v7146_v2, %v10484_v61  ;;  %v4737_v18 = vpop.f32.mrb[25].mxu0 }
 0x2ff   : > { %v5092_v25 = vmax.f32 %v5028_v35, 0.0  ;;  %v7533_v33 = vadd.f32 %v4737_v18, %v10486_v49 }
 0x300   : > { %5157 = vst [vmem:[%s10510_s6 + $0xb8] sm:$0xff] %v5093_v43  ;;  %v5031_v9 = vadd.f32 %v7532_v1, %v10504_v37 }
 0x301   : > { %5156 = vst [vmem:[%s10510_s6 + $0xb0] sm:$0xff] %v5092_v25  ;;  %v5030_v48 = vadd.f32 %v7533_v33, %v10504_v37  ;;  %v7149_v41 = vpop.f32.mrb[26].mxu0 }
 0x302   : > { %v5095_v53 = vmax.f32 %v5031_v9, 0.0  ;;  %v7534_v6 = vadd.f32 %v7149_v41, %v10488_v40  ;;  %v4747_v30 = vpop.f32.mrb[27].mxu0 }
 0x303   : > { %v5094_v46 = vmax.f32 %v5030_v48, 0.0  ;;  %v7535_v61 = vadd.f32 %v4747_v30, %v10490_v32 }
 0x304   : > { %5159 = vst [vmem:[%s10510_s6 + $0xc8] sm:$0xff] %v5095_v53  ;;  %v5033_v42 = vadd.f32 %v7534_v6, %v10504_v37 }
 0x305   : > { %5158 = vst [vmem:[%s10510_s6 + $0xc0] sm:$0xff] %v5094_v46  ;;  %v5032_v49 = vadd.f32 %v7535_v61, %v10504_v37  ;;  %v7152_v21 = vpop.f32.mrb[28].mxu0 }
 0x306   : > { %v5097_v56 = vmax.f32 %v5033_v42, 0.0  ;;  %v7536_v16 = vadd.f32 %v7152_v21, %v10492_v38  ;;  %v4757_v50 = vpop.f32.mrb[29].mxu0 }
 0x307   : > { %v5096_v15 = vmax.f32 %v5032_v49, 0.0  ;;  %v7537_v40 = vadd.f32 %v4757_v50, %v10494_v7 }
 0x308   : > { %5161 = vst [vmem:[%s10510_s6 + $0xd8] sm:$0xff] %v5097_v56  ;;  %v5035_v5 = vadd.f32 %v7536_v16, %v10504_v37 }
 0x309   : > { %5160 = vst [vmem:[%s10510_s6 + $0xd0] sm:$0xff] %v5096_v15  ;;  %v5034_v32 = vadd.f32 %v7537_v40, %v10504_v37  ;;  %v7155_v4 = vpop.f32.mrb[30].mxu0 }
 0x30a   : > { %v5099_v45 = vmax.f32 %v5035_v5, 0.0  ;;  %v7538_v26 = vadd.f32 %v7155_v4, %v10496_v60  ;;  %v4767_v20 = vpop.f32.mrb[31].mxu0 }
 0x30b   : > { %v5098_v31 = vmax.f32 %v5034_v32, 0.0  ;;  %v7539_v38 = vadd.f32 %v4767_v20, %v10498_v22 }
 0x30c   : > { %5163 = vst [vmem:[%s10510_s6 + $0xe8] sm:$0xff] %v5099_v45  ;;  %v5037_v28 = vadd.f32 %v7538_v26, %v10504_v37  ;;  %v6646_v7 = vpop.f32.mrb[32].mxu1 }
 0x30d   : > { %5162 = vst [vmem:[%s10510_s6 + $0xe0] sm:$0xff] %v5098_v31  ;;  %v5036_v0 = vadd.f32 %v7539_v38, %v10504_v37  ;;  %v7158_v19 = vpop.f32.mrb[32].mxu0  ;;  %v2933_v10 = vpop.f32.mrb[33].mxu1 }
 0x30e   : > { %v5101_v54 = vmax.f32 %v5037_v28, 0.0  ;;  %v7540_v51 = vadd.f32 %v7158_v19, %v6646_v7  ;;  %v4777_v23 = vpop.f32.mrb[33].mxu0 }
 0x30f   : > { %v5100_v60 = vmax.f32 %v5036_v0, 0.0  ;;  %v7541_v13 = vadd.f32 %v4777_v23, %v2933_v10 }
 0x310   : > { %5165 = vst [vmem:[%s10510_s6 + $0xf8] sm:$0xff] %v5101_v54  ;;  %v5039_v22 = vadd.f32 %v7540_v51, %v10504_v37  ;;  %v6649_v55 = vpop.f32.mrb[34].mxu1 }
 0x311   : > { %5164 = vst [vmem:[%s10510_s6 + $0xf0] sm:$0xff] %v5100_v60  ;;  %v5038_v57 = vadd.f32 %v7541_v13, %v10504_v37  ;;  %v7161_v14 = vpop.f32.mrb[34].mxu0  ;;  %v2943_v58 = vpop.f32.mrb[35].mxu1 }
 0x312   : > { %v5103_v24 = vmax.f32 %v5039_v22, 0.0  ;;  %v7542_v29 = vadd.f32 %v7161_v14, %v6649_v55  ;;  %v4787_v12 = vpop.f32.mrb[35].mxu0 }
 0x313   : > { %v5102_v47 = vmax.f32 %v5038_v57, 0.0  ;;  %v7543_v34 = vadd.f32 %v4787_v12, %v2943_v58 }
 0x314   : > { %5167 = vst [vmem:[%s10510_s6 + $0x108] sm:$0xff] %v5103_v24  ;;  %v5041_v3 = vadd.f32 %v7542_v29, %v10504_v37  ;;  %v6652_v11 = vpop.f32.mrb[36].mxu1 }
 0x315   : > { %5166 = vst [vmem:[%s10510_s6 + $0x100] sm:$0xff] %v5102_v47  ;;  %v5040_v36 = vadd.f32 %v7543_v34, %v10504_v37  ;;  %v7164_v27 = vpop.f32.mrb[36].mxu0  ;;  %v2953_v8 = vpop.f32.mrb[37].mxu1 }
 0x316   : > { %v5105_v52 = vmax.f32 %v5041_v3, 0.0  ;;  %v7544_v62 = vadd.f32 %v7164_v27, %v6652_v11  ;;  %v4797_v39 = vpop.f32.mrb[37].mxu0 }
 0x317   : > { %v5104_v63 = vmax.f32 %v5040_v36, 0.0  ;;  %v7545_v59 = vadd.f32 %v4797_v39, %v2953_v8 }
 0x318   : > { %5169 = vst [vmem:[%s10510_s6 + $0x118] sm:$0xff] %v5105_v52  ;;  %v5043_v44 = vadd.f32 %v7544_v62, %v10504_v37  ;;  %v6655_v17 = vpop.f32.mrb[38].mxu1 }
 0x319   : > { %5168 = vst [vmem:[%s10510_s6 + $0x110] sm:$0xff] %v5104_v63  ;;  %v5042_v35 = vadd.f32 %v7545_v59, %v10504_v37  ;;  %v7167_v2 = vpop.f32.mrb[38].mxu0  ;;  %v2963_v43 = vpop.f32.mrb[39].mxu1 }
 0x31a   : > { %v5107_v1 = vmax.f32 %v5043_v44, 0.0  ;;  %v7546_v18 = vadd.f32 %v7167_v2, %v6655_v17  ;;  %v4807_v25 = vpop.f32.mrb[39].mxu0 }
 0x31b   : > { %v5106_v33 = vmax.f32 %v5042_v35, 0.0  ;;  %v7547_v9 = vadd.f32 %v4807_v25, %v2963_v43 }
 0x31c   : > { %5171 = vst [vmem:[%s10510_s6 + $0x128] sm:$0xff] %v5107_v1  ;;  %v5045_v48 = vadd.f32 %v7546_v18, %v10504_v37  ;;  %v6658_v41 = vpop.f32.mrb[40].mxu1 }
 0x31d   : > { %5170 = vst [vmem:[%s10510_s6 + $0x120] sm:$0xff] %v5106_v33  ;;  %v5044_v53 = vadd.f32 %v7547_v9, %v10504_v37  ;;  %v7170_v6 = vpop.f32.mrb[40].mxu0  ;;  %v2973_v30 = vpop.f32.mrb[41].mxu1 }
 0x31e   : > { %v5109_v46 = vmax.f32 %v5045_v48, 0.0  ;;  %v7548_v61 = vadd.f32 %v7170_v6, %v6658_v41  ;;  %v4817_v42 = vpop.f32.mrb[41].mxu0 }
 0x31f   : > { %v5108_v49 = vmax.f32 %v5044_v53, 0.0  ;;  %v7549_v21 = vadd.f32 %v4817_v42, %v2973_v30 }
 0x320   : > { %5173 = vst [vmem:[%s10510_s6 + $0x138] sm:$0xff] %v5109_v46  ;;  %v5047_v56 = vadd.f32 %v7548_v61, %v10504_v37  ;;  %v6661_v16 = vpop.f32.mrb[42].mxu1 }
 0x321   : > { %5172 = vst [vmem:[%s10510_s6 + $0x130] sm:$0xff] %v5108_v49  ;;  %v5046_v50 = vadd.f32 %v7549_v21, %v10504_v37  ;;  %v7173_v15 = vpop.f32.mrb[42].mxu0  ;;  %v2983_v40 = vpop.f32.mrb[43].mxu1 }
 0x322   : > { %v5111_v5 = vmax.f32 %v5047_v56, 0.0  ;;  %v7550_v32 = vadd.f32 %v7173_v15, %v6661_v16  ;;  %v4827_v4 = vpop.f32.mrb[43].mxu0 }
 0x323   : > { %v5110_v45 = vmax.f32 %v5046_v50, 0.0  ;;  %v7551_v26 = vadd.f32 %v4827_v4, %v2983_v40 }
 0x324   : > { %5175 = vst [vmem:[%s10510_s6 + $0x148] sm:$0xff] %v5111_v5  ;;  %v5049_v20 = vadd.f32 %v7550_v32, %v10504_v37  ;;  %v6664_v31 = vpop.f32.mrb[44].mxu1 }
 0x325   : > { %5174 = vst [vmem:[%s10510_s6 + $0x140] sm:$0xff] %v5110_v45  ;;  %v5048_v38 = vadd.f32 %v7551_v26, %v10504_v37  ;;  %v7176_v28 = vpop.f32.mrb[44].mxu0  ;;  %v2993_v7 = vpop.f32.mrb[45].mxu1 }
 0x326   : > { %v5113_v0 = vmax.f32 %v5049_v20, 0.0  ;;  %v7552_v19 = vadd.f32 %v7176_v28, %v6664_v31  ;;  %v4837_v10 = vpop.f32.mrb[45].mxu0 }
 0x327   : > { %v5112_v54 = vmax.f32 %v5048_v38, 0.0  ;;  %v7553_v51 = vadd.f32 %v4837_v10, %v2993_v7 }
 0x328   : > { %5177 = vst [vmem:[%s10510_s6 + $0x158] sm:$0xff] %v5113_v0  ;;  %v5051_v23 = vadd.f32 %v7552_v19, %v10504_v37  ;;  %v6667_v60 = vpop.f32.mrb[46].mxu1 }
 0x329   : > { %5176 = vst [vmem:[%s10510_s6 + $0x150] sm:$0xff] %v5112_v54  ;;  %v5050_v13 = vadd.f32 %v7553_v51, %v10504_v37  ;;  %v7179_v22 = vpop.f32.mrb[46].mxu0  ;;  %v3003_v55 = vpop.f32.mrb[47].mxu1 }
 0x32a   : > { %v5115_v57 = vmax.f32 %v5051_v23, 0.0  ;;  %v7554_v14 = vadd.f32 %v7179_v22, %v6667_v60  ;;  %v4847_v58 = vpop.f32.mrb[47].mxu0 }
 0x32b   : > { %v5114_v24 = vmax.f32 %v5050_v13, 0.0  ;;  %v7555_v29 = vadd.f32 %v4847_v58, %v3003_v55 }
 0x32c   : > { %5179 = vst [vmem:[%s10510_s6 + $0x168] sm:$0xff] %v5115_v57  ;;  %v5053_v12 = vadd.f32 %v7554_v14, %v10504_v37  ;;  %v6670_v47 = vpop.f32.mrb[48].mxu1 }
 0x32d   : > { %5178 = vst [vmem:[%s10510_s6 + $0x160] sm:$0xff] %v5114_v24  ;;  %v5052_v34 = vadd.f32 %v7555_v29, %v10504_v37  ;;  %v7182_v3 = vpop.f32.mrb[48].mxu0  ;;  %v3013_v11 = vpop.f32.mrb[49].mxu1 }
 0x32e   : > { %v5117_v36 = vmax.f32 %v5053_v12, 0.0  ;;  %v7556_v27 = vadd.f32 %v7182_v3, %v6670_v47  ;;  %v4857_v8 = vpop.f32.mrb[49].mxu0 }
 0x32f   : > { %v5116_v52 = vmax.f32 %v5052_v34, 0.0  ;;  %v7557_v62 = vadd.f32 %v4857_v8, %v3013_v11 }
 0x330   : > { %5181 = vst [vmem:[%s10510_s6 + $0x178] sm:$0xff] %v5117_v36  ;;  %v5055_v39 = vadd.f32 %v7556_v27, %v10504_v37  ;;  %v6673_v63 = vpop.f32.mrb[50].mxu1 }
 0x331   : > { %5180 = vst [vmem:[%s10510_s6 + $0x170] sm:$0xff] %v5116_v52  ;;  %v5054_v59 = vadd.f32 %v7557_v62, %v10504_v37  ;;  %v7185_v44 = vpop.f32.mrb[50].mxu0  ;;  %v3023_v17 = vpop.f32.mrb[51].mxu1 }
 0x332   : > { %v5119_v35 = vmax.f32 %v5055_v39, 0.0  ;;  %v7558_v2 = vadd.f32 %v7185_v44, %v6673_v63  ;;  %v4867_v43 = vpop.f32.mrb[51].mxu0 }
 0x333   : > { %v5118_v1 = vmax.f32 %v5054_v59, 0.0  ;;  %v7559_v18 = vadd.f32 %v4867_v43, %v3023_v17 }
 0x334   : > { %5183 = vst [vmem:[%s10510_s6 + $0x188] sm:$0xff] %v5119_v35  ;;  %v5057_v25 = vadd.f32 %v7558_v2, %v10504_v37  ;;  %v6676_v33 = vpop.f32.mrb[52].mxu1 }
 0x335   : > { %5182 = vst [vmem:[%s10510_s6 + $0x180] sm:$0xff] %v5118_v1  ;;  %v5056_v9 = vadd.f32 %v7559_v18, %v10504_v37  ;;  %v7188_v48 = vpop.f32.mrb[52].mxu0  ;;  %v3033_v41 = vpop.f32.mrb[53].mxu1 }
 0x336   : > { %v5121_v53 = vmax.f32 %v5057_v25, 0.0  ;;  %v7560_v6 = vadd.f32 %v7188_v48, %v6676_v33  ;;  %v4877_v30 = vpop.f32.mrb[53].mxu0 }
 0x337   : > { %v5120_v46 = vmax.f32 %v5056_v9, 0.0  ;;  %v7561_v61 = vadd.f32 %v4877_v30, %v3033_v41 }
 0x338   : > { %5185 = vst [vmem:[%s10510_s6 + $0x198] sm:$0xff] %v5121_v53  ;;  %v5059_v42 = vadd.f32 %v7560_v6, %v10504_v37  ;;  %v6679_v49 = vpop.f32.mrb[54].mxu1 }
 0x339   : > { %5184 = vst [vmem:[%s10510_s6 + $0x190] sm:$0xff] %v5120_v46  ;;  %v5058_v21 = vadd.f32 %v7561_v61, %v10504_v37  ;;  %v7191_v56 = vpop.f32.mrb[54].mxu0  ;;  %v3043_v16 = vpop.f32.mrb[55].mxu1 }
 0x33a   : > { %v5123_v50 = vmax.f32 %v5059_v42, 0.0  ;;  %v7562_v15 = vadd.f32 %v7191_v56, %v6679_v49  ;;  %v4887_v40 = vpop.f32.mrb[55].mxu0 }
 0x33b   : > { %v5122_v5 = vmax.f32 %v5058_v21, 0.0  ;;  %v7563_v32 = vadd.f32 %v4887_v40, %v3043_v16 }
 0x33c   : > { %5187 = vst [vmem:[%s10510_s6 + $0x1a8] sm:$0xff] %v5123_v50  ;;  %v5061_v4 = vadd.f32 %v7562_v15, %v10504_v37  ;;  %v6682_v45 = vpop.f32.mrb[56].mxu1 }
 0x33d   : > { %5186 = vst [vmem:[%s10510_s6 + $0x1a0] sm:$0xff] %v5122_v5  ;;  %v5060_v26 = vadd.f32 %v7563_v32, %v10504_v37  ;;  %v7194_v20 = vpop.f32.mrb[56].mxu0  ;;  %v3053_v31 = vpop.f32.mrb[57].mxu1 }
 0x33e   : > { %v5125_v38 = vmax.f32 %v5061_v4, 0.0  ;;  %v7564_v28 = vadd.f32 %v7194_v20, %v6682_v45  ;;  %v4897_v7 = vpop.f32.mrb[57].mxu0 }
 0x33f   : > { %v5124_v0 = vmax.f32 %v5060_v26, 0.0  ;;  %v7565_v19 = vadd.f32 %v4897_v7, %v3053_v31 }
 0x340   : > { %5189 = vst [vmem:[%s10510_s6 + $0x1b8] sm:$0xff] %v5125_v38  ;;  %v5063_v10 = vadd.f32 %v7564_v28, %v10504_v37  ;;  %v6685_v54 = vpop.f32.mrb[58].mxu1 }
 0x341   : > { %5188 = vst [vmem:[%s10510_s6 + $0x1b0] sm:$0xff] %v5124_v0  ;;  %v5062_v51 = vadd.f32 %v7565_v19, %v10504_v37  ;;  %v7197_v23 = vpop.f32.mrb[58].mxu0  ;;  %v3063_v60 = vpop.f32.mrb[59].mxu1 }
 0x342   : > { %v5127_v13 = vmax.f32 %v5063_v10, 0.0  ;;  %v7566_v22 = vadd.f32 %v7197_v23, %v6685_v54  ;;  %v4907_v55 = vpop.f32.mrb[59].mxu0 }
 0x343   : > { %v5126_v57 = vmax.f32 %v5062_v51, 0.0  ;;  %v7567_v14 = vadd.f32 %v4907_v55, %v3063_v60 }
 0x344   : > { %5191 = vst [vmem:[%s10510_s6 + $0x1c8] sm:$0xff] %v5127_v13  ;;  %v5065_v58 = vadd.f32 %v7566_v22, %v10504_v37  ;;  %v6688_v24 = vpop.f32.mrb[60].mxu1 }
 0x345   : > { %5190 = vst [vmem:[%s10510_s6 + $0x1c0] sm:$0xff] %v5126_v57  ;;  %v5064_v29 = vadd.f32 %v7567_v14, %v10504_v37  ;;  %v7200_v12 = vpop.f32.mrb[60].mxu0  ;;  %v3073_v47 = vpop.f32.mrb[61].mxu1 }
 0x346   : > { %v5129_v34 = vmax.f32 %v5065_v58, 0.0  ;;  %v7568_v3 = vadd.f32 %v7200_v12, %v6688_v24  ;;  %v4917_v11 = vpop.f32.mrb[61].mxu0 }
 0x347   : > { %v5128_v36 = vmax.f32 %v5064_v29, 0.0  ;;  %v7569_v27 = vadd.f32 %v4917_v11, %v3073_v47 }
 0x348   : > { %5193 = vst [vmem:[%s10510_s6 + $0x1d8] sm:$0xff] %v5129_v34  ;;  %v5067_v8 = vadd.f32 %v7568_v3, %v10504_v37  ;;  %v6691_v52 = vpop.f32.mrb[62].mxu1 }
 0x349   : > { %5192 = vst [vmem:[%s10510_s6 + $0x1d0] sm:$0xff] %v5128_v36  ;;  %v5066_v62 = vadd.f32 %v7569_v27, %v10504_v37  ;;  %v7203_v39 = vpop.f32.mrb[62].mxu0  ;;  %v3083_v63 = vpop.f32.mrb[63].mxu1 }
 0x34a   : > { %v5131_v59 = vmax.f32 %v5067_v8, 0.0  ;;  %v7570_v44 = vadd.f32 %v7203_v39, %v6691_v52  ;;  %v4927_v17 = vpop.f32.mrb[63].mxu0 }
 0x34b   : > { %v5130_v35 = vmax.f32 %v5066_v62, 0.0  ;;  %v7571_v2 = vadd.f32 %v4927_v17, %v3083_v63 }
 0x34c   : > { %5195 = vst [vmem:[%s10510_s6 + $0x1e8] sm:$0xff] %v5131_v59  ;;  %v5069_v43 = vadd.f32 %v7570_v44, %v10504_v37 }
 0x34d   : > { %5194 = vst [vmem:[%s10510_s6 + $0x1e0] sm:$0xff] %v5130_v35  ;;  %v5068_v1 = vadd.f32 %v7571_v2, %v10504_v37 }
 0x34e   : > { %v5133_v18 = vmax.f32 %v5069_v43, 0.0 }
 0x34f   : > { %v5132_v25 = vmax.f32 %v5068_v1, 0.0 }
 0x350   : > { %5197 = vst [vmem:[%s10510_s6 + $0x1f8] sm:$0xff] %v5133_v18 }
 0x351   : > { %5196 = vst [vmem:[%s10510_s6 + $0x1f0] sm:$0xff] %v5132_v25 }
 0x352   : > { %8159 = shalt.err (!%p8156_p5)
}
 0x353   : > { %s8160_s26 = scalar_lea.hbm %s10665_s11, 8192  ;;  %s8164_s28 = scalar_lea.hbm %s10722_s3, 16384 }
 0x354   : > { %p8161_p6 = scmp.ne.s32.totalorder %s10665_s11, %s8160_s26  ;;  %p8165_p10 = scmp.lt.u32.totalorder %s10665_s11, %s10722_s3 }
 0x355   : > { %p8166_p11 = scmp.lt.u32.totalorder %s8164_s28, %s8160_s26  ;;  %p8168_p13 = scmp.lt.u32.totalorder %s8160_s26, %s10665_s11 }
 0x356   : > { %p8162_p7 = pnand %p8161_p6, %p8289_p4 }
 0x357   : > { %p8167_p12 = por %p8166_p11, %p8165_p10 }
 0x358   : > { %p8163_p9 = pneg %p8162_p7 }
 0x359   : > { %p8169_p0 = por %p8168_p13, %p8167_p12 }
 0x35b   : > { %p8170_p1 = pnand %p8169_p0, %p8163_p9 }
 0x35d   : > { %8173 = shalt.err (!%p8170_p1)
}
 0x35e   : > { %s8227_s4 = smov 128   ;;  %s8228_s6 = smov 8  }
 0x35f   : > { %8021 = dma.vmem_to_hbm [thread:$0]  (%p8289_p4), %s10667_s8, 8192, %s10665_s11, %s10673_s15, %s8227_s4, %s8227_s4, %s8228_s6  }
 0x360 PF: > { %p8027_p2 = scmp.ge.s32.totalorder %s8224_s17, 2  ;;  %s5229_s7 = sand.u32 1, %s8204_s12  }
 0x361   : > { %s5230_s9 = scalar_lea.sflag [#allocation3], %s5229_s7 }
 0x362   : > { %p8024_p3 = pnand %p8027_p2, %p8296_p8 }
 0x364   : > { %8199 = dma.done.wait (!%p8024_p3), %s5230_s9, 8192  }
 0x365   : > { %8201 = vsyncadd (!%p8024_p3), %s5230_s9, 4294959104  ;;  %s16_s17 = sadd.s32 1, %s8224_s17   ;;  %s11354_s12 = smov %s8208_s13 }
 0x366   : > { %p13_p5 = scmp.ge.s32.totalorder %s16_s17, 4   ;;  %s11355_s13 = smov %s8212_s14 }
 0x367   : > { %s11356_s14 = smov %s8302_s25  ;;  %s11357_s15 = smov %s8220_s16 }
 0x368   : > { %s11358_s16 = smov %s11360_s20  ;;  %15 = sbr.rel (!%p13_p5) target bundleno = 4 (0x4), region = 73 }
 0x36f   :  { %5235 = vsyncpa [#allocation3], 1 }
 0x370   :  { %5237 = vsyncpa [#allocation3 + $0x1], 1 }

</bundles_post_ra>
